<compile_context>
chip_gen: v7x
topology: tpu7x:2x2x1
jax: 0.10.0
libtpu: 0.0.40
codegen_flags: <defaults>
</compile_context>

<pallas_src>
import functools
import math

import jax
import jax.numpy as jnp
from jax.experimental import pallas as pl
from jax.experimental.pallas import tpu as pltpu

BN_EPS = 1e-5


def _round_up(v, m):
    return ((v + m - 1) // m) * m


# --------------------------------------------------------------------------- #
# Shared forward math: runs on Pallas Refs (in-kernel) or jnp arrays (reference)
# --------------------------------------------------------------------------- #
def _forward_core(ws, bias, act, meta, temperature, wait=lambda name: None):
    """Folded-BN CVAE forward on packed slabs.

    ws   : dict of weight slabs. Stage slabs ("enc*"/"dec*") may be Refs or arrays
           (only static-sliced); "head"/"outw" must be loaded values / arrays.
    bias : (1, BT) f32 bias slab (Ref or array), every entry 128-lane aligned.
    act  : (B, act_width) f32 value laid out as [ x | c | 0-pad | eps | 0-pad ].
    """
    B = act.shape[0]
    lat = meta["latent_dim"]
    f32 = jnp.float32

    def get_b(name):
        off, width = meta["bias_offsets"][name]
        return bias[:, off:off + width]                       # (1, width) f32

    def dot(a, w):
        # bf16 operands on the MXU, f32 accumulation.
        return jnp.dot(a.astype(jnp.bfloat16), w, preferred_element_type=f32)

    def stage(h_in, slab, k, d, name):
        # Linear+BN(folded)+ReLU (+Dropout=id) then ResidualBlock (BN folded).
        h = jnp.maximum(dot(h_in, slab[0:k, :]) + get_b(name + "_b"), 0.0)
        t = jnp.maximum(dot(h, slab[k:k + d, :]) + get_b(name + "_ba"), 0.0)
        t = dot(t, slab[k + d:k + 2 * d, :]) + get_b(name + "_bb")
        return jnp.maximum(t + h, 0.0)

    # ----- encoder: x||c already lane-adjacent + zero-padded in the act slab -----
    h = act[:, 0:meta["enc_in_pad"]]
    hdims = meta["hidden_dims"]
    for i, d in enumerate(hdims):
        k = meta["enc_in_pad"] if i == 0 else hdims[i - 1]
        h = stage(h, ws[f"enc{i}"], k, d, f"enc{i}")

    # ----- latent heads (packed [mu | var]) + reparameterize -----
    muvar = dot(h, ws["head"]) + get_b("head")                # (B, 2*lat)
    mu, lv = muvar[:, :lat], muvar[:, lat:2 * lat]
    eps = act[:, meta["eps_off"]:meta["eps_off"] + lat]
    z = mu + eps * (jnp.exp(0.5 * lv) * temperature)

    # ----- decoder: z||c (zero-padded to dec_in_pad; weight rows padded to match) -----
    c = act[:, meta["input_dim"]:meta["input_dim"] + meta["n_classes"]]
    zpad = meta["dec_in_pad"] - lat - meta["n_classes"]
    da = jnp.concatenate([z, c, jnp.zeros((B, zpad), f32)], axis=1)
    ddims = meta["dec_dims"]
    for i, d in enumerate(ddims):
        wait(f"dec{i}")                                       # kernel: block on prefetch DMA
        k = meta["dec_in_pad"] if i == 0 else ddims[i - 1]
        da = stage(da, ws[f"dec{i}"], k, d, f"dec{i}")
    recon = dot(da, ws["outw"]) + get_b("out")                # (B, input_dim)

    # one lane-dense output slab: [ recon | mu | log_var | 0-pad ]
    opad = meta["out_width"] - meta["input_dim"] - 2 * lat
    return jnp.concatenate([recon, muvar, jnp.zeros((B, opad), f32)], axis=1)


# ------------------------------ Pallas kernel ------------------------------- #
def _cvae_kernel(act_ref, bias_ref,
                 enc0_ref, enc1_ref, enc2_ref, head_ref, outw_ref,
                 dec0_hbm, dec1_hbm, dec2_hbm,
                 out_ref,
                 dec0_buf, dec1_buf, dec2_buf, sem,
                 *, meta, temperature):
    # Kick off decoder-weight prefetch from HBM immediately so its DMA overlaps
    # with the encoder matmuls (encoder slabs arrive via the auto pipeline).
    copies = {
        "dec0": pltpu.make_async_copy(dec0_hbm, dec0_buf, sem.at[0]),
        "dec1": pltpu.make_async_copy(dec1_hbm, dec1_buf, sem.at[1]),
        "dec2": pltpu.make_async_copy(dec2_hbm, dec2_buf, sem.at[2]),
    }
    for cp in copies.values():
        cp.start()

    ws = {"enc0": enc0_ref, "enc1": enc1_ref, "enc2": enc2_ref,
          "head": head_ref[...], "outw": outw_ref[...],
          "dec0": dec0_buf, "dec1": dec1_buf, "dec2": dec2_buf}

    out_ref[...] = _forward_core(ws, bias_ref, act_ref[...], meta, temperature,
                                 wait=lambda name: copies[name].wait())


def _full_spec(shape):
    # Whole-array block (block_shape == array shape satisfies the (8,128) rule).
    return pl.BlockSpec(shape, lambda *_: (0,) * len(shape))


def _pack_act(meta, x, c, eps):
    # [ x | c | 0-pad to enc_in_pad | eps | 0-pad to 128 ]  -> one lane-dense input.
    B = x.shape[0]
    f32 = jnp.float32
    p1 = meta["enc_in_pad"] - meta["input_dim"] - meta["n_classes"]
    p2 = meta["act_width"] - meta["enc_in_pad"] - meta["latent_dim"]
    return jnp.concatenate(
        [x.astype(f32), c.astype(f32), jnp.zeros((B, p1), f32),
         eps.astype(f32), jnp.zeros((B, p2), f32)], axis=1)


def _split_out(meta, out):
    i, lat = meta["input_dim"], meta["latent_dim"]
    return out[:, :i], out[:, i:i + lat], out[:, i + lat:i + 2 * lat]


def cvae_forward(prepped, x, c, eps, temperature=1.0):
    """Single-launch fused CVAE forward. Returns (recon, mu, log_var).

    TODO(synk): in a serving loop, keep the bf16 weight slabs VMEM-resident across
    calls (cross-call prefetch / semaphore-future pattern) instead of re-streaming
    ~3.6 MB from HBM every invocation.
    """
    meta = prepped["meta"]
    ws = prepped["weights"]
    B = x.shape[0]

    act = _pack_act(meta, x, c, eps)
    inputs = [act, prepped["bias"],
              ws["enc0"], ws["enc1"], ws["enc2"], ws["head"], ws["outw"],
              ws["dec0"], ws["dec1"], ws["dec2"]]
    in_specs = ([_full_spec(a.shape) for a in inputs[:7]]
                + [pl.BlockSpec(memory_space=pl.ANY)] * 3)     # decoder slabs: manual DMA
    out_shape = jax.ShapeDtypeStruct((B, meta["out_width"]), jnp.float32)

    kernel = functools.partial(_cvae_kernel, meta=meta,
                               temperature=float(temperature))
    out = pl.pallas_call(
        kernel,
        grid=(1,),
        in_specs=in_specs,
        out_specs=_full_spec(out_shape.shape),
        out_shape=out_shape,
        scratch_shapes=[
            pltpu.VMEM(ws["dec0"].shape, jnp.bfloat16),
            pltpu.VMEM(ws["dec1"].shape, jnp.bfloat16),
            pltpu.VMEM(ws["dec2"].shape, jnp.bfloat16),
            pltpu.SemaphoreType.DMA((3,)),
        ],
        compiler_params=pltpu.CompilerParams(
            dimension_semantics=("arbitrary",),
            vmem_limit_bytes=32 * 1024 * 1024),
    )(*inputs)
    return _split_out(meta, out)


def cvae_forward_ref(prepped, x, c, eps, temperature=1.0):
    """Pure-JAX reference using the exact same folded/bf16/slab math as the kernel."""
    meta = prepped["meta"]
    out = _forward_core(prepped["weights"], prepped["bias"],
                        _pack_act(meta, x, c, eps), meta, float(temperature))
    return _split_out(meta, out)


# ------------------------------ parameter init ------------------------------ #
def init_cvae_params(key, input_dim, n_classes, latent_dim=20,
                     hidden_dims=(512, 256, 128)):
    """Raw (unfolded) f32 parameters mirroring the PyTorch module structure."""
    keys = iter(jax.random.split(key, 128))

    def lin(i, o):
        kw, kb = jax.random.split(next(keys))
        s = 1.0 / math.sqrt(i)
        return {"w": jax.random.uniform(kw, (i, o), jnp.float32, -s, s),
                "b": jax.random.uniform(kb, (1, o), jnp.float32, -s, s)}

    def bn(d):
        kg, kb, km, kv = jax.random.split(next(keys), 4)
        return {"gamma": 1.0 + 0.1 * jax.random.normal(kg, (1, d), jnp.float32),
                "beta": 0.1 * jax.random.normal(kb, (1, d), jnp.float32),
                "mean": 0.1 * jax.random.normal(km, (1, d), jnp.float32),
                "var": 1.0 + 0.1 * jnp.abs(jax.random.normal(kv, (1, d), jnp.float32))}

    def stage(prev, d):
        return {"lin": lin(prev, d), "bn": bn(d),
                "res": {"lin_a": lin(d, d), "bn_a": bn(d),
                        "lin_b": lin(d, d), "bn_b": bn(d)}}

    params = {"encoder": [], "decoder": []}
    prev = input_dim + n_classes
    for d in hidden_dims:
        params["encoder"].append(stage(prev, d))
        prev = d
    params["fc_mu"] = lin(hidden_dims[-1], latent_dim)
    params["fc_var"] = lin(hidden_dims[-1], latent_dim)
    prev = latent_dim + n_classes
    for d in reversed(hidden_dims):
        params["decoder"].append(stage(prev, d))
        prev = d
    params["decoder_out"] = lin(hidden_dims[0], input_dim)
    return params


def prepare_params(raw, input_dim, n_classes, latent_dim, hidden_dims):
    """Fold eval-mode BN into the Linears, pack per-stage bf16 weight slabs
    (first Linear rows zero-padded to a 16-multiple so x||c / z||c becomes one
    matmul), pack all biases into one 128-lane-aligned f32 slab."""
    hidden_dims = tuple(hidden_dims)
    dec_dims = tuple(reversed(hidden_dims))

    def fold(lin_p, bn_p):
        scale = bn_p["gamma"] * jax.lax.rsqrt(bn_p["var"] + BN_EPS)       # (1, d)
        return lin_p["w"] * scale, (lin_p["b"] - bn_p["mean"]) * scale + bn_p["beta"]

    enc_in = input_dim + n_classes
    dec_in = latent_dim + n_classes
    enc_in_pad = _round_up(enc_in, 16)
    dec_in_pad = _round_up(dec_in, 16)

    weights, bias_entries = {}, []

    def pack_stage(name, st, k_pad, k_real):
        w0, b0 = fold(st["lin"], st["bn"])
        wa, ba = fold(st["res"]["lin_a"], st["res"]["bn_a"])
        wb, bb = fold(st["res"]["lin_b"], st["res"]["bn_b"])
        if k_pad != k_real:
            w0 = jnp.pad(w0, ((0, k_pad - k_real), (0, 0)))
        weights[name] = jnp.concatenate([w0, wa, wb], axis=0).astype(jnp.bfloat16)
        bias_entries.extend([(name + "_b", b0), (name + "_ba", ba), (name + "_bb", bb)])

    prev, prev_pad = enc_in, enc_in_pad
    for i, d in enumerate(hidden_dims):
        pack_stage(f"enc{i}", raw["encoder"][i], prev_pad, prev)
        prev = prev_pad = d

    weights["head"] = jnp.concatenate(
        [raw["fc_mu"]["w"], raw["fc_var"]["w"]], axis=1).astype(jnp.bfloat16)
    bias_entries.append(
        ("head", jnp.concatenate([raw["fc_mu"]["b"], raw["fc_var"]["b"]], axis=1)))

    prev, prev_pad = dec_in, dec_in_pad
    for i, d in enumerate(dec_dims):
        pack_stage(f"dec{i}", raw["decoder"][i], prev_pad, prev)
        prev = prev_pad = d

    weights["outw"] = raw["decoder_out"]["w"].astype(jnp.bfloat16)
    bias_entries.append(("out", raw["decoder_out"]["b"]))

    # One lane-dense bias slab; every entry starts at a 128-aligned lane offset.
    offsets, parts, off = {}, [], 0
    for name, arr in bias_entries:
        w = arr.shape[1]
        wp = _round_up(w, 128)
        parts.append(jnp.pad(arr.astype(jnp.float32), ((0, 0), (0, wp - w))))
        offsets[name] = (off, w)
        off += wp
    bias_slab = jnp.concatenate(parts, axis=1)

    meta = dict(input_dim=input_dim, n_classes=n_classes, latent_dim=latent_dim,
                hidden_dims=hidden_dims, dec_dims=dec_dims,
                enc_in_pad=enc_in_pad, dec_in_pad=dec_in_pad, eps_off=enc_in_pad,
                act_width=_round_up(enc_in_pad + latent_dim, 128),
                out_width=_round_up(input_dim + 2 * latent_dim, 128),
                bias_offsets=offsets)
    return {"weights": weights, "bias": bias_slab, "meta": meta}


# --------------------- original (unfolded, f32) reference -------------------- #
def _ref_forward_raw(params, x, c, eps, temperature):
    """Eval-mode forward of the original PyTorch CVAE in plain f32 JAX."""
    def bn(h, p):
        return (h - p["mean"]) * jax.lax.rsqrt(p["var"] + BN_EPS) * p["gamma"] + p["beta"]

    def lin(h, p):
        return h @ p["w"] + p["b"]

    def res_block(h, p):
        out = jnp.maximum(bn(lin(h, p["lin_a"]), p["bn_a"]), 0.0)
        out = bn(lin(out, p["lin_b"]), p["bn_b"])
        return jnp.maximum(out + h, 0.0)

    def stage(h, st):
        h = jnp.maximum(bn(lin(h, st["lin"]), st["bn"]), 0.0)
        return res_block(h, st["res"])

    h = jnp.concatenate([x, c], axis=1)
    for st in params["encoder"]:
        h = stage(h, st)
    mu = lin(h, params["fc_mu"])
    lv = lin(h, params["fc_var"])
    z = mu + eps * (jnp.exp(0.5 * lv) * temperature)
    d = jnp.concatenate([z, c], axis=1)
    for st in params["decoder"]:
        d = stage(d, st)
    return lin(d, params["decoder_out"]), mu, lv


# ----------------------------------- main ----------------------------------- #
if __name__ == "__main__":
    B, input_dim, n_classes, latent_dim = 16, 64, 4, 20   # B=16 fills bf16 sublanes
    hidden_dims = (512, 256, 128)                          # module defaults

    key = jax.random.PRNGKey(0)
    kp, kx, kc, ke = jax.random.split(key, 4)

    raw = init_cvae_params(kp, input_dim, n_classes, latent_dim, hidden_dims)
    prepped = prepare_params(raw, input_dim, n_classes, latent_dim, hidden_dims)

    x = jax.random.normal(kx, (B, input_dim), jnp.float32)
    labels = jax.random.randint(kc, (B,), 0, n_classes)
    c = jax.nn.one_hot(labels, n_classes, dtype=jnp.float32)   # conditioning one-hots
    eps = jax.random.normal(ke, (B, latent_dim), jnp.float32)  # external randn_like(std)

    recon, mu, log_var = cvae_forward(prepped, x, c, eps, temperature=1.0)
    recon, mu, log_var = jax.block_until_ready((recon, mu, log_var))

    assert recon.shape == (B, input_dim)
    assert mu.shape == (B, latent_dim) and log_var.shape == (B, latent_dim)
    assert bool(jnp.all(jnp.isfinite(recon)))

    # (a) Pallas kernel vs identical folded/bf16 JAX math (tight tolerance).
    r_f, m_f, l_f = cvae_forward_ref(prepped, x, c, eps, 1.0)
    assert bool(jnp.allclose(mu, m_f, rtol=2e-2, atol=2e-2))
    assert bool(jnp.allclose(log_var, l_f, rtol=2e-2, atol=2e-2))
    assert bool(jnp.allclose(recon, r_f, rtol=2e-2, atol=2e-2))

    # (b) vs the original unfolded f32 eval-mode math (bounds BN-fold + bf16 error).
    r_r, m_r, l_r = _ref_forward_raw(raw, x, c, eps, 1.0)

    def rel_l2(a, b):
        return float(jnp.linalg.norm(a - b) / (jnp.linalg.norm(b) + 1e-12))

    assert rel_l2(mu, m_r) < 5e-2
    assert rel_l2(log_var, l_r) < 5e-2
    assert rel_l2(recon, r_r) < 1e-1

    print("KERNEL_OK")
</pallas_src>

<mosaic_0001>
module attributes {stable_mosaic.version = 11 : i64} {
  func.func @_cvae_kernel(%arg0: i32, %arg1: memref<16x128xf32, #tpu.memory_space<vmem>>, %arg2: memref<1x5632xf32, #tpu.memory_space<vmem>>, %arg3: memref<1104x512xbf16, #tpu.memory_space<vmem>>, %arg4: memref<1024x256xbf16, #tpu.memory_space<vmem>>, %arg5: memref<512x128xbf16, #tpu.memory_space<vmem>>, %arg6: memref<128x40xbf16, #tpu.memory_space<vmem>>, %arg7: memref<512x64xbf16, #tpu.memory_space<vmem>>, %arg8: memref<288x128xbf16, #tpu.memory_space<any>>, %arg9: memref<640x256xbf16, #tpu.memory_space<any>>, %arg10: memref<1280x512xbf16, #tpu.memory_space<any>>, %arg11: memref<16x128xf32, #tpu.memory_space<vmem>>, %arg12: memref<288x128xbf16, #tpu.memory_space<vmem>>, %arg13: memref<640x256xbf16, #tpu.memory_space<vmem>>, %arg14: memref<1280x512xbf16, #tpu.memory_space<vmem>>, %arg15: memref<3x!tpu.dma_semaphore, #tpu.memory_space<semaphore_mem>>) attributes {dimension_semantics = [#tpu.dimension_semantics<arbitrary>], iteration_bounds = array<i64: 1>, scalar_prefetch = 0 : i64, scratch_operands = 4 : i64, tpu.core_type = #tpu.core_type<tc>, window_params = [{pipeline_mode = #tpu.pipeline_mode<synchronous>, transform_indices = @transform_0, window_bounds = array<i64: 16, 128>}, {pipeline_mode = #tpu.pipeline_mode<synchronous>, transform_indices = @transform_1, window_bounds = array<i64: 1, 5632>}, {pipeline_mode = #tpu.pipeline_mode<synchronous>, transform_indices = @transform_2, window_bounds = array<i64: 1104, 512>}, {pipeline_mode = #tpu.pipeline_mode<synchronous>, transform_indices = @transform_3, window_bounds = array<i64: 1024, 256>}, {pipeline_mode = #tpu.pipeline_mode<synchronous>, transform_indices = @transform_4, window_bounds = array<i64: 512, 128>}, {pipeline_mode = #tpu.pipeline_mode<synchronous>, transform_indices = @transform_5, window_bounds = array<i64: 128, 40>}, {pipeline_mode = #tpu.pipeline_mode<synchronous>, transform_indices = @transform_6, window_bounds = array<i64: 512, 64>}, {}, {}, {}, {pipeline_mode = #tpu.pipeline_mode<synchronous>, transform_indices = @transform_10, window_bounds = array<i64: 16, 128>}]} {
    %c0_i32 = arith.constant 0 : i32
    %0 = tpu.memref_slice %arg15[%c0_i32] : memref<3x!tpu.dma_semaphore, #tpu.memory_space<semaphore_mem>> -> memref<1x!tpu.dma_semaphore, #tpu.memory_space<semaphore_mem>>
    %1 = tpu.memref_squeeze %0 : memref<1x!tpu.dma_semaphore, #tpu.memory_space<semaphore_mem>> -> memref<!tpu.dma_semaphore, #tpu.memory_space<semaphore_mem>>
    tpu.enqueue_dma source(%arg8 : memref<288x128xbf16, #tpu.memory_space<any>>) target(%arg12 : memref<288x128xbf16, #tpu.memory_space<vmem>>) target_semaphore(%1 : memref<!tpu.dma_semaphore, #tpu.memory_space<semaphore_mem>>)
    %c1_i32 = arith.constant 1 : i32
    %2 = tpu.memref_slice %arg15[%c1_i32] : memref<3x!tpu.dma_semaphore, #tpu.memory_space<semaphore_mem>> -> memref<1x!tpu.dma_semaphore, #tpu.memory_space<semaphore_mem>>
    %3 = tpu.memref_squeeze %2 : memref<1x!tpu.dma_semaphore, #tpu.memory_space<semaphore_mem>> -> memref<!tpu.dma_semaphore, #tpu.memory_space<semaphore_mem>>
    tpu.enqueue_dma source(%arg9 : memref<640x256xbf16, #tpu.memory_space<any>>) target(%arg13 : memref<640x256xbf16, #tpu.memory_space<vmem>>) target_semaphore(%3 : memref<!tpu.dma_semaphore, #tpu.memory_space<semaphore_mem>>)
    %c2_i32 = arith.constant 2 : i32
    %4 = tpu.memref_slice %arg15[%c2_i32] : memref<3x!tpu.dma_semaphore, #tpu.memory_space<semaphore_mem>> -> memref<1x!tpu.dma_semaphore, #tpu.memory_space<semaphore_mem>>
    %5 = tpu.memref_squeeze %4 : memref<1x!tpu.dma_semaphore, #tpu.memory_space<semaphore_mem>> -> memref<!tpu.dma_semaphore, #tpu.memory_space<semaphore_mem>>
    tpu.enqueue_dma source(%arg10 : memref<1280x512xbf16, #tpu.memory_space<any>>) target(%arg14 : memref<1280x512xbf16, #tpu.memory_space<vmem>>) target_semaphore(%5 : memref<!tpu.dma_semaphore, #tpu.memory_space<semaphore_mem>>)
    %c0 = arith.constant 0 : index
    %c0_0 = arith.constant 0 : index
    %6 = vector.load %arg6[%c0, %c0_0] : memref<128x40xbf16, #tpu.memory_space<vmem>>, vector<128x40xbf16>
    %c0_1 = arith.constant 0 : index
    %c0_2 = arith.constant 0 : index
    %7 = vector.load %arg7[%c0_1, %c0_2] : memref<512x64xbf16, #tpu.memory_space<vmem>>, vector<512x64xbf16>
    %c0_3 = arith.constant 0 : index
    %c0_4 = arith.constant 0 : index
    %8 = vector.load %arg1[%c0_3, %c0_4] : memref<16x128xf32, #tpu.memory_space<vmem>>, vector<16x128xf32>
    %9 = vector.extract_strided_slice %8 {offsets = [0, 0], sizes = [16, 80], strides = [1, 1]} : vector<16x128xf32> to vector<16x80xf32>
    %c0_5 = arith.constant 0 : index
    %c0_6 = arith.constant 0 : index
    %10 = vector.load %arg3[%c0_5, %c0_6] : memref<1104x512xbf16, #tpu.memory_space<vmem>>, vector<80x512xbf16>
    %11 = arith.truncf %9 : vector<16x80xf32> to vector<16x80xbf16>
    %cst = arith.constant dense<0.000000e+00> : vector<16x512xf32>
    %12 = tpu.matmul %11, %10, %cst {dimension_numbers = #tpu.dot_dimension_numbers<[1], [0], [0], [1], [0, 0, 1, 1], [], []>} : vector<16x80xbf16>, vector<80x512xbf16>, vector<16x512xf32> -> vector<16x512xf32>
    %c0_7 = arith.constant 0 : index
    %c0_8 = arith.constant 0 : index
    %13 = vector.load %arg2[%c0_7, %c0_8] : memref<1x5632xf32, #tpu.memory_space<vmem>>, vector<1x512xf32>
    %14 = vector.broadcast %13 : vector<1x512xf32> to vector<16x512xf32>
    %15 = arith.addf %12, %14 : vector<16x512xf32>
    %cst_9 = arith.constant 0.000000e+00 : f32
    %16 = vector.broadcast %cst_9 : f32 to vector<16x512xf32>
    %17 = arith.maximumf %15, %16 : vector<16x512xf32>
    %c80 = arith.constant 80 : index
    %c0_10 = arith.constant 0 : index
    %18 = vector.load %arg3[%c80, %c0_10] : memref<1104x512xbf16, #tpu.memory_space<vmem>>, vector<512x512xbf16>
    %19 = arith.truncf %17 : vector<16x512xf32> to vector<16x512xbf16>
    %cst_11 = arith.constant dense<0.000000e+00> : vector<16x512xf32>
    %20 = tpu.matmul %19, %18, %cst_11 {dimension_numbers = #tpu.dot_dimension_numbers<[1], [0], [0], [1], [0, 0, 1, 1], [], []>} : vector<16x512xbf16>, vector<512x512xbf16>, vector<16x512xf32> -> vector<16x512xf32>
    %c0_12 = arith.constant 0 : index
    %c512 = arith.constant 512 : index
    %21 = vector.load %arg2[%c0_12, %c512] : memref<1x5632xf32, #tpu.memory_space<vmem>>, vector<1x512xf32>
    %22 = vector.broadcast %21 : vector<1x512xf32> to vector<16x512xf32>
    %23 = arith.addf %20, %22 : vector<16x512xf32>
    %cst_13 = arith.constant 0.000000e+00 : f32
    %24 = vector.broadcast %cst_13 : f32 to vector<16x512xf32>
    %25 = arith.maximumf %23, %24 : vector<16x512xf32>
    %c592 = arith.constant 592 : index
    %c0_14 = arith.constant 0 : index
    %26 = vector.load %arg3[%c592, %c0_14] : memref<1104x512xbf16, #tpu.memory_space<vmem>>, vector<512x512xbf16>
    %27 = arith.truncf %25 : vector<16x512xf32> to vector<16x512xbf16>
    %cst_15 = arith.constant dense<0.000000e+00> : vector<16x512xf32>
    %28 = tpu.matmul %27, %26, %cst_15 {dimension_numbers = #tpu.dot_dimension_numbers<[1], [0], [0], [1], [0, 0, 1, 1], [], []>} : vector<16x512xbf16>, vector<512x512xbf16>, vector<16x512xf32> -> vector<16x512xf32>
    %c0_16 = arith.constant 0 : index
    %c1024 = arith.constant 1024 : index
    %29 = vector.load %arg2[%c0_16, %c1024] : memref<1x5632xf32, #tpu.memory_space<vmem>>, vector<1x512xf32>
    %30 = vector.broadcast %29 : vector<1x512xf32> to vector<16x512xf32>
    %31 = arith.addf %28, %30 : vector<16x512xf32>
    %32 = arith.addf %31, %17 : vector<16x512xf32>
    %cst_17 = arith.constant 0.000000e+00 : f32
    %33 = vector.broadcast %cst_17 : f32 to vector<16x512xf32>
    %34 = arith.maximumf %32, %33 : vector<16x512xf32>
    %c0_18 = arith.constant 0 : index
    %c0_19 = arith.constant 0 : index
    %35 = vector.load %arg4[%c0_18, %c0_19] : memref<1024x256xbf16, #tpu.memory_space<vmem>>, vector<512x256xbf16>
    %36 = arith.truncf %34 : vector<16x512xf32> to vector<16x512xbf16>
    %cst_20 = arith.constant dense<0.000000e+00> : vector<16x256xf32>
    %37 = tpu.matmul %36, %35, %cst_20 {dimension_numbers = #tpu.dot_dimension_numbers<[1], [0], [0], [1], [0, 0, 1, 1], [], []>} : vector<16x512xbf16>, vector<512x256xbf16>, vector<16x256xf32> -> vector<16x256xf32>
    %c0_21 = arith.constant 0 : index
    %c1536 = arith.constant 1536 : index
    %38 = vector.load %arg2[%c0_21, %c1536] : memref<1x5632xf32, #tpu.memory_space<vmem>>, vector<1x256xf32>
    %39 = vector.broadcast %38 : vector<1x256xf32> to vector<16x256xf32>
    %40 = arith.addf %37, %39 : vector<16x256xf32>
    %cst_22 = arith.constant 0.000000e+00 : f32
    %41 = vector.broadcast %cst_22 : f32 to vector<16x256xf32>
    %42 = arith.maximumf %40, %41 : vector<16x256xf32>
    %c512_23 = arith.constant 512 : index
    %c0_24 = arith.constant 0 : index
    %43 = vector.load %arg4[%c512_23, %c0_24] : memref<1024x256xbf16, #tpu.memory_space<vmem>>, vector<256x256xbf16>
    %44 = arith.truncf %42 : vector<16x256xf32> to vector<16x256xbf16>
    %cst_25 = arith.constant dense<0.000000e+00> : vector<16x256xf32>
    %45 = tpu.matmul %44, %43, %cst_25 {dimension_numbers = #tpu.dot_dimension_numbers<[1], [0], [0], [1], [0, 0, 1, 1], [], []>} : vector<16x256xbf16>, vector<256x256xbf16>, vector<16x256xf32> -> vector<16x256xf32>
    %c0_26 = arith.constant 0 : index
    %c1792 = arith.constant 1792 : index
    %46 = vector.load %arg2[%c0_26, %c1792] : memref<1x5632xf32, #tpu.memory_space<vmem>>, vector<1x256xf32>
    %47 = vector.broadcast %46 : vector<1x256xf32> to vector<16x256xf32>
    %48 = arith.addf %45, %47 : vector<16x256xf32>
    %cst_27 = arith.constant 0.000000e+00 : f32
    %49 = vector.broadcast %cst_27 : f32 to vector<16x256xf32>
    %50 = arith.maximumf %48, %49 : vector<16x256xf32>
    %c768 = arith.constant 768 : index
    %c0_28 = arith.constant 0 : index
    %51 = vector.load %arg4[%c768, %c0_28] : memref<1024x256xbf16, #tpu.memory_space<vmem>>, vector<256x256xbf16>
    %52 = arith.truncf %50 : vector<16x256xf32> to vector<16x256xbf16>
    %cst_29 = arith.constant dense<0.000000e+00> : vector<16x256xf32>
    %53 = tpu.matmul %52, %51, %cst_29 {dimension_numbers = #tpu.dot_dimension_numbers<[1], [0], [0], [1], [0, 0, 1, 1], [], []>} : vector<16x256xbf16>, vector<256x256xbf16>, vector<16x256xf32> -> vector<16x256xf32>
    %c0_30 = arith.constant 0 : index
    %c2048 = arith.constant 2048 : index
    %54 = vector.load %arg2[%c0_30, %c2048] : memref<1x5632xf32, #tpu.memory_space<vmem>>, vector<1x256xf32>
    %55 = vector.broadcast %54 : vector<1x256xf32> to vector<16x256xf32>
    %56 = arith.addf %53, %55 : vector<16x256xf32>
    %57 = arith.addf %56, %42 : vector<16x256xf32>
    %cst_31 = arith.constant 0.000000e+00 : f32
    %58 = vector.broadcast %cst_31 : f32 to vector<16x256xf32>
    %59 = arith.maximumf %57, %58 : vector<16x256xf32>
    %c0_32 = arith.constant 0 : index
    %c0_33 = arith.constant 0 : index
    %60 = vector.load %arg5[%c0_32, %c0_33] : memref<512x128xbf16, #tpu.memory_space<vmem>>, vector<256x128xbf16>
    %61 = arith.truncf %59 : vector<16x256xf32> to vector<16x256xbf16>
    %cst_34 = arith.constant dense<0.000000e+00> : vector<16x128xf32>
    %62 = tpu.matmul %61, %60, %cst_34 {dimension_numbers = #tpu.dot_dimension_numbers<[1], [0], [0], [1], [0, 0, 1, 1], [], []>} : vector<16x256xbf16>, vector<256x128xbf16>, vector<16x128xf32> -> vector<16x128xf32>
    %c0_35 = arith.constant 0 : index
    %c2304 = arith.constant 2304 : index
    %63 = vector.load %arg2[%c0_35, %c2304] : memref<1x5632xf32, #tpu.memory_space<vmem>>, vector<1x128xf32>
    %64 = vector.broadcast %63 : vector<1x128xf32> to vector<16x128xf32>
    %65 = arith.addf %62, %64 : vector<16x128xf32>
    %cst_36 = arith.constant 0.000000e+00 : f32
    %66 = vector.broadcast %cst_36 : f32 to vector<16x128xf32>
    %67 = arith.maximumf %65, %66 : vector<16x128xf32>
    %c256 = arith.constant 256 : index
    %c0_37 = arith.constant 0 : index
    %68 = vector.load %arg5[%c256, %c0_37] : memref<512x128xbf16, #tpu.memory_space<vmem>>, vector<128x128xbf16>
    %69 = arith.truncf %67 : vector<16x128xf32> to vector<16x128xbf16>
    %cst_38 = arith.constant dense<0.000000e+00> : vector<16x128xf32>
    %70 = tpu.matmul %69, %68, %cst_38 {dimension_numbers = #tpu.dot_dimension_numbers<[1], [0], [0], [1], [0, 0, 1, 1], [], []>} : vector<16x128xbf16>, vector<128x128xbf16>, vector<16x128xf32> -> vector<16x128xf32>
    %c0_39 = arith.constant 0 : index
    %c2432 = arith.constant 2432 : index
    %71 = vector.load %arg2[%c0_39, %c2432] : memref<1x5632xf32, #tpu.memory_space<vmem>>, vector<1x128xf32>
    %72 = vector.broadcast %71 : vector<1x128xf32> to vector<16x128xf32>
    %73 = arith.addf %70, %72 : vector<16x128xf32>
    %cst_40 = arith.constant 0.000000e+00 : f32
    %74 = vector.broadcast %cst_40 : f32 to vector<16x128xf32>
    %75 = arith.maximumf %73, %74 : vector<16x128xf32>
    %c384 = arith.constant 384 : index
    %c0_41 = arith.constant 0 : index
    %76 = vector.load %arg5[%c384, %c0_41] : memref<512x128xbf16, #tpu.memory_space<vmem>>, vector<128x128xbf16>
    %77 = arith.truncf %75 : vector<16x128xf32> to vector<16x128xbf16>
    %cst_42 = arith.constant dense<0.000000e+00> : vector<16x128xf32>
    %78 = tpu.matmul %77, %76, %cst_42 {dimension_numbers = #tpu.dot_dimension_numbers<[1], [0], [0], [1], [0, 0, 1, 1], [], []>} : vector<16x128xbf16>, vector<128x128xbf16>, vector<16x128xf32> -> vector<16x128xf32>
    %c0_43 = arith.constant 0 : index
    %c2560 = arith.constant 2560 : index
    %79 = vector.load %arg2[%c0_43, %c2560] : memref<1x5632xf32, #tpu.memory_space<vmem>>, vector<1x128xf32>
    %80 = vector.broadcast %79 : vector<1x128xf32> to vector<16x128xf32>
    %81 = arith.addf %78, %80 : vector<16x128xf32>
    %82 = arith.addf %81, %67 : vector<16x128xf32>
    %cst_44 = arith.constant 0.000000e+00 : f32
    %83 = vector.broadcast %cst_44 : f32 to vector<16x128xf32>
    %84 = arith.maximumf %82, %83 : vector<16x128xf32>
    %85 = arith.truncf %84 : vector<16x128xf32> to vector<16x128xbf16>
    %cst_45 = arith.constant dense<0.000000e+00> : vector<16x40xf32>
    %86 = tpu.matmul %85, %6, %cst_45 {dimension_numbers = #tpu.dot_dimension_numbers<[1], [0], [0], [1], [0, 0, 1, 1], [], []>} : vector<16x128xbf16>, vector<128x40xbf16>, vector<16x40xf32> -> vector<16x40xf32>
    %c0_46 = arith.constant 0 : index
    %c2688 = arith.constant 2688 : index
    %87 = vector.load %arg2[%c0_46, %c2688] : memref<1x5632xf32, #tpu.memory_space<vmem>>, vector<1x40xf32>
    %88 = vector.broadcast %87 : vector<1x40xf32> to vector<16x40xf32>
    %89 = arith.addf %86, %88 : vector<16x40xf32>
    %90 = vector.extract_strided_slice %89 {offsets = [0, 0], sizes = [16, 20], strides = [1, 1]} : vector<16x40xf32> to vector<16x20xf32>
    %91 = vector.extract_strided_slice %89 {offsets = [0, 20], sizes = [16, 20], strides = [1, 1]} : vector<16x40xf32> to vector<16x20xf32>
    %92 = vector.extract_strided_slice %8 {offsets = [0, 80], sizes = [16, 20], strides = [1, 1]} : vector<16x128xf32> to vector<16x20xf32>
    %cst_47 = arith.constant 5.000000e-01 : f32
    %93 = vector.broadcast %cst_47 : f32 to vector<16x20xf32>
    %94 = arith.mulf %93, %91 : vector<16x20xf32>
    %95 = math.exp %94 : vector<16x20xf32>
    %cst_48 = arith.constant 1.000000e+00 : f32
    %96 = vector.broadcast %cst_48 : f32 to vector<16x20xf32>
    %97 = arith.mulf %95, %96 : vector<16x20xf32>
    %98 = arith.mulf %92, %97 : vector<16x20xf32>
    %99 = arith.addf %90, %98 : vector<16x20xf32>
    %100 = vector.extract_strided_slice %8 {offsets = [0, 64], sizes = [16, 4], strides = [1, 1]} : vector<16x128xf32> to vector<16x4xf32>
    %cst_49 = arith.constant 0.000000e+00 : f32
    %101 = vector.broadcast %cst_49 : f32 to vector<16x8xf32>
    %102 = tpu.concatenate %99, %100, %101 in 1 : vector<16x20xf32>, vector<16x4xf32>, vector<16x8xf32> -> vector<16x32xf32>
    %c0_i32_50 = arith.constant 0 : i32
    %103 = tpu.memref_slice %arg15[%c0_i32_50] : memref<3x!tpu.dma_semaphore, #tpu.memory_space<semaphore_mem>> -> memref<1x!tpu.dma_semaphore, #tpu.memory_space<semaphore_mem>>
    %104 = tpu.memref_squeeze %103 : memref<1x!tpu.dma_semaphore, #tpu.memory_space<semaphore_mem>> -> memref<!tpu.dma_semaphore, #tpu.memory_space<semaphore_mem>>
    tpu.wait_dma2 semaphore(%104 : memref<!tpu.dma_semaphore, #tpu.memory_space<semaphore_mem>>) src(%arg8 : memref<288x128xbf16, #tpu.memory_space<any>>) dst(%arg12 : memref<288x128xbf16, #tpu.memory_space<vmem>>)
    %c0_51 = arith.constant 0 : index
    %c0_52 = arith.constant 0 : index
    %105 = vector.load %arg12[%c0_51, %c0_52] : memref<288x128xbf16, #tpu.memory_space<vmem>>, vector<32x128xbf16>
    %106 = arith.truncf %102 : vector<16x32xf32> to vector<16x32xbf16>
    %cst_53 = arith.constant dense<0.000000e+00> : vector<16x128xf32>
    %107 = tpu.matmul %106, %105, %cst_53 {dimension_numbers = #tpu.dot_dimension_numbers<[1], [0], [0], [1], [0, 0, 1, 1], [], []>} : vector<16x32xbf16>, vector<32x128xbf16>, vector<16x128xf32> -> vector<16x128xf32>
    %c0_54 = arith.constant 0 : index
    %c2816 = arith.constant 2816 : index
    %108 = vector.load %arg2[%c0_54, %c2816] : memref<1x5632xf32, #tpu.memory_space<vmem>>, vector<1x128xf32>
    %109 = vector.broadcast %108 : vector<1x128xf32> to vector<16x128xf32>
    %110 = arith.addf %107, %109 : vector<16x128xf32>
    %cst_55 = arith.constant 0.000000e+00 : f32
    %111 = vector.broadcast %cst_55 : f32 to vector<16x128xf32>
    %112 = arith.maximumf %110, %111 : vector<16x128xf32>
    %c32 = arith.constant 32 : index
    %c0_56 = arith.constant 0 : index
    %113 = vector.load %arg12[%c32, %c0_56] : memref<288x128xbf16, #tpu.memory_space<vmem>>, vector<128x128xbf16>
    %114 = arith.truncf %112 : vector<16x128xf32> to vector<16x128xbf16>
    %cst_57 = arith.constant dense<0.000000e+00> : vector<16x128xf32>
    %115 = tpu.matmul %114, %113, %cst_57 {dimension_numbers = #tpu.dot_dimension_numbers<[1], [0], [0], [1], [0, 0, 1, 1], [], []>} : vector<16x128xbf16>, vector<128x128xbf16>, vector<16x128xf32> -> vector<16x128xf32>
    %c0_58 = arith.constant 0 : index
    %c2944 = arith.constant 2944 : index
    %116 = vector.load %arg2[%c0_58, %c2944] : memref<1x5632xf32, #tpu.memory_space<vmem>>, vector<1x128xf32>
    %117 = vector.broadcast %116 : vector<1x128xf32> to vector<16x128xf32>
    %118 = arith.addf %115, %117 : vector<16x128xf32>
    %cst_59 = arith.constant 0.000000e+00 : f32
    %119 = vector.broadcast %cst_59 : f32 to vector<16x128xf32>
    %120 = arith.maximumf %118, %119 : vector<16x128xf32>
    %c160 = arith.constant 160 : index
    %c0_60 = arith.constant 0 : index
    %121 = vector.load %arg12[%c160, %c0_60] : memref<288x128xbf16, #tpu.memory_space<vmem>>, vector<128x128xbf16>
    %122 = arith.truncf %120 : vector<16x128xf32> to vector<16x128xbf16>
    %cst_61 = arith.constant dense<0.000000e+00> : vector<16x128xf32>
    %123 = tpu.matmul %122, %121, %cst_61 {dimension_numbers = #tpu.dot_dimension_numbers<[1], [0], [0], [1], [0, 0, 1, 1], [], []>} : vector<16x128xbf16>, vector<128x128xbf16>, vector<16x128xf32> -> vector<16x128xf32>
    %c0_62 = arith.constant 0 : index
    %c3072 = arith.constant 3072 : index
    %124 = vector.load %arg2[%c0_62, %c3072] : memref<1x5632xf32, #tpu.memory_space<vmem>>, vector<1x128xf32>
    %125 = vector.broadcast %124 : vector<1x128xf32> to vector<16x128xf32>
    %126 = arith.addf %123, %125 : vector<16x128xf32>
    %127 = arith.addf %126, %112 : vector<16x128xf32>
    %cst_63 = arith.constant 0.000000e+00 : f32
    %128 = vector.broadcast %cst_63 : f32 to vector<16x128xf32>
    %129 = arith.maximumf %127, %128 : vector<16x128xf32>
    %c1_i32_64 = arith.constant 1 : i32
    %130 = tpu.memref_slice %arg15[%c1_i32_64] : memref<3x!tpu.dma_semaphore, #tpu.memory_space<semaphore_mem>> -> memref<1x!tpu.dma_semaphore, #tpu.memory_space<semaphore_mem>>
    %131 = tpu.memref_squeeze %130 : memref<1x!tpu.dma_semaphore, #tpu.memory_space<semaphore_mem>> -> memref<!tpu.dma_semaphore, #tpu.memory_space<semaphore_mem>>
    tpu.wait_dma2 semaphore(%131 : memref<!tpu.dma_semaphore, #tpu.memory_space<semaphore_mem>>) src(%arg9 : memref<640x256xbf16, #tpu.memory_space<any>>) dst(%arg13 : memref<640x256xbf16, #tpu.memory_space<vmem>>)
    %c0_65 = arith.constant 0 : index
    %c0_66 = arith.constant 0 : index
    %132 = vector.load %arg13[%c0_65, %c0_66] : memref<640x256xbf16, #tpu.memory_space<vmem>>, vector<128x256xbf16>
    %133 = arith.truncf %129 : vector<16x128xf32> to vector<16x128xbf16>
    %cst_67 = arith.constant dense<0.000000e+00> : vector<16x256xf32>
    %134 = tpu.matmul %133, %132, %cst_67 {dimension_numbers = #tpu.dot_dimension_numbers<[1], [0], [0], [1], [0, 0, 1, 1], [], []>} : vector<16x128xbf16>, vector<128x256xbf16>, vector<16x256xf32> -> vector<16x256xf32>
    %c0_68 = arith.constant 0 : index
    %c3200 = arith.constant 3200 : index
    %135 = vector.load %arg2[%c0_68, %c3200] : memref<1x5632xf32, #tpu.memory_space<vmem>>, vector<1x256xf32>
    %136 = vector.broadcast %135 : vector<1x256xf32> to vector<16x256xf32>
    %137 = arith.addf %134, %136 : vector<16x256xf32>
    %cst_69 = arith.constant 0.000000e+00 : f32
    %138 = vector.broadcast %cst_69 : f32 to vector<16x256xf32>
    %139 = arith.maximumf %137, %138 : vector<16x256xf32>
    %c128 = arith.constant 128 : index
    %c0_70 = arith.constant 0 : index
    %140 = vector.load %arg13[%c128, %c0_70] : memref<640x256xbf16, #tpu.memory_space<vmem>>, vector<256x256xbf16>
    %141 = arith.truncf %139 : vector<16x256xf32> to vector<16x256xbf16>
    %cst_71 = arith.constant dense<0.000000e+00> : vector<16x256xf32>
    %142 = tpu.matmul %141, %140, %cst_71 {dimension_numbers = #tpu.dot_dimension_numbers<[1], [0], [0], [1], [0, 0, 1, 1], [], []>} : vector<16x256xbf16>, vector<256x256xbf16>, vector<16x256xf32> -> vector<16x256xf32>
    %c0_72 = arith.constant 0 : index
    %c3456 = arith.constant 3456 : index
    %143 = vector.load %arg2[%c0_72, %c3456] : memref<1x5632xf32, #tpu.memory_space<vmem>>, vector<1x256xf32>
    %144 = vector.broadcast %143 : vector<1x256xf32> to vector<16x256xf32>
    %145 = arith.addf %142, %144 : vector<16x256xf32>
    %cst_73 = arith.constant 0.000000e+00 : f32
    %146 = vector.broadcast %cst_73 : f32 to vector<16x256xf32>
    %147 = arith.maximumf %145, %146 : vector<16x256xf32>
    %c384_74 = arith.constant 384 : index
    %c0_75 = arith.constant 0 : index
    %148 = vector.load %arg13[%c384_74, %c0_75] : memref<640x256xbf16, #tpu.memory_space<vmem>>, vector<256x256xbf16>
    %149 = arith.truncf %147 : vector<16x256xf32> to vector<16x256xbf16>
    %cst_76 = arith.constant dense<0.000000e+00> : vector<16x256xf32>
    %150 = tpu.matmul %149, %148, %cst_76 {dimension_numbers = #tpu.dot_dimension_numbers<[1], [0], [0], [1], [0, 0, 1, 1], [], []>} : vector<16x256xbf16>, vector<256x256xbf16>, vector<16x256xf32> -> vector<16x256xf32>
    %c0_77 = arith.constant 0 : index
    %c3712 = arith.constant 3712 : index
    %151 = vector.load %arg2[%c0_77, %c3712] : memref<1x5632xf32, #tpu.memory_space<vmem>>, vector<1x256xf32>
    %152 = vector.broadcast %151 : vector<1x256xf32> to vector<16x256xf32>
    %153 = arith.addf %150, %152 : vector<16x256xf32>
    %154 = arith.addf %153, %139 : vector<16x256xf32>
    %cst_78 = arith.constant 0.000000e+00 : f32
    %155 = vector.broadcast %cst_78 : f32 to vector<16x256xf32>
    %156 = arith.maximumf %154, %155 : vector<16x256xf32>
    %c2_i32_79 = arith.constant 2 : i32
    %157 = tpu.memref_slice %arg15[%c2_i32_79] : memref<3x!tpu.dma_semaphore, #tpu.memory_space<semaphore_mem>> -> memref<1x!tpu.dma_semaphore, #tpu.memory_space<semaphore_mem>>
    %158 = tpu.memref_squeeze %157 : memref<1x!tpu.dma_semaphore, #tpu.memory_space<semaphore_mem>> -> memref<!tpu.dma_semaphore, #tpu.memory_space<semaphore_mem>>
    tpu.wait_dma2 semaphore(%158 : memref<!tpu.dma_semaphore, #tpu.memory_space<semaphore_mem>>) src(%arg10 : memref<1280x512xbf16, #tpu.memory_space<any>>) dst(%arg14 : memref<1280x512xbf16, #tpu.memory_space<vmem>>)
    %c0_80 = arith.constant 0 : index
    %c0_81 = arith.constant 0 : index
    %159 = vector.load %arg14[%c0_80, %c0_81] : memref<1280x512xbf16, #tpu.memory_space<vmem>>, vector<256x512xbf16>
    %160 = arith.truncf %156 : vector<16x256xf32> to vector<16x256xbf16>
    %cst_82 = arith.constant dense<0.000000e+00> : vector<16x512xf32>
    %161 = tpu.matmul %160, %159, %cst_82 {dimension_numbers = #tpu.dot_dimension_numbers<[1], [0], [0], [1], [0, 0, 1, 1], [], []>} : vector<16x256xbf16>, vector<256x512xbf16>, vector<16x512xf32> -> vector<16x512xf32>
    %c0_83 = arith.constant 0 : index
    %c3968 = arith.constant 3968 : index
    %162 = vector.load %arg2[%c0_83, %c3968] : memref<1x5632xf32, #tpu.memory_space<vmem>>, vector<1x512xf32>
    %163 = vector.broadcast %162 : vector<1x512xf32> to vector<16x512xf32>
    %164 = arith.addf %161, %163 : vector<16x512xf32>
    %cst_84 = arith.constant 0.000000e+00 : f32
    %165 = vector.broadcast %cst_84 : f32 to vector<16x512xf32>
    %166 = arith.maximumf %164, %165 : vector<16x512xf32>
    %c256_85 = arith.constant 256 : index
    %c0_86 = arith.constant 0 : index
    %167 = vector.load %arg14[%c256_85, %c0_86] : memref<1280x512xbf16, #tpu.memory_space<vmem>>, vector<512x512xbf16>
    %168 = arith.truncf %166 : vector<16x512xf32> to vector<16x512xbf16>
    %cst_87 = arith.constant dense<0.000000e+00> : vector<16x512xf32>
    %169 = tpu.matmul %168, %167, %cst_87 {dimension_numbers = #tpu.dot_dimension_numbers<[1], [0], [0], [1], [0, 0, 1, 1], [], []>} : vector<16x512xbf16>, vector<512x512xbf16>, vector<16x512xf32> -> vector<16x512xf32>
    %c0_88 = arith.constant 0 : index
    %c4480 = arith.constant 4480 : index
    %170 = vector.load %arg2[%c0_88, %c4480] : memref<1x5632xf32, #tpu.memory_space<vmem>>, vector<1x512xf32>
    %171 = vector.broadcast %170 : vector<1x512xf32> to vector<16x512xf32>
    %172 = arith.addf %169, %171 : vector<16x512xf32>
    %cst_89 = arith.constant 0.000000e+00 : f32
    %173 = vector.broadcast %cst_89 : f32 to vector<16x512xf32>
    %174 = arith.maximumf %172, %173 : vector<16x512xf32>
    %c768_90 = arith.constant 768 : index
    %c0_91 = arith.constant 0 : index
    %175 = vector.load %arg14[%c768_90, %c0_91] : memref<1280x512xbf16, #tpu.memory_space<vmem>>, vector<512x512xbf16>
    %176 = arith.truncf %174 : vector<16x512xf32> to vector<16x512xbf16>
    %cst_92 = arith.constant dense<0.000000e+00> : vector<16x512xf32>
    %177 = tpu.matmul %176, %175, %cst_92 {dimension_numbers = #tpu.dot_dimension_numbers<[1], [0], [0], [1], [0, 0, 1, 1], [], []>} : vector<16x512xbf16>, vector<512x512xbf16>, vector<16x512xf32> -> vector<16x512xf32>
    %c0_93 = arith.constant 0 : index
    %c4992 = arith.constant 4992 : index
    %178 = vector.load %arg2[%c0_93, %c4992] : memref<1x5632xf32, #tpu.memory_space<vmem>>, vector<1x512xf32>
    %179 = vector.broadcast %178 : vector<1x512xf32> to vector<16x512xf32>
    %180 = arith.addf %177, %179 : vector<16x512xf32>
    %181 = arith.addf %180, %166 : vector<16x512xf32>
    %cst_94 = arith.constant 0.000000e+00 : f32
    %182 = vector.broadcast %cst_94 : f32 to vector<16x512xf32>
    %183 = arith.maximumf %181, %182 : vector<16x512xf32>
    %184 = arith.truncf %183 : vector<16x512xf32> to vector<16x512xbf16>
    %cst_95 = arith.constant dense<0.000000e+00> : vector<16x64xf32>
    %185 = tpu.matmul %184, %7, %cst_95 {dimension_numbers = #tpu.dot_dimension_numbers<[1], [0], [0], [1], [0, 0, 1, 1], [], []>} : vector<16x512xbf16>, vector<512x64xbf16>, vector<16x64xf32> -> vector<16x64xf32>
    %c0_96 = arith.constant 0 : index
    %c5504 = arith.constant 5504 : index
    %186 = vector.load %arg2[%c0_96, %c5504] : memref<1x5632xf32, #tpu.memory_space<vmem>>, vector<1x64xf32>
    %187 = vector.broadcast %186 : vector<1x64xf32> to vector<16x64xf32>
    %188 = arith.addf %185, %187 : vector<16x64xf32>
    %cst_97 = arith.constant 0.000000e+00 : f32
    %189 = vector.broadcast %cst_97 : f32 to vector<16x24xf32>
    %190 = tpu.concatenate %188, %89, %189 in 1 : vector<16x64xf32>, vector<16x40xf32>, vector<16x24xf32> -> vector<16x128xf32>
    %c0_98 = arith.constant 0 : index
    %c0_99 = arith.constant 0 : index
    %191 = vector.load %arg11[%c0_98, %c0_99] : memref<16x128xf32, #tpu.memory_space<vmem>>, vector<16x128xf32>
    tpu.vector_store %arg11[%c0_98, %c0_99], %190 {strides = array<i32>} : memref<16x128xf32, #tpu.memory_space<vmem>>, vector<16x128xf32>,
    return
  }
  func.func @transform_0(%arg0: i32) -> (i32, i32) {
    %c0_i32 = arith.constant 0 : i32
    %c0_i32_0 = arith.constant 0 : i32
    %c0_i32_1 = arith.constant 0 : i32
    return %c0_i32, %c0_i32_0 : i32, i32
  }
  func.func @transform_1(%arg0: i32) -> (i32, i32) {
    %c0_i32 = arith.constant 0 : i32
    %c0_i32_0 = arith.constant 0 : i32
    %c0_i32_1 = arith.constant 0 : i32
    return %c0_i32, %c0_i32_0 : i32, i32
  }
  func.func @transform_2(%arg0: i32) -> (i32, i32) {
    %c0_i32 = arith.constant 0 : i32
    %c0_i32_0 = arith.constant 0 : i32
    %c0_i32_1 = arith.constant 0 : i32
    return %c0_i32, %c0_i32_0 : i32, i32
  }
  func.func @transform_3(%arg0: i32) -> (i32, i32) {
    %c0_i32 = arith.constant 0 : i32
    %c0_i32_0 = arith.constant 0 : i32
    %c0_i32_1 = arith.constant 0 : i32
    return %c0_i32, %c0_i32_0 : i32, i32
  }
  func.func @transform_4(%arg0: i32) -> (i32, i32) {
    %c0_i32 = arith.constant 0 : i32
    %c0_i32_0 = arith.constant 0 : i32
    %c0_i32_1 = arith.constant 0 : i32
    return %c0_i32, %c0_i32_0 : i32, i32
  }
  func.func @transform_5(%arg0: i32) -> (i32, i32) {
    %c0_i32 = arith.constant 0 : i32
    %c0_i32_0 = arith.constant 0 : i32
    %c0_i32_1 = arith.constant 0 : i32
    return %c0_i32, %c0_i32_0 : i32, i32
  }
  func.func @transform_6(%arg0: i32) -> (i32, i32) {
    %c0_i32 = arith.constant 0 : i32
    %c0_i32_0 = arith.constant 0 : i32
    %c0_i32_1 = arith.constant 0 : i32
    return %c0_i32, %c0_i32_0 : i32, i32
  }
  func.func @transform_10(%arg0: i32) -> (i32, i32) {
    %c0_i32 = arith.constant 0 : i32
    %c0_i32_0 = arith.constant 0 : i32
    %c0_i32_1 = arith.constant 0 : i32
    return %c0_i32, %c0_i32_0 : i32, i32
  }
}

</mosaic_0001>

<bundles_post_ra>
// kernel: tpu_custom_call.1
= control target key start
LH: loop header
LB: loop body
LE: loop exit
PB: predicated region body
PF: predicated region fallthrough
CT: control target
= control target key end

     0   :  { %15 = vsyncpa [#allocation7], 0  ;;  %s8228_s0 = inlined_call_operand.hbm [shape: f32[16,128], index: 0, kind: input, shape index: {}]   ;;  %s8229_s1 = inlined_call_operand.hbm [shape: f32[1,5632], index: 1, kind: input, shape index: {}]   ;;  %s8230_s2 = inlined_call_operand.hbm [shape: bf16[1104,512], index: 2, kind: input, shape index: {}]   ;;  %s8231_s3 = inlined_call_operand.hbm [shape: bf16[1024,256], index: 3, kind: input, shape index: {}]   ;;  %s8232_s4 = inlined_call_operand.hbm [shape: bf16[512,128], index: 4, kind: input, shape index: {}]   ;;  %s8233_s5 = inlined_call_operand.vmem [shape: bf16[128,40], index: 5, kind: input, shape index: {}]   ;;  %s8234_s6 = inlined_call_operand.vmem [shape: bf16[512,64], index: 6, kind: input, shape index: {}]   ;;  %s8235_s7 = inlined_call_operand.hbm [shape: bf16[288,128], index: 7, kind: input, shape index: {}]   ;;  %s8236_s8 = inlined_call_operand.hbm [shape: bf16[640,256], index: 8, kind: input, shape index: {}]   ;;  %s8237_s9 = inlined_call_operand.hbm [shape: bf16[1280,512], index: 9, kind: input, shape index: {}]   ;;  %s8238_s10 = inlined_call_operand.hbm [shape: f32[16,128], index: 10, kind: output, shape index: {}]  }
   0x1   :  { %16 = vsyncpa [#allocation10], 0 }
   0x2   :  { %17 = vsyncpa [#allocation13], 0 }
   0x3   :  { %18 = vsyncpa [#allocation8], 0  ;;  %s7300_s13 = smov [#allocation9]   ;;  %s7132_s17 = scalar_lea.hbm %s8229_s1, 704 }
   0x4   :  { %s37_s14 = sshll.u32 %s7300_s13, 4  ;;  %p7133_p0 = scmp.ne.s32.totalorder %s8229_s1, %s7132_s17  ;;  %s38_s14 = int_to_ptr.vmem [resolvable:$true] %s37_s14 }
   0x5   :  { %p7136_p1 = scmp.lt.u32.totalorder %s7132_s17, %s8229_s1 }
   0x7   :  { %p7138_p2 = pnand %p7136_p1, %p7133_p0 }
   0x9   :  { %7141 = shalt.err (!%p7138_p2)
}
   0xa   :  { %s7142_s22 = scalar_lea.vmem %s38_s14, 704  ;;  %p7147_p4 = scmp.lt.s32.totalorder %s38_s14, %s38_s14 }
   0xb   :  { %p7143_p3 = scmp.ne.s32.totalorder %s38_s14, %s7142_s22  ;;  %p7148_p5 = scmp.lt.s32.totalorder %s7142_s22, %s7142_s22 }
   0xd   :  { %p7149_p6 = por %p7148_p5, %p7147_p4 }
   0xf   :  { %p7150_p7 = pnand %p7149_p6, %p7143_p3 }
  0x11   :  { %7153 = shalt.err (!%p7150_p7)
}
  0x12   :  { %40 = dma.hbm_to_vmem [thread:$0]  %s8229_s1, 704, %s38_s14, [#allocation10]  }
  0x13   :  { %s7301_s25 = smov [#allocation12]   ;;  %s7302_s27 = smov [#allocation6]  }
  0x14   :  { %s58_s26 = sshll.u32 %s7301_s25, 4  ;;  %s24_s28 = sshll.u32 %s7302_s27, 4  ;;  %s59_s26 = int_to_ptr.vmem [resolvable:$true] %s58_s26  ;;  %s25_s28 = int_to_ptr.vmem [resolvable:$true] %s24_s28 }
  0x15   :  { %s7154_s11 = scalar_lea.hbm %s8231_s3, 16384 }
  0x16   :  { %p7155_p8 = scmp.ne.s32.totalorder %s8231_s3, %s7154_s11  ;;  %p7158_p9 = scmp.lt.u32.totalorder %s7154_s11, %s8231_s3 }
  0x18   :  { %p7160_p10 = pnand %p7158_p9, %p7155_p8 }
  0x1a   :  { %7163 = shalt.err (!%p7160_p10)
}
  0x1b   :  { %s7164_s1 = scalar_lea.vmem %s59_s26, 16384  ;;  %p7169_p12 = scmp.lt.s32.totalorder %s59_s26, %s59_s26 }
  0x1c   :  { %p7165_p11 = scmp.ne.s32.totalorder %s59_s26, %s7164_s1  ;;  %p7170_p13 = scmp.lt.s32.totalorder %s7164_s1, %s7164_s1 }
  0x1e   :  { %p7171_p0 = por %p7170_p13, %p7169_p12 }
  0x20   :  { %p7172_p1 = pnand %p7171_p0, %p7165_p11 }
  0x22   :  { %7175 = shalt.err (!%p7172_p1)
}
  0x23   :  { %s7303_s14 = smov 128   ;;  %s7304_s17 = smov 8  }
  0x24   :  { %64 = dma.hbm_to_vmem [thread:$0]  %s8231_s3, 16384, %s59_s26, [#allocation13], %s7303_s14, %s7303_s14, %s7304_s17  }
  0x25   :  { %s7176_s22 = scalar_lea.hbm %s8228_s0, 256 }
  0x26   :  { %p7177_p2 = scmp.ne.s32.totalorder %s8228_s0, %s7176_s22  ;;  %p7180_p3 = scmp.lt.u32.totalorder %s7176_s22, %s8228_s0 }
  0x28   :  { %p7182_p4 = pnand %p7180_p3, %p7177_p2 }
  0x2a   :  { %7185 = shalt.err (!%p7182_p4)
}
  0x2b   :  { %s7186_s29 = scalar_lea.vmem %s25_s28, 256  ;;  %p7191_p6 = scmp.lt.s32.totalorder %s25_s28, %s25_s28 }
  0x2c   :  { %p7187_p5 = scmp.ne.s32.totalorder %s25_s28, %s7186_s29  ;;  %p7192_p7 = scmp.lt.s32.totalorder %s7186_s29, %s7186_s29 }
  0x2e   :  { %p7193_p8 = por %p7192_p7, %p7191_p6 }
  0x30   :  { %p7194_p9 = pnand %p7193_p8, %p7187_p5 }
  0x32   :  { %7197 = shalt.err (!%p7194_p9)
}
  0x33   :  { %30 = dma.hbm_to_vmem [thread:$0]  %s8228_s0, 256, %s25_s28, [#allocation7], %s7303_s14, %s7303_s14, %s7304_s17  }
  0x34   :  { %s7305_s30 = smov [#allocation11]   ;;  %s7198_s15 = scalar_lea.hbm %s8230_s2, 35328 }
  0x35   :  { %s46_s11 = sshll.u32 %s7305_s30, 4  ;;  %p7199_p10 = scmp.ne.s32.totalorder %s8230_s2, %s7198_s15  ;;  %s47_s11 = int_to_ptr.vmem [resolvable:$true] %s46_s11 }
  0x36   :  { %p7202_p11 = scmp.lt.u32.totalorder %s7198_s15, %s8230_s2 }
  0x38   :  { %p7204_p12 = pnand %p7202_p11, %p7199_p10 }
  0x3a   :  { %7207 = shalt.err (!%p7204_p12)
}
  0x3b   :  { %s7208_s20 = scalar_lea.vmem %s47_s11, 35328  ;;  %p7213_p0 = scmp.lt.s32.totalorder %s47_s11, %s47_s11 }
  0x3c   :  { %p7209_p13 = scmp.ne.s32.totalorder %s47_s11, %s7208_s20  ;;  %p7214_p1 = scmp.lt.s32.totalorder %s7208_s20, %s7208_s20 }
  0x3e   :  { %p7215_p2 = por %p7214_p1, %p7213_p0 }
  0x40   :  { %p7216_p3 = pnand %p7215_p2, %p7209_p13 }
  0x42   :  { %7219 = shalt.err (!%p7216_p3)
}
  0x43   :  { %s7306_s0 = smov 256   ;;  %s7307_s28 = smov 16  }
  0x44   :  { %52 = dma.hbm_to_vmem [thread:$0]  %s8230_s2, 35328, %s47_s11, [#allocation10], %s7306_s0, %s7306_s0, %s7307_s28  }
  0x45   :  { %s7308_s23 = smov [#allocation14]   ;;  %s7220_s29 = scalar_lea.hbm %s8232_s4, 4096 }
  0x46   :  { %s70_s24 = sshll.u32 %s7308_s23, 4  ;;  %p7221_p4 = scmp.ne.s32.totalorder %s8232_s4, %s7220_s29  ;;  %s71_s24 = int_to_ptr.vmem [resolvable:$true] %s70_s24 }
  0x47   :  { %p7224_p5 = scmp.lt.u32.totalorder %s7220_s29, %s8232_s4 }
  0x49   :  { %p7226_p6 = pnand %p7224_p5, %p7221_p4 }
  0x4b   :  { %7229 = shalt.err (!%p7226_p6)
}
  0x4c   :  { %s7230_s13 = scalar_lea.vmem %s71_s24, 4096  ;;  %p7235_p8 = scmp.lt.s32.totalorder %s71_s24, %s71_s24 }
  0x4d   :  { %p7231_p7 = scmp.ne.s32.totalorder %s71_s24, %s7230_s13  ;;  %p7236_p9 = scmp.lt.s32.totalorder %s7230_s13, %s7230_s13 }
  0x4f   :  { %p7237_p10 = por %p7236_p9, %p7235_p8 }
  0x51   :  { %p7238_p11 = pnand %p7237_p10, %p7231_p7 }
  0x53   :  { %7241 = shalt.err (!%p7238_p11)
}
  0x54   :  { %s7309_s2 = smov 64   ;;  %s7310_s11 = smov 4  }
  0x55   :  { %76 = dma.hbm_to_vmem [thread:$0]  %s8232_s4, 4096, %s71_s24, [#allocation13], %s7309_s2, %s7309_s2, %s7310_s11  }
  0x56   :  { %7286 = dma.done.wait [#allocation7], 256  }
  0x57   :  { %7287 = vsyncadd [#allocation7], 4294967040 }
  0x58   :  { %7288 = dma.done.wait [#allocation10], 36032  }
  0x59   :  { %7289 = vsyncadd [#allocation10], 4294931264 }
  0x5a   :  { %7290 = dma.done.wait [#allocation13], 20480  }
  0x5b   :  { %7291 = vsyncadd [#allocation13], 4294946816  ;;  %s113_s1 = sld [smem:[#allocation0]]   ;;  %125 = sst [smem:[#allocation21]] %s7306_s0  ;;  %v8239_v0 = vmov 0  }
  0x5c   :  { %440 = vmatprep.mubr.bf16.mxu0 %v8239_v0  ;;  %127 = sst [smem:[#allocation21 + $0x1]] %s7306_s0  ;;  %s7312_s18 = smov [#allocation2]  }
  0x5d   :  { %s104_s19 = sshll.u32 %s7312_s18, 4  ;;  %131 = sst [smem:[#allocation21 + $0x3]] %s7309_s2  ;;  %s105_s19 = int_to_ptr.vmem [resolvable:$true] %s104_s19 }
  0x5e   :  { %133 = sst [smem:[#allocation21 + $0x4]] %s7303_s14  ;;  %s7313_s4 = smov [#allocation3]  }
  0x5f   :  { %s7458_s20 = sshll.u32 %s7313_s4, 4  ;;  %137 = sst [smem:[#allocation21 + $0x6]] %s7303_s14  ;;  %s122_s20 = int_to_ptr.vmem [resolvable:$true] %s7458_s20 }
  0x60   :  { %139 = sst [smem:[#allocation21 + $0x7]] %s7309_s2  ;;  %s7314_s22 = smov 2  }
  0x61   :  { %s5660_s28 = sshll.u32 %s113_s1, 26  ;;  %141 = sst [smem:[#allocation21 + $0x8]] %s7310_s11 }
  0x62   :  { %s7464_s21 = sadd.s32 134217728, %s5660_s28  ;;  %129 = sst [smem:[#allocation21 + $0x2]] %s7314_s22 }
  0x63   :  { %s7242_s25 = scalar_lea.hbm %s8235_s7, 2304 }
  0x64   :  { %p7243_p12 = scmp.ne.s32.totalorder %s8235_s7, %s7242_s25  ;;  %p7246_p13 = scmp.lt.u32.totalorder %s7242_s25, %s8235_s7 }
  0x66   :  { %p7248_p0 = pnand %p7246_p13, %p7243_p12 }
  0x68   :  { %7251 = shalt.err (!%p7248_p0)  }
  0x69   :  { %s7252_s30 = scalar_lea.vmem %s105_s19, 2304  ;;  %p7257_p2 = scmp.lt.s32.totalorder %s105_s19, %s105_s19 }
  0x6a   :  { %p7253_p1 = scmp.ne.s32.totalorder %s105_s19, %s7252_s30  ;;  %p7258_p3 = scmp.lt.s32.totalorder %s7252_s30, %s7252_s30 }
  0x6c   :  { %p7259_p4 = por %p7258_p3, %p7257_p2 }
  0x6e   :  { %p7260_p5 = pnand %p7259_p4, %p7253_p1 }
  0x70   :  { %7263 = shalt.err (!%p7260_p5)  }
  0x71   :  { %107 = dma.hbm_to_vmem [thread:$0]  %s8235_s7, 2304, %s105_s19, [#allocation5]  ;;  %vm404_vm0 = vcmask 654336   ;;  %vm7322_vm1 = vmmov 0   ;;  %vm4001_vm2 = vcmask 162816   ;;  %vm4004_vm3 = vcmask 195584  }
  0x72   :  { %135 = sst [smem:[#allocation21 + $0x5]] %s7314_s22  ;;  %s7315_s15 = smov [#allocation5 + $0x1]  }
  0x73   :  { %s7316_s16 = smov [#allocation20]   ;;  %s7317_s4 = smov 512  }
  0x74   :  { %143 = dma.general %s8236_s8, 10240, %s122_s20, %s7315_s15, %s7316_s16, [#allocation21], %s7464_s21, 0  }
  0x75   :  { %160 = sst [smem:[#allocation23]] %s7317_s4  ;;  %s7318_s28 = smov [#allocation4]  }
  0x76   :  { %162 = sst [smem:[#allocation23 + $0x1]] %s7317_s4  ;;  %s156_s23 = sshll.u32 %s7318_s28, 4  ;;  %s157_s23 = int_to_ptr.vmem [resolvable:$true] %s156_s23 }
  0x77   :  { %164 = sst [smem:[#allocation23 + $0x2]] %s7310_s11  ;;  %s7319_s7 = smov [#allocation5 + $0x2]  }
  0x78   :  { %166 = sst [smem:[#allocation23 + $0x3]] %s7309_s2  ;;  %s7320_s8 = smov [#allocation22]  }
  0x79   :  { %168 = sst [smem:[#allocation23 + $0x4]] %s7303_s14  ;;  %s7324_s4 = smov 84  }
  0x7a   :  { %170 = sst [smem:[#allocation23 + $0x5]] %s7314_s22  ;;  %s7325_s28 = smov 48  }
  0x7b   :  { %172 = sst [smem:[#allocation23 + $0x6]] %s7306_s0 }
  0x7c   :  { %174 = sst [smem:[#allocation23 + $0x7]] %s7309_s2 }
  0x7d   :  { %176 = sst [smem:[#allocation23 + $0x8]] %s7310_s11 }
  0x7e   :  { %178 = dma.general %s8237_s9, 40960, %s157_s23, %s7319_s7, %s7320_s8, [#allocation23], %s7464_s21, 0  }
  0x7f   :  { %v7495_v1 = vld [vmem:[%s8234_s6] sm:$0xf]  ;;  %v7500_v2 = vld [vmem:[%s8234_s6 + $0x4] sm:$0xf]  ;;  %v7505_v3 = vld [vmem:[%s8234_s6 + $0x8] sm:$0xf] }
  0x80   :  { %v7510_v4 = vld [vmem:[%s8234_s6 + $0xc] sm:$0xf]  ;;  %v7515_v5 = vld [vmem:[%s8234_s6 + $0x10] sm:$0xf]  ;;  %v7520_v6 = vld [vmem:[%s8234_s6 + $0x14] sm:$0xf] }
  0x81   :  { %v7525_v7 = vld [vmem:[%s8234_s6 + $0x18] sm:$0xf]  ;;  %v7530_v8 = vld [vmem:[%s8234_s6 + $0x1c] sm:$0xf]  ;;  %v7535_v9 = vld [vmem:[%s8234_s6 + $0x20] sm:$0xf] }
  0x82   :  { %8256 = vst [vmem:[#allocation31_spill] sm:$0xff] %v7525_v7  ;;  %8257 = vst [vmem:[#allocation32_spill] sm:$0xff] %v7530_v8  ;;  %v7540_v10 = vld [vmem:[%s8234_s6 + $0x24] sm:$0xf]  ;;  %v7545_v11 = vld [vmem:[%s8234_s6 + $0x28] sm:$0xf] }
  0x83   :  { %8258 = vst [vmem:[#allocation33_spill] sm:$0xff] %v7535_v9  ;;  %8259 = vst [vmem:[#allocation34_spill] sm:$0xff] %v7540_v10  ;;  %v7550_v12 = vld [vmem:[%s8234_s6 + $0x2c] sm:$0xf]  ;;  %v7555_v13 = vld [vmem:[%s8234_s6 + $0x30] sm:$0xf] }
  0x84   :  { %8260 = vst [vmem:[#allocation35_spill] sm:$0xff] %v7545_v11  ;;  %8261 = vst [vmem:[#allocation36_spill] sm:$0xff] %v7550_v12  ;;  %v7560_v14 = vld [vmem:[%s8234_s6 + $0x34] sm:$0xf]  ;;  %v7565_v15 = vld [vmem:[%s8234_s6 + $0x38] sm:$0xf] }
  0x85   :  { %8262 = vst [vmem:[#allocation37_spill] sm:$0xff] %v7555_v13  ;;  %8263 = vst [vmem:[#allocation38_spill] sm:$0xff] %v7560_v14  ;;  %v7570_v16 = vld [vmem:[%s8234_s6 + $0x3c] sm:$0xf]  ;;  %v7575_v17 = vld [vmem:[%s8234_s6 + $0x40] sm:$0xf] }
  0x86   :  { %8264 = vst [vmem:[#allocation39_spill] sm:$0xff] %v7565_v15  ;;  %8265 = vst [vmem:[#allocation40_spill] sm:$0xff] %v7570_v16  ;;  %v7580_v18 = vld [vmem:[%s8234_s6 + $0x44] sm:$0xf]  ;;  %v7585_v19 = vld [vmem:[%s8234_s6 + $0x48] sm:$0xf] }
  0x87   :  { %v7590_v20 = vld [vmem:[%s8234_s6 + $0x4c] sm:$0xf]  ;;  %v7595_v21 = vld [vmem:[%s8234_s6 + $0x50] sm:$0xf]  ;;  %v7600_v22 = vld [vmem:[%s8234_s6 + $0x54] sm:$0xf] }
  0x88   :  { %v7605_v23 = vld [vmem:[%s8234_s6 + $0x58] sm:$0xf]  ;;  %v7610_v24 = vld [vmem:[%s8234_s6 + $0x5c] sm:$0xf]  ;;  %v7615_v25 = vld [vmem:[%s8234_s6 + $0x60] sm:$0xf] }
  0x89   :  { %8266 = vst [vmem:[#allocation41_spill] sm:$0xff] %v7605_v23  ;;  %8267 = vst [vmem:[#allocation42_spill] sm:$0xff] %v7610_v24  ;;  %v7620_v26 = vld [vmem:[%s8234_s6 + $0x64] sm:$0xf]  ;;  %v7625_v27 = vld [vmem:[%s8234_s6 + $0x68] sm:$0xf] }
  0x8a   :  { %8268 = vst [vmem:[#allocation43_spill] sm:$0xff] %v7615_v25  ;;  %8269 = vst [vmem:[#allocation44_spill] sm:$0xff] %v7620_v26  ;;  %v7630_v28 = vld [vmem:[%s8234_s6 + $0x6c] sm:$0xf]  ;;  %v7635_v29 = vld [vmem:[%s8234_s6 + $0x70] sm:$0xf] }
  0x8b   :  { %8270 = vst [vmem:[#allocation45_spill] sm:$0xff] %v7625_v27  ;;  %8271 = vst [vmem:[#allocation46_spill] sm:$0xff] %v7630_v28  ;;  %v7640_v30 = vld [vmem:[%s8234_s6 + $0x74] sm:$0xf]  ;;  %v7645_v31 = vld [vmem:[%s8234_s6 + $0x78] sm:$0xf] }
  0x8c   :  { %8272 = vst [vmem:[#allocation47_spill] sm:$0xff] %v7635_v29  ;;  %8273 = vst [vmem:[#allocation48_spill] sm:$0xff] %v7640_v30  ;;  %v7650_v32 = vld [vmem:[%s8234_s6 + $0x7c] sm:$0xf]  ;;  %v7655_v33 = vld [vmem:[%s8234_s6 + $0x80] sm:$0xf] }
  0x8d   :  { %8274 = vst [vmem:[#allocation49_spill] sm:$0xff] %v7645_v31  ;;  %8275 = vst [vmem:[#allocation50_spill] sm:$0xff] %v7650_v32  ;;  %v7660_v34 = vld [vmem:[%s8234_s6 + $0x84] sm:$0xf]  ;;  %v7665_v35 = vld [vmem:[%s8234_s6 + $0x88] sm:$0xf] }
  0x8e   :  { %v7670_v36 = vld [vmem:[%s8234_s6 + $0x8c] sm:$0xf]  ;;  %v7675_v37 = vld [vmem:[%s8234_s6 + $0x90] sm:$0xf]  ;;  %v7680_v38 = vld [vmem:[%s8234_s6 + $0x94] sm:$0xf] }
  0x8f   :  { %8276 = vst [vmem:[#allocation51_spill] sm:$0xff] %v7675_v37  ;;  %8277 = vst [vmem:[#allocation52_spill] sm:$0xff] %v7680_v38  ;;  %v7685_v39 = vld [vmem:[%s8234_s6 + $0x98] sm:$0xf]  ;;  %v7690_v40 = vld [vmem:[%s8234_s6 + $0x9c] sm:$0xf] }
  0x90   :  { %8278 = vst [vmem:[#allocation53_spill] sm:$0xff] %v7685_v39  ;;  %8279 = vst [vmem:[#allocation54_spill] sm:$0xff] %v7690_v40  ;;  %v7695_v41 = vld [vmem:[%s8234_s6 + $0xa0] sm:$0xf]  ;;  %v7700_v42 = vld [vmem:[%s8234_s6 + $0xa4] sm:$0xf] }
  0x91   :  { %8280 = vst [vmem:[#allocation55_spill] sm:$0xff] %v7695_v41  ;;  %8281 = vst [vmem:[#allocation56_spill] sm:$0xff] %v7700_v42  ;;  %v7705_v43 = vld [vmem:[%s8234_s6 + $0xa8] sm:$0xf]  ;;  %v7710_v44 = vld [vmem:[%s8234_s6 + $0xac] sm:$0xf] }
  0x92   :  { %8282 = vst [vmem:[#allocation57_spill] sm:$0xff] %v7705_v43  ;;  %8283 = vst [vmem:[#allocation58_spill] sm:$0xff] %v7710_v44  ;;  %v7715_v45 = vld [vmem:[%s8234_s6 + $0xb0] sm:$0xf]  ;;  %v7720_v46 = vld [vmem:[%s8234_s6 + $0xb4] sm:$0xf] }
  0x93   :  { %8284 = vst [vmem:[#allocation59_spill] sm:$0xff] %v7715_v45  ;;  %8285 = vst [vmem:[#allocation60_spill] sm:$0xff] %v7720_v46  ;;  %v7725_v47 = vld [vmem:[%s8234_s6 + $0xb8] sm:$0xf]  ;;  %v7730_v48 = vld [vmem:[%s8234_s6 + $0xbc] sm:$0xf] }
  0x94   :  { %8286 = vst [vmem:[#allocation61_spill] sm:$0xff] %v7725_v47  ;;  %8287 = vst [vmem:[#allocation62_spill] sm:$0xff] %v7730_v48  ;;  %v7735_v49 = vld [vmem:[%s8234_s6 + $0xc0] sm:$0xf]  ;;  %v7740_v50 = vld [vmem:[%s8234_s6 + $0xc4] sm:$0xf] }
  0x95   :  { %v7745_v51 = vld [vmem:[%s8234_s6 + $0xc8] sm:$0xf]  ;;  %v7750_v52 = vld [vmem:[%s8234_s6 + $0xcc] sm:$0xf]  ;;  %v7755_v53 = vld [vmem:[%s8234_s6 + $0xd0] sm:$0xf] }
  0x96   :  { %v7760_v54 = vld [vmem:[%s8234_s6 + $0xd4] sm:$0xf]  ;;  %v7765_v55 = vld [vmem:[%s8234_s6 + $0xd8] sm:$0xf]  ;;  %v7770_v56 = vld [vmem:[%s8234_s6 + $0xdc] sm:$0xf] }
  0x97   :  { %8288 = vst [vmem:[#allocation63_spill] sm:$0xff] %v7765_v55  ;;  %8289 = vst [vmem:[#allocation64_spill] sm:$0xff] %v7770_v56  ;;  %v7775_v57 = vld [vmem:[%s8234_s6 + $0xe0] sm:$0xf]  ;;  %v7780_v58 = vld [vmem:[%s8234_s6 + $0xe4] sm:$0xf] }
  0x98   :  { %8290 = vst [vmem:[#allocation65_spill] sm:$0xff] %v7775_v57  ;;  %8291 = vst [vmem:[#allocation66_spill] sm:$0xff] %v7780_v58  ;;  %v7785_v59 = vld [vmem:[%s8234_s6 + $0xe8] sm:$0xf]  ;;  %v7790_v60 = vld [vmem:[%s8234_s6 + $0xec] sm:$0xf] }
  0x99   :  { %8292 = vst [vmem:[#allocation67_spill] sm:$0xff] %v7785_v59  ;;  %8293 = vst [vmem:[#allocation68_spill] sm:$0xff] %v7790_v60  ;;  %v7795_v61 = vld [vmem:[%s8234_s6 + $0xf0] sm:$0xf]  ;;  %v7800_v62 = vld [vmem:[%s8234_s6 + $0xf4] sm:$0xf] }
  0x9a   :  { %8294 = vst [vmem:[#allocation69_spill] sm:$0xff] %v7795_v61  ;;  %8295 = vst [vmem:[#allocation70_spill] sm:$0xff] %v7800_v62  ;;  %v7805_v63 = vld [vmem:[%s8234_s6 + $0xf8] sm:$0xf]  ;;  %v7810_v0 = vld [vmem:[%s8234_s6 + $0xfc] sm:$0xf] }
  0x9b   :  { %8296 = vst [vmem:[#allocation71_spill] sm:$0xff] %v7805_v63  ;;  %8297 = vst [vmem:[#allocation72_spill] sm:$0xff] %v7810_v0  ;;  %v6480_v47 = vld [vmem:[#allocation11 + $0x4] ss:$16 sps:$4 sm:$0xff]   ;;  %v6482_v48 = vld [vmem:[#allocation11] ss:$16 sps:$4 sm:$0xff]  }
  0x9c   :  { %v6483_v15 = vld [vmem:[#allocation11 + $0x24] ss:$16 sps:$4 sm:$0xff]   ;;  %408 = vmatprep.subr.bf16.mxu0 %v6480_v47  ;;  %v6485_v16 = vld [vmem:[#allocation11 + $0x20] ss:$16 sps:$4 sm:$0xff]   ;;  %v6513_v0 = vld [vmem:[#allocation11 + $0xac] ss:$16 sps:$4 sm:$0xff]  }
  0x9d   :  { %409 = vmatpush1.bf16.msra.mxu0 %v6482_v48  ;;  %v6486_v31 = vld [vmem:[#allocation11 + $0x44] ss:$16 sps:$4 sm:$0xff]   ;;  %v6488_v32 = vld [vmem:[#allocation11 + $0x40] ss:$16 sps:$4 sm:$0xff]   ;;  %v6515_v62 = vld [vmem:[#allocation11 + $0xa8] ss:$16 sps:$4 sm:$0xff]   ;;  %1382 = vmatprep.subr.bf16.mxu1 %v6513_v0 }
  0x9e   :  { %410 = vmatprep.subr.bf16.mxu0 %v6483_v15  ;;  %v6489_v45 = vld [vmem:[#allocation11 + $0x64] ss:$16 sps:$4 sm:$0xff]   ;;  %v6491_v46 = vld [vmem:[#allocation11 + $0x60] ss:$16 sps:$4 sm:$0xff]   ;;  %v6497_v47 = vld [vmem:[#allocation11 + $0xc] ss:$16 sps:$4 sm:$0xff]   ;;  %1383 = vmatpush1.bf16.msra.mxu1 %v6515_v62 }
  0x9f   :  { %v6492_v63 = vld [vmem:[#allocation11 + $0x84] ss:$16 sps:$4 sm:$0xff]   ;;  %v6494_v13 = vld [vmem:[#allocation11 + $0x80] ss:$16 sps:$4 sm:$0xff]   ;;  %v6519_v15 = vld [vmem:[#allocation11 + $0xcc] ss:$16 sps:$4 sm:$0xff]  }
  0xa0   :  { %v259_v14 = vld [vmem:[#allocation6] sm:$0xff]  ;;  %v260_v61 = vld [vmem:[#allocation6 + $0x8] sm:$0xff]  ;;  %1384 = vmatprep.subr.bf16.mxu1 %v6519_v15 }
  0xa1   :  { %411 = vmatpush1.bf16.msra.mxu0 %v6485_v16  ;;  %v281_v48 = vpack.c.bf16 %v260_v61, %v259_v14  ;;  %v6521_v16 = vld [vmem:[#allocation11 + $0xc8] ss:$16 sps:$4 sm:$0xff]   ;;  %v6531_v0 = vld [vmem:[#allocation11 + $0x10c] ss:$16 sps:$4 sm:$0xff]   ;;  %v6542_v43 = vld [vmem:[#allocation11 + $0x144] ss:$16 sps:$4 sm:$0xff]  }
  0xa2   :  { %412 = vmatprep.subr.bf16.mxu0 %v6486_v31  ;;  %v6495_v31 = vld [vmem:[#allocation11 + $0x8] ss:$16 sps:$4 sm:$0xff]   ;;  %1385 = vmatpush1.bf16.msra.mxu1 %v6521_v16  ;;  %v6503_v14 = vld [vmem:[#allocation11 + $0x4c] ss:$16 sps:$4 sm:$0xff]   ;;  %v6630_v41 = vld [vmem:[#allocation11 + $0x320] ss:$16 sps:$4 sm:$0xff]  }
  0xa3   :  { %v6498_v29 = vld [vmem:[#allocation11 + $0x28] ss:$16 sps:$4 sm:$0xff]   ;;  %v6537_v62 = vld [vmem:[#allocation11 + $0x12c] ss:$16 sps:$4 sm:$0xff]   ;;  %v6798_v38 = vld [vmem:[#allocation11 + $0x6a0] ss:$16 sps:$4 sm:$0xff]  }
  0xa4   :  { %v6501_v61 = vld [vmem:[#allocation11 + $0x48] ss:$16 sps:$4 sm:$0xff]   ;;  %v6509_v30 = vld [vmem:[#allocation11 + $0x8c] ss:$16 sps:$4 sm:$0xff]  }
  0xa5   :  { %413 = vmatpush1.bf16.msra.mxu0 %v6488_v32  ;;  %v6500_v32 = vld [vmem:[#allocation11 + $0x2c] ss:$16 sps:$4 sm:$0xff]   ;;  %v6539_v15 = vld [vmem:[#allocation11 + $0x128] ss:$16 sps:$4 sm:$0xff]  }
  0xa6   :  { %414 = vmatprep.subr.bf16.mxu0 %v6489_v45  ;;  %v6525_v45 = vld [vmem:[#allocation11 + $0xec] ss:$16 sps:$4 sm:$0xff]   ;;  %v6504_v16 = vld [vmem:[#allocation11 + $0x68] ss:$16 sps:$4 sm:$0xff]  }
  0xa7   :  { %1386 = vmatprep.subr.bf16.mxu1 %v6525_v45  ;;  %v6507_v45 = vld [vmem:[#allocation11 + $0x88] ss:$16 sps:$4 sm:$0xff]   ;;  %v6629_v27 = vld [vmem:[#allocation11 + $0x30c] ss:$16 sps:$4 sm:$0xff]  }
  0xa8   :  { %v6609_v12 = vld [vmem:[#allocation11 + $0x2a8] ss:$16 sps:$4 sm:$0xff]  }
  0xa9   :  { %415 = vmatpush1.bf16.msra.mxu0 %v6491_v46  ;;  %v6527_v46 = vld [vmem:[#allocation11 + $0xe8] ss:$16 sps:$4 sm:$0xff]  }
  0xaa   :  { %416 = vmatprep.subr.bf16.mxu0 %v6492_v63  ;;  %v8298_v63 = vmov 0   ;;  %1387 = vmatpush1.bf16.msra.mxu1 %v6527_v46  ;;  %v6549_v46 = vld [vmem:[#allocation11 + $0x16c] ss:$16 sps:$4 sm:$0xff]   ;;  %v6615_v59 = vld [vmem:[#allocation11 + $0x2c8] ss:$16 sps:$4 sm:$0xff]  }
  0xab   :  { %1388 = vmatprep.subr.bf16.mxu1 %v6531_v0  ;;  %v6551_v0 = vld [vmem:[#allocation11 + $0x168] ss:$16 sps:$4 sm:$0xff]  }
  0xac   :  { %v6633_v42 = vld [vmem:[#allocation11 + $0x328] ss:$16 sps:$4 sm:$0xff]  }
  0xad   :  { %417 = vmatpush1.bf16.msra.mxu0 %v6494_v13  ;;  %v6533_v13 = vld [vmem:[#allocation11 + $0x108] ss:$16 sps:$4 sm:$0xff]  }
  0xae   :  { %451 = vmatprep.subr.bf16.mxu0 %v6497_v47  ;;  %v6506_v47 = vld [vmem:[#allocation11 + $0x6c] ss:$16 sps:$4 sm:$0xff]   ;;  %1389 = vmatpush1.bf16.msra.mxu1 %v6533_v13  ;;  %v6639_v10 = vld [vmem:[#allocation11 + $0x348] ss:$16 sps:$4 sm:$0xff]  }
  0xaf   :  { %1390 = vmatprep.subr.bf16.mxu1 %v6537_v62  ;;  %v6555_v13 = vld [vmem:[#allocation11 + $0x18c] ss:$16 sps:$4 sm:$0xff]   ;;  %v6557_v62 = vld [vmem:[#allocation11 + $0x188] ss:$16 sps:$4 sm:$0xff]  }
  0xb0   :  { %5684 = vmatmul.mubr.msk.bf16.vlgmr.msra.gmra.mrb[0].mxu0 %vm404_vm0, %v281_v48  ;;  %v6651_v57 = vld [vmem:[#allocation11 + $0x388] ss:$16 sps:$4 sm:$0xff]  }
  0xb1   :  { %452 = vmatpush1.bf16.msra.mxu0 %v6495_v31  ;;  %483 = vmatprep.mubr.bf16.mxu0 %v8298_v63  ;;  %v6543_v31 = vld [vmem:[#allocation11 + $0x14c] ss:$16 sps:$4 sm:$0xff]  }
  0xb2   :  { %453 = vmatprep.subr.bf16.mxu0 %v6500_v32  ;;  %1391 = vmatpush1.bf16.msra.mxu1 %v6539_v15  ;;  %v6545_v32 = vld [vmem:[#allocation11 + $0x148] ss:$16 sps:$4 sm:$0xff]   ;;  %v6561_v15 = vld [vmem:[#allocation11 + $0x1ac] ss:$16 sps:$4 sm:$0xff]  }
  0xb3   :  { %1392 = vmatprep.subr.bf16.mxu1 %v6543_v31  ;;  %v6522_v31 = vld [vmem:[#allocation11 + $0xe0] ss:$16 sps:$4 sm:$0xff]  }
  0xb5   :  { %454 = vmatpush1.bf16.msra.mxu0 %v6498_v29  ;;  %v6512_v29 = vld [vmem:[#allocation11 + $0xa4] ss:$16 sps:$4 sm:$0xff]  }
  0xb6   :  { %455 = vmatprep.subr.bf16.mxu0 %v6503_v14  ;;  %1393 = vmatpush1.bf16.msra.mxu1 %v6545_v32  ;;  %v6510_v14 = vld [vmem:[#allocation11 + $0xa0] ss:$16 sps:$4 sm:$0xff]   ;;  %v6567_v32 = vld [vmem:[#allocation11 + $0x1cc] ss:$16 sps:$4 sm:$0xff]  }
  0xb7   :  { %1394 = vmatprep.subr.bf16.mxu1 %v6549_v46  ;;  %v6528_v46 = vld [vmem:[#allocation11 + $0x100] ss:$16 sps:$4 sm:$0xff]  }
  0xb9   :  { %456 = vmatpush1.bf16.msra.mxu0 %v6501_v61  ;;  %v6518_v61 = vld [vmem:[#allocation11 + $0xc4] ss:$16 sps:$4 sm:$0xff]  }
  0xba   :  { %457 = vmatprep.subr.bf16.mxu0 %v6506_v47  ;;  %1395 = vmatpush1.bf16.msra.mxu1 %v6551_v0  ;;  %v6516_v47 = vld [vmem:[#allocation11 + $0xc0] ss:$16 sps:$4 sm:$0xff]   ;;  %v6573_v0 = vld [vmem:[#allocation11 + $0x1ec] ss:$16 sps:$4 sm:$0xff]  }
  0xbb   :  { %1396 = vmatprep.subr.bf16.mxu1 %v6555_v13  ;;  %v6534_v13 = vld [vmem:[#allocation11 + $0x120] ss:$16 sps:$4 sm:$0xff]  }
  0xbd   :  { %458 = vmatpush1.bf16.msra.mxu0 %v6504_v16  ;;  %v6524_v16 = vld [vmem:[#allocation11 + $0xe4] ss:$16 sps:$4 sm:$0xff]  }
  0xbe   :  { %459 = vmatprep.subr.bf16.mxu0 %v6509_v30  ;;  %1397 = vmatpush1.bf16.msra.mxu1 %v6557_v62  ;;  %v6563_v30 = vld [vmem:[#allocation11 + $0x1a8] ss:$16 sps:$4 sm:$0xff]  }
  0xbf   :  { %1398 = vmatprep.subr.bf16.mxu1 %v6561_v15  ;;  %v6581_v62 = vld [vmem:[#allocation11 + $0x208] ss:$16 sps:$4 sm:$0xff]   ;;  %v6585_v15 = vld [vmem:[#allocation11 + $0x22c] ss:$16 sps:$4 sm:$0xff]  }
  0xc1   :  { %460 = vmatpush1.bf16.msra.mxu0 %v6507_v45  ;;  %v6530_v45 = vld [vmem:[#allocation11 + $0x104] ss:$16 sps:$4 sm:$0xff]  }
  0xc2   :  { %1296 = vmatprep.subr.bf16.mxu0 %v6512_v29  ;;  %v6536_v29 = vld [vmem:[#allocation11 + $0x124] ss:$16 sps:$4 sm:$0xff]   ;;  %1399 = vmatpush1.bf16.msra.mxu1 %v6563_v30  ;;  %v6587_v30 = vld [vmem:[#allocation11 + $0x228] ss:$16 sps:$4 sm:$0xff]  }
  0xc3   :  { %1400 = vmatprep.subr.bf16.mxu1 %v6567_v32  ;;  %v6591_v32 = vld [vmem:[#allocation11 + $0x24c] ss:$16 sps:$4 sm:$0xff]  }
  0xc4   :  { %5685 = vmatmul.mubr.msk.bf16.vlgmr.msra.gmra.mrb[4].mxu0 %vm404_vm0, %v281_v48  ;;  %v6569_v48 = vld [vmem:[#allocation11 + $0x1c8] ss:$16 sps:$4 sm:$0xff]  }
  0xc5   :  { %1297 = vmatpush1.bf16.msra.mxu0 %v6510_v14  ;;  %v6575_v14 = vld [vmem:[#allocation11 + $0x1e8] ss:$16 sps:$4 sm:$0xff]  }
  0xc6   :  { %1298 = vmatprep.subr.bf16.mxu0 %v6518_v61  ;;  %v6579_v61 = vld [vmem:[#allocation11 + $0x20c] ss:$16 sps:$4 sm:$0xff]   ;;  %1401 = vmatpush1.bf16.msra.mxu1 %v6569_v48  ;;  %v6593_v48 = vld [vmem:[#allocation11 + $0x248] ss:$16 sps:$4 sm:$0xff]  }
  0xc7   :  { %1402 = vmatprep.subr.bf16.mxu1 %v6573_v0  ;;  %v6560_v0 = vld [vmem:[#allocation11 + $0x1a4] ss:$16 sps:$4 sm:$0xff]  }
  0xc9   :  { %1299 = vmatpush1.bf16.msra.mxu0 %v6516_v47  ;;  %v6540_v47 = vld [vmem:[#allocation11 + $0x140] ss:$16 sps:$4 sm:$0xff]  }
  0xca   :  { %1300 = vmatprep.subr.bf16.mxu0 %v6524_v16  ;;  %v6548_v16 = vld [vmem:[#allocation11 + $0x164] ss:$16 sps:$4 sm:$0xff]   ;;  %1403 = vmatpush1.bf16.msra.mxu1 %v6575_v14 }
  0xcb   :  { %1404 = vmatprep.subr.bf16.mxu1 %v6579_v61  ;;  %v6566_v14 = vld [vmem:[#allocation11 + $0x1c4] ss:$16 sps:$4 sm:$0xff]   ;;  %v6570_v61 = vld [vmem:[#allocation11 + $0x1e0] ss:$16 sps:$4 sm:$0xff]  }
  0xcd   :  { %1301 = vmatpush1.bf16.msra.mxu0 %v6522_v31  ;;  %v6546_v31 = vld [vmem:[#allocation11 + $0x160] ss:$16 sps:$4 sm:$0xff]  }
  0xce   :  { %1302 = vmatprep.subr.bf16.mxu0 %v6530_v45  ;;  %v6554_v45 = vld [vmem:[#allocation11 + $0x184] ss:$16 sps:$4 sm:$0xff]   ;;  %1405 = vmatpush1.bf16.msra.mxu1 %v6581_v62 }
  0xcf   :  { %1406 = vmatprep.subr.bf16.mxu1 %v6585_v15  ;;  %v6578_v62 = vld [vmem:[#allocation11 + $0x204] ss:$16 sps:$4 sm:$0xff]  }
  0xd0   :  { %v6584_v15 = vld [vmem:[#allocation11 + $0x224] ss:$16 sps:$4 sm:$0xff]  }
  0xd1   :  { %1303 = vmatpush1.bf16.msra.mxu0 %v6528_v46  ;;  %v6552_v46 = vld [vmem:[#allocation11 + $0x180] ss:$16 sps:$4 sm:$0xff]  }
  0xd2   :  { %1304 = vmatprep.subr.bf16.mxu0 %v6536_v29  ;;  %1407 = vmatpush1.bf16.msra.mxu1 %v6587_v30  ;;  %v6558_v29 = vld [vmem:[#allocation11 + $0x1a0] ss:$16 sps:$4 sm:$0xff]   ;;  %v6590_v30 = vld [vmem:[#allocation11 + $0x244] ss:$16 sps:$4 sm:$0xff]  }
  0xd3   :  { %1408 = vmatprep.subr.bf16.mxu1 %v6591_v32  ;;  %v6596_v32 = vld [vmem:[#allocation11 + $0x264] ss:$16 sps:$4 sm:$0xff]  }
  0xd5   :  { %1305 = vmatpush1.bf16.msra.mxu0 %v6534_v13  ;;  %v6572_v13 = vld [vmem:[#allocation11 + $0x1e4] ss:$16 sps:$4 sm:$0xff]  }
  0xd6   :  { %1306 = vmatprep.subr.bf16.mxu0 %v6542_v43  ;;  %1409 = vmatpush1.bf16.msra.mxu1 %v6593_v48  ;;  %v6564_v43 = vld [vmem:[#allocation11 + $0x1c0] ss:$16 sps:$4 sm:$0xff]  }
  0xd7   :  { %v6594_v48 = vld [vmem:[#allocation11 + $0x260] ss:$16 sps:$4 sm:$0xff]  }
  0xd9   :  { %1307 = vmatpush1.bf16.msra.mxu0 %v6540_v47  ;;  %v6576_v47 = vld [vmem:[#allocation11 + $0x200] ss:$16 sps:$4 sm:$0xff]  }
  0xda   :  { %1308 = vmatprep.subr.bf16.mxu0 %v6548_v16  ;;  %v6582_v16 = vld [vmem:[#allocation11 + $0x220] ss:$16 sps:$4 sm:$0xff]  }
  0xdd   :  { %1309 = vmatpush1.bf16.msra.mxu0 %v6546_v31  ;;  %v6588_v31 = vld [vmem:[#allocation11 + $0x240] ss:$16 sps:$4 sm:$0xff]  }
  0xde   :  { %1310 = vmatprep.subr.bf16.mxu0 %v6554_v45  ;;  %v6597_v45 = vld [vmem:[#allocation11 + $0x26c] ss:$16 sps:$4 sm:$0xff]  }
  0xdf   :  { %1410 = vmatprep.subr.bf16.mxu1 %v6597_v45 }
  0xe1   :  { %1311 = vmatpush1.bf16.msra.mxu0 %v6552_v46  ;;  %v6599_v46 = vld [vmem:[#allocation11 + $0x268] ss:$16 sps:$4 sm:$0xff]  }
  0xe2   :  { %1312 = vmatprep.subr.bf16.mxu0 %v6560_v0  ;;  %1411 = vmatpush1.bf16.msra.mxu1 %v6599_v46  ;;  %v6602_v0 = vld [vmem:[#allocation11 + $0x284] ss:$16 sps:$4 sm:$0xff]  }
  0xe5   :  { %1313 = vmatpush1.bf16.msra.mxu0 %v6558_v29  ;;  %v6603_v29 = vld [vmem:[#allocation11 + $0x28c] ss:$16 sps:$4 sm:$0xff]  }
  0xe6   :  { %1314 = vmatprep.subr.bf16.mxu0 %v6566_v14  ;;  %v6600_v14 = vld [vmem:[#allocation11 + $0x280] ss:$16 sps:$4 sm:$0xff]   ;;  %1412 = vmatprep.subr.bf16.mxu1 %v6603_v29 }
  0xe9   :  { %1315 = vmatpush1.bf16.msra.mxu0 %v6564_v43  ;;  %v6605_v43 = vld [vmem:[#allocation11 + $0x288] ss:$16 sps:$4 sm:$0xff]  }
  0xea   :  { %1316 = vmatprep.subr.bf16.mxu0 %v6572_v13  ;;  %1413 = vmatpush1.bf16.msra.mxu1 %v6605_v43  ;;  %v6608_v13 = vld [vmem:[#allocation11 + $0x2a4] ss:$16 sps:$4 sm:$0xff]  }
  0xed   :  { %1317 = vmatpush1.bf16.msra.mxu0 %v6570_v61  ;;  %v6611_v61 = vld [vmem:[#allocation11 + $0x2ac] ss:$16 sps:$4 sm:$0xff]  }
  0xee   :  { %1318 = vmatprep.subr.bf16.mxu0 %v6578_v62  ;;  %1425 = vmatprep.subr.bf16.mxu1 %v6611_v61  ;;  %v284_v62 = vlaneseq }
  0xf1   :  { %1319 = vmatpush1.bf16.msra.mxu0 %v6576_v47  ;;  %v7815_v47 = vshrl.u32 %v284_v62, 7 }
  0xf2   :  { %1320 = vmatprep.subr.bf16.mxu0 %v6584_v15 }
  0xf3   :  { %v7818_v15 = vsub.s32 0, %v7815_v47  ;;  %v7850_v60 = vsub.s32 3, %v7815_v47 }
  0xf5   :  { %1321 = vmatpush1.bf16.msra.mxu0 %v6582_v16  ;;  %v7821_v16 = vsub.s32 1, %v7815_v47 }
  0xf6   :  { %1322 = vmatprep.subr.bf16.mxu0 %v6590_v30  ;;  %v7823_v30 = vld [vmem:[#allocation9] sm:$0xf] }
  0xf9   :  { %1323 = vmatpush1.bf16.msra.mxu0 %v6588_v31  ;;  %v291_v31 = vrot.slane %v7823_v30, %v7821_v16 }
  0xfa   :  { %1324 = vmatprep.subr.bf16.mxu0 %v6596_v32  ;;  %v287_v32 = vrot.slane %v7823_v30, %v7818_v15 }
  0xfd   :  { %1325 = vmatpush1.bf16.msra.mxu0 %v6594_v48 }
  0xfe   :  { %1326 = vmatprep.subr.bf16.mxu0 %v6602_v0 }
 0x101   :  { %1327 = vmatpush1.bf16.msra.mxu0 %v6600_v14 }
 0x102   :  { %1339 = vmatprep.subr.bf16.mxu0 %v6608_v13 }
 0x183   :  { %v442_v45 = vpop.f32.mrb[0].mxu0 }
 0x184   :  { %v444_v48 = vpop.f32.mrb[1].mxu0  ;;  %v7831_v29 = vadd.f32 %v442_v45, %v287_v32  ;;  %v6606_v45 = vld [vmem:[#allocation11 + $0x2a0] ss:$16 sps:$4 sm:$0xff]  }
 0x185   :  { %v7829_v46 = vadd.f32 %v444_v48, %v291_v31  ;;  %v446_v0 = vpop.f32.mrb[2].mxu0 }
 0x186   :  { %v7833_v14 = vadd.f32 %v446_v0, %v287_v32  ;;  %v448_v43 = vpop.f32.mrb[3].mxu0  ;;  %v8244_v11 = vmax.f32 %v7831_v29, 0.0  ;;  %v6614_v32 = vld [vmem:[#allocation11 + $0x2c4] ss:$16 sps:$4 sm:$0xff]   ;;  %v6617_v0 = vld [vmem:[#allocation11 + $0x2cc] ss:$16 sps:$4 sm:$0xff]  }
 0x187   :  { %v7835_v13 = vadd.f32 %v448_v43, %v291_v31  ;;  %v8242_v62 = vmax.f32 %v7829_v46, 0.0  ;;  %v6612_v43 = vld [vmem:[#allocation11 + $0x2c0] ss:$16 sps:$4 sm:$0xff]  }
 0x188   :  { %v8243_v61 = vmax.f32 %v7833_v14, 0.0 }
 0x189   :  { %v8241_v44 = vmax.f32 %v7835_v13, 0.0 }
 0x18a   :  { %v630_v31 = vpack.c.bf16 %v8243_v61, %v8244_v11  ;;  %v6618_v61 = vld [vmem:[#allocation11 + $0x2e0] ss:$16 sps:$4 sm:$0xff]   ;;  %v6621_v11 = vld [vmem:[#allocation11 + $0x2e8] ss:$16 sps:$4 sm:$0xff]  }
 0x18b   :  { %v631_v48 = vpack.c.bf16 %v8241_v44, %v8242_v62  ;;  %v6620_v44 = vld [vmem:[#allocation11 + $0x2e4] ss:$16 sps:$4 sm:$0xff]   ;;  %v6623_v62 = vld [vmem:[#allocation11 + $0x2ec] ss:$16 sps:$4 sm:$0xff]  }
 0x18d   :  { %1328 = vmatprep.mubr.bf16.mxu0 %v631_v48  ;;  %1414 = vmatprep.mubr.bf16.mxu1 %v631_v48  ;;  %v6626_v48 = vld [vmem:[#allocation11 + $0x304] ss:$16 sps:$4 sm:$0xff]  }
 0x18e   :  { %1329 = vmatmul.mubr.bf16.vlgmr.msra.gmra.mrb[8].mxu0 %v630_v31  ;;  %1415 = vmatmul.mubr.bf16.vlgmr.msra.gmra.mrb[0].mxu1 %v630_v31  ;;  %v6627_v31 = vld [vmem:[#allocation11 + $0x308] ss:$16 sps:$4 sm:$0xff]  }
 0x18f   :  { %1340 = vmatpush1.bf16.msra.mxu0 %v6606_v45  ;;  %1426 = vmatpush1.bf16.msra.mxu1 %v6609_v12  ;;  %v299_v12 = vrot.slane %v7823_v30, %v7850_v60  ;;  %v6624_v45 = vld [vmem:[#allocation11 + $0x300] ss:$16 sps:$4 sm:$0xff]  }
 0x190   :  { %1341 = vmatprep.subr.bf16.mxu0 %v6614_v32  ;;  %1427 = vmatprep.subr.bf16.mxu1 %v6617_v0  ;;  %v6632_v0 = vld [vmem:[#allocation11 + $0x324] ss:$16 sps:$4 sm:$0xff]  }
 0x193   :  { %1342 = vmatpush1.bf16.msra.mxu0 %v6612_v43  ;;  %1428 = vmatpush1.bf16.msra.mxu1 %v6615_v59  ;;  %v6635_v43 = vld [vmem:[#allocation11 + $0x32c] ss:$16 sps:$4 sm:$0xff]  }
 0x194   :  { %1343 = vmatprep.subr.bf16.mxu0 %v6620_v44  ;;  %1429 = vmatprep.subr.bf16.mxu1 %v6623_v62 }
 0x197   :  { %1344 = vmatpush1.bf16.msra.mxu0 %v6618_v61  ;;  %1430 = vmatpush1.bf16.msra.mxu1 %v6621_v11  ;;  %v7854_v32 = vpop.f32.mrb[4].mxu0 }
 0x198   :  { %1345 = vmatprep.subr.bf16.mxu0 %v6626_v48  ;;  %1431 = vmatprep.subr.bf16.mxu1 %v6629_v27  ;;  %v487_v59 = vpop.f32.mrb[5].mxu0  ;;  %v6638_v48 = vld [vmem:[#allocation11 + $0x344] ss:$16 sps:$4 sm:$0xff]   ;;  %v6641_v27 = vld [vmem:[#allocation11 + $0x34c] ss:$16 sps:$4 sm:$0xff]  }
 0x199   :  { %v7856_v28 = vadd.f32 %v487_v59, %v299_v12  ;;  %v7858_v44 = vpop.f32.mrb[6].mxu0  ;;  %v6636_v59 = vld [vmem:[#allocation11 + $0x340] ss:$16 sps:$4 sm:$0xff]  }
 0x19a   :  { %v491_v62 = vpop.f32.mrb[7].mxu0 }
 0x19b   :  { %1346 = vmatpush1.bf16.msra.mxu0 %v6624_v45  ;;  %1432 = vmatpush1.bf16.msra.mxu1 %v6627_v31  ;;  %v8247_v11 = vmax.f32 %v7856_v28, 0.0  ;;  %v7861_v61 = vadd.f32 %v491_v62, %v299_v12  ;;  %v6644_v31 = vld [vmem:[#allocation11 + $0x364] ss:$16 sps:$4 sm:$0xff]   ;;  %v6647_v12 = vld [vmem:[#allocation11 + $0x36c] ss:$16 sps:$4 sm:$0xff]  }
 0x19c   :  { %1347 = vmatprep.subr.bf16.mxu0 %v6632_v0  ;;  %1433 = vmatprep.subr.bf16.mxu1 %v6635_v43  ;;  %v6642_v0 = vld [vmem:[#allocation11 + $0x360] ss:$16 sps:$4 sm:$0xff]   ;;  %v6645_v43 = vld [vmem:[#allocation11 + $0x368] ss:$16 sps:$4 sm:$0xff]  }
 0x19d   :  { %v8245_v9 = vmax.f32 %v7861_v61, 0.0  ;;  %v6648_v62 = vld [vmem:[#allocation11 + $0x380] ss:$16 sps:$4 sm:$0xff]  }
 0x19f   :  { %1348 = vmatpush1.bf16.msra.mxu0 %v6630_v41  ;;  %1434 = vmatpush1.bf16.msra.mxu1 %v6633_v42  ;;  %v633_v45 = vpack.c.bf16 %v8245_v9, %v8247_v11  ;;  %v6650_v41 = vld [vmem:[#allocation11 + $0x384] ss:$16 sps:$4 sm:$0xff]   ;;  %v6653_v42 = vld [vmem:[#allocation11 + $0x38c] ss:$16 sps:$4 sm:$0xff]   ;;  %v6654_v9 = vld [vmem:[#allocation11 + $0x3a0] ss:$16 sps:$4 sm:$0xff]  }
 0x1a0   :  { %1349 = vmatprep.subr.bf16.mxu0 %v6638_v48  ;;  %1435 = vmatprep.subr.bf16.mxu1 %v6641_v27  ;;  %v6656_v48 = vld [vmem:[#allocation11 + $0x3a4] ss:$16 sps:$4 sm:$0xff]   ;;  %v6659_v27 = vld [vmem:[#allocation11 + $0x3ac] ss:$16 sps:$4 sm:$0xff]  }
 0x1a1   :  { %1371 = vmatprep.mubr.bf16.mxu0 %v633_v45  ;;  %1457 = vmatprep.mubr.bf16.mxu1 %v633_v45  ;;  %v6657_v45 = vld [vmem:[#allocation11 + $0x3a8] ss:$16 sps:$4 sm:$0xff]  }
 0x1a3   :  { %1350 = vmatpush1.bf16.msra.mxu0 %v6636_v59  ;;  %1436 = vmatpush1.bf16.msra.mxu1 %v6639_v10  ;;  %v6662_v10 = vld [vmem:[#allocation11 + $0x3c4] ss:$16 sps:$4 sm:$0xff]   ;;  %v6665_v59 = vld [vmem:[#allocation11 + $0x3cc] ss:$16 sps:$4 sm:$0xff]  }
 0x1a4   :  { %1351 = vmatprep.subr.bf16.mxu0 %v6644_v31  ;;  %1437 = vmatprep.subr.bf16.mxu1 %v6647_v12  ;;  %v6660_v31 = vld [vmem:[#allocation11 + $0x3c0] ss:$16 sps:$4 sm:$0xff]   ;;  %v6663_v12 = vld [vmem:[#allocation11 + $0x3c8] ss:$16 sps:$4 sm:$0xff]  }
 0x1a7   :  { %1352 = vmatpush1.bf16.msra.mxu0 %v6642_v0  ;;  %1438 = vmatpush1.bf16.msra.mxu1 %v6645_v43  ;;  %v6668_v0 = vld [vmem:[#allocation11 + $0x3e4] ss:$16 sps:$4 sm:$0xff]   ;;  %v6671_v43 = vld [vmem:[#allocation11 + $0x3ec] ss:$16 sps:$4 sm:$0xff]  }
 0x1a8   :  { %1353 = vmatprep.subr.bf16.mxu0 %v6650_v41  ;;  %1439 = vmatprep.subr.bf16.mxu1 %v6653_v42  ;;  %v6666_v41 = vld [vmem:[#allocation11 + $0x3e0] ss:$16 sps:$4 sm:$0xff]   ;;  %v6669_v42 = vld [vmem:[#allocation11 + $0x3e8] ss:$16 sps:$4 sm:$0xff]  }
 0x1ab   :  { %1354 = vmatpush1.bf16.msra.mxu0 %v6648_v62  ;;  %1440 = vmatpush1.bf16.msra.mxu1 %v6651_v57  ;;  %v6674_v57 = vld [vmem:[#allocation11 + $0x404] ss:$16 sps:$4 sm:$0xff]   ;;  %v6677_v62 = vld [vmem:[#allocation11 + $0x40c] ss:$16 sps:$4 sm:$0xff]  }
 0x1ac   :  { %1355 = vmatprep.subr.bf16.mxu0 %v6656_v48  ;;  %1441 = vmatprep.subr.bf16.mxu1 %v6659_v27  ;;  %v6672_v48 = vld [vmem:[#allocation11 + $0x400] ss:$16 sps:$4 sm:$0xff]   ;;  %v6675_v27 = vld [vmem:[#allocation11 + $0x408] ss:$16 sps:$4 sm:$0xff]  }
 0x1af   :  { %1356 = vmatpush1.bf16.msra.mxu0 %v6654_v9  ;;  %1442 = vmatpush1.bf16.msra.mxu1 %v6657_v45  ;;  %v6680_v9 = vld [vmem:[#allocation11 + $0x424] ss:$16 sps:$4 sm:$0xff]   ;;  %v6683_v45 = vld [vmem:[#allocation11 + $0x42c] ss:$16 sps:$4 sm:$0xff]  }
 0x1b0   :  { %1357 = vmatprep.subr.bf16.mxu0 %v6662_v10  ;;  %1443 = vmatprep.subr.bf16.mxu1 %v6665_v59  ;;  %v6678_v10 = vld [vmem:[#allocation11 + $0x420] ss:$16 sps:$4 sm:$0xff]   ;;  %v6681_v59 = vld [vmem:[#allocation11 + $0x428] ss:$16 sps:$4 sm:$0xff]  }
 0x1b3   :  { %1358 = vmatpush1.bf16.msra.mxu0 %v6660_v31  ;;  %1444 = vmatpush1.bf16.msra.mxu1 %v6663_v12  ;;  %v7869_v31 = vsub.s32 2, %v7815_v47  ;;  %v6686_v12 = vld [vmem:[#allocation11 + $0x444] ss:$16 sps:$4 sm:$0xff]  }
 0x1b4   :  { %1359 = vmatprep.subr.bf16.mxu0 %v6668_v0  ;;  %1445 = vmatprep.subr.bf16.mxu1 %v6671_v43  ;;  %v6689_v0 = vld [vmem:[#allocation11 + $0x44c] ss:$16 sps:$4 sm:$0xff]   ;;  %v6684_v43 = vld [vmem:[#allocation11 + $0x440] ss:$16 sps:$4 sm:$0xff]  }
 0x1b7   :  { %1360 = vmatpush1.bf16.msra.mxu0 %v6666_v41  ;;  %1446 = vmatpush1.bf16.msra.mxu1 %v6669_v42  ;;  %v6687_v41 = vld [vmem:[#allocation11 + $0x448] ss:$16 sps:$4 sm:$0xff]   ;;  %v295_v42 = vrot.slane %v7823_v30, %v7869_v31  ;;  %v6696_v30 = vld [vmem:[#allocation11 + $0x480] ss:$16 sps:$4 sm:$0xff]  }
 0x1b8   :  { %1361 = vmatprep.subr.bf16.mxu0 %v6674_v57  ;;  %1447 = vmatprep.subr.bf16.mxu1 %v6677_v62  ;;  %v6692_v57 = vld [vmem:[#allocation11 + $0x464] ss:$16 sps:$4 sm:$0xff]   ;;  %v6695_v62 = vld [vmem:[#allocation11 + $0x46c] ss:$16 sps:$4 sm:$0xff]  }
 0x1b9   :  { %v7874_v47 = vadd.f32 %v7854_v32, %v295_v42  ;;  %v6707_v32 = vld [vmem:[#allocation11 + $0x4ac] ss:$16 sps:$4 sm:$0xff]  }
 0x1bb   :  { %1362 = vmatpush1.bf16.msra.mxu0 %v6672_v48  ;;  %1448 = vmatpush1.bf16.msra.mxu1 %v6675_v27  ;;  %v6690_v48 = vld [vmem:[#allocation11 + $0x460] ss:$16 sps:$4 sm:$0xff]   ;;  %v6693_v27 = vld [vmem:[#allocation11 + $0x468] ss:$16 sps:$4 sm:$0xff]  }
 0x1bc   :  { %1363 = vmatprep.subr.bf16.mxu0 %v6680_v9  ;;  %1449 = vmatprep.subr.bf16.mxu1 %v6683_v45  ;;  %v7877_v9 = vadd.f32 %v7858_v44, %v295_v42  ;;  %v6698_v45 = vld [vmem:[#allocation11 + $0x484] ss:$16 sps:$4 sm:$0xff]   ;;  %v6702_v44 = vld [vmem:[#allocation11 + $0x4a0] ss:$16 sps:$4 sm:$0xff]  }
 0x1bf   :  { %1364 = vmatpush1.bf16.msra.mxu0 %v6678_v10  ;;  %1450 = vmatpush1.bf16.msra.mxu1 %v6681_v59  ;;  %v6701_v10 = vld [vmem:[#allocation11 + $0x48c] ss:$16 sps:$4 sm:$0xff]   ;;  %v6699_v59 = vld [vmem:[#allocation11 + $0x488] ss:$16 sps:$4 sm:$0xff]  }
 0x1c0   :  { %1365 = vmatprep.subr.bf16.mxu0 %v6686_v12  ;;  %1451 = vmatprep.subr.bf16.mxu1 %v6689_v0  ;;  %v8248_v12 = vmax.f32 %v7874_v47, 0.0  ;;  %v8246_v0 = vmax.f32 %v7877_v9, 0.0 }
 0x1c2   :  { %v632_v42 = vpack.c.bf16 %v8246_v0, %v8248_v12  ;;  %v6720_v0 = vld [vmem:[#allocation11 + $0x500] ss:$16 sps:$4 sm:$0xff]  }
 0x1c3   :  { %1366 = vmatpush1.bf16.msra.mxu0 %v6684_v43  ;;  %1452 = vmatpush1.bf16.msra.mxu1 %v6687_v41  ;;  %v6704_v43 = vld [vmem:[#allocation11 + $0x4a4] ss:$16 sps:$4 sm:$0xff]   ;;  %v6705_v41 = vld [vmem:[#allocation11 + $0x4a8] ss:$16 sps:$4 sm:$0xff]  }
 0x1c4   :  { %1367 = vmatprep.subr.bf16.mxu0 %v6692_v57  ;;  %1453 = vmatprep.subr.bf16.mxu1 %v6695_v62  ;;  %v6710_v57 = vld [vmem:[#allocation11 + $0x4c4] ss:$16 sps:$4 sm:$0xff]   ;;  %v6713_v62 = vld [vmem:[#allocation11 + $0x4cc] ss:$16 sps:$4 sm:$0xff]  }
 0x1c7   :  { %1368 = vmatpush1.bf16.msra.mxu0 %v6690_v48  ;;  %1454 = vmatpush1.bf16.msra.mxu1 %v6693_v27  ;;  %v6708_v48 = vld [vmem:[#allocation11 + $0x4c0] ss:$16 sps:$4 sm:$0xff]   ;;  %v6711_v27 = vld [vmem:[#allocation11 + $0x4c8] ss:$16 sps:$4 sm:$0xff]  }
 0x1c8   :  { %1369 = vmatprep.subr.bf16.mxu0 %v6698_v45  ;;  %1455 = vmatprep.subr.bf16.mxu1 %v6701_v10  ;;  %v6716_v45 = vld [vmem:[#allocation11 + $0x4e4] ss:$16 sps:$4 sm:$0xff]   ;;  %v6719_v10 = vld [vmem:[#allocation11 + $0x4ec] ss:$16 sps:$4 sm:$0xff]  }
 0x1cb   :  { %1370 = vmatpush1.bf16.msra.mxu0 %v6696_v30  ;;  %1456 = vmatpush1.bf16.msra.mxu1 %v6699_v59  ;;  %v6714_v30 = vld [vmem:[#allocation11 + $0x4e0] ss:$16 sps:$4 sm:$0xff]   ;;  %v6717_v59 = vld [vmem:[#allocation11 + $0x4e8] ss:$16 sps:$4 sm:$0xff]  }
 0x1cc   :  { %2270 = vmatprep.subr.bf16.mxu0 %v6704_v43  ;;  %2356 = vmatprep.subr.bf16.mxu1 %v6707_v32  ;;  %v6722_v43 = vld [vmem:[#allocation11 + $0x504] ss:$16 sps:$4 sm:$0xff]   ;;  %v6725_v32 = vld [vmem:[#allocation11 + $0x50c] ss:$16 sps:$4 sm:$0xff]  }
 0x1ce   :  { %1372 = vmatmul.mubr.bf16.vlgmr.msra.gmra.mrb[8].mxu0 %v632_v42  ;;  %1458 = vmatmul.mubr.bf16.vlgmr.msra.gmra.mrb[0].mxu1 %v632_v42  ;;  %v6723_v42 = vld [vmem:[#allocation11 + $0x508] ss:$16 sps:$4 sm:$0xff]  }
 0x1cf   :  { %2271 = vmatpush1.bf16.msra.mxu0 %v6702_v44  ;;  %2357 = vmatpush1.bf16.msra.mxu1 %v6705_v41  ;;  %v6728_v44 = vld [vmem:[#allocation11 + $0x524] ss:$16 sps:$4 sm:$0xff]   ;;  %v6731_v41 = vld [vmem:[#allocation11 + $0x52c] ss:$16 sps:$4 sm:$0xff]  }
 0x1d0   :  { %2272 = vmatprep.subr.bf16.mxu0 %v6710_v57  ;;  %2358 = vmatprep.subr.bf16.mxu1 %v6713_v62  ;;  %v6726_v57 = vld [vmem:[#allocation11 + $0x520] ss:$16 sps:$4 sm:$0xff]   ;;  %v6729_v62 = vld [vmem:[#allocation11 + $0x528] ss:$16 sps:$4 sm:$0xff]  }
 0x1d3   :  { %2273 = vmatpush1.bf16.msra.mxu0 %v6708_v48  ;;  %2359 = vmatpush1.bf16.msra.mxu1 %v6711_v27  ;;  %v6734_v48 = vld [vmem:[#allocation11 + $0x544] ss:$16 sps:$4 sm:$0xff]   ;;  %v6737_v27 = vld [vmem:[#allocation11 + $0x54c] ss:$16 sps:$4 sm:$0xff]  }
 0x1d4   :  { %2274 = vmatprep.subr.bf16.mxu0 %v6716_v45  ;;  %2360 = vmatprep.subr.bf16.mxu1 %v6719_v10  ;;  %v6732_v45 = vld [vmem:[#allocation11 + $0x540] ss:$16 sps:$4 sm:$0xff]   ;;  %v6735_v10 = vld [vmem:[#allocation11 + $0x548] ss:$16 sps:$4 sm:$0xff]  }
 0x1d7   :  { %2275 = vmatpush1.bf16.msra.mxu0 %v6714_v30  ;;  %2361 = vmatpush1.bf16.msra.mxu1 %v6717_v59  ;;  %v6740_v30 = vld [vmem:[#allocation11 + $0x564] ss:$16 sps:$4 sm:$0xff]   ;;  %v6743_v59 = vld [vmem:[#allocation11 + $0x56c] ss:$16 sps:$4 sm:$0xff]  }
 0x1d8   :  { %2276 = vmatprep.subr.bf16.mxu0 %v6722_v43  ;;  %2362 = vmatprep.subr.bf16.mxu1 %v6725_v32  ;;  %v6738_v43 = vld [vmem:[#allocation11 + $0x560] ss:$16 sps:$4 sm:$0xff]   ;;  %v6741_v32 = vld [vmem:[#allocation11 + $0x568] ss:$16 sps:$4 sm:$0xff]  }
 0x1db   :  { %2277 = vmatpush1.bf16.msra.mxu0 %v6720_v0  ;;  %2363 = vmatpush1.bf16.msra.mxu1 %v6723_v42  ;;  %v6746_v0 = vld [vmem:[#allocation11 + $0x584] ss:$16 sps:$4 sm:$0xff]   ;;  %v6749_v42 = vld [vmem:[#allocation11 + $0x58c] ss:$16 sps:$4 sm:$0xff]  }
 0x1dc   :  { %2278 = vmatprep.subr.bf16.mxu0 %v6728_v44  ;;  %2364 = vmatprep.subr.bf16.mxu1 %v6731_v41  ;;  %v6744_v44 = vld [vmem:[#allocation11 + $0x580] ss:$16 sps:$4 sm:$0xff]   ;;  %v6747_v41 = vld [vmem:[#allocation11 + $0x588] ss:$16 sps:$4 sm:$0xff]  }
 0x1df   :  { %2279 = vmatpush1.bf16.msra.mxu0 %v6726_v57  ;;  %2365 = vmatpush1.bf16.msra.mxu1 %v6729_v62  ;;  %v6752_v57 = vld [vmem:[#allocation11 + $0x5a4] ss:$16 sps:$4 sm:$0xff]   ;;  %v6755_v62 = vld [vmem:[#allocation11 + $0x5ac] ss:$16 sps:$4 sm:$0xff]  }
 0x1e0   :  { %2280 = vmatprep.subr.bf16.mxu0 %v6734_v48  ;;  %2366 = vmatprep.subr.bf16.mxu1 %v6737_v27  ;;  %v6750_v48 = vld [vmem:[#allocation11 + $0x5a0] ss:$16 sps:$4 sm:$0xff]   ;;  %v6753_v27 = vld [vmem:[#allocation11 + $0x5a8] ss:$16 sps:$4 sm:$0xff]  }
 0x1e3   :  { %2281 = vmatpush1.bf16.msra.mxu0 %v6732_v45  ;;  %2367 = vmatpush1.bf16.msra.mxu1 %v6735_v10  ;;  %v6758_v45 = vld [vmem:[#allocation11 + $0x5c4] ss:$16 sps:$4 sm:$0xff]   ;;  %v6761_v10 = vld [vmem:[#allocation11 + $0x5cc] ss:$16 sps:$4 sm:$0xff]  }
 0x1e4   :  { %2282 = vmatprep.subr.bf16.mxu0 %v6740_v30  ;;  %2368 = vmatprep.subr.bf16.mxu1 %v6743_v59  ;;  %v6756_v30 = vld [vmem:[#allocation11 + $0x5c0] ss:$16 sps:$4 sm:$0xff]   ;;  %v6759_v59 = vld [vmem:[#allocation11 + $0x5c8] ss:$16 sps:$4 sm:$0xff]  }
 0x1e7   :  { %2283 = vmatpush1.bf16.msra.mxu0 %v6738_v43  ;;  %2369 = vmatpush1.bf16.msra.mxu1 %v6741_v32  ;;  %v6764_v43 = vld [vmem:[#allocation11 + $0x5e4] ss:$16 sps:$4 sm:$0xff]   ;;  %v6767_v32 = vld [vmem:[#allocation11 + $0x5ec] ss:$16 sps:$4 sm:$0xff]  }
 0x1e8   :  { %2284 = vmatprep.subr.bf16.mxu0 %v6746_v0  ;;  %2370 = vmatprep.subr.bf16.mxu1 %v6749_v42  ;;  %v6762_v0 = vld [vmem:[#allocation11 + $0x5e0] ss:$16 sps:$4 sm:$0xff]   ;;  %v6765_v42 = vld [vmem:[#allocation11 + $0x5e8] ss:$16 sps:$4 sm:$0xff]  }
 0x1eb   :  { %2285 = vmatpush1.bf16.msra.mxu0 %v6744_v44  ;;  %2371 = vmatpush1.bf16.msra.mxu1 %v6747_v41  ;;  %v6770_v44 = vld [vmem:[#allocation11 + $0x604] ss:$16 sps:$4 sm:$0xff]   ;;  %v6773_v41 = vld [vmem:[#allocation11 + $0x60c] ss:$16 sps:$4 sm:$0xff]  }
 0x1ec   :  { %2286 = vmatprep.subr.bf16.mxu0 %v6752_v57  ;;  %2372 = vmatprep.subr.bf16.mxu1 %v6755_v62  ;;  %v6768_v57 = vld [vmem:[#allocation11 + $0x600] ss:$16 sps:$4 sm:$0xff]   ;;  %v6771_v62 = vld [vmem:[#allocation11 + $0x608] ss:$16 sps:$4 sm:$0xff]  }
 0x1ef   :  { %2287 = vmatpush1.bf16.msra.mxu0 %v6750_v48  ;;  %2373 = vmatpush1.bf16.msra.mxu1 %v6753_v27  ;;  %v6776_v48 = vld [vmem:[#allocation11 + $0x624] ss:$16 sps:$4 sm:$0xff]   ;;  %v6779_v27 = vld [vmem:[#allocation11 + $0x62c] ss:$16 sps:$4 sm:$0xff]  }
 0x1f0   :  { %2288 = vmatprep.subr.bf16.mxu0 %v6758_v45  ;;  %2374 = vmatprep.subr.bf16.mxu1 %v6761_v10  ;;  %v6774_v45 = vld [vmem:[#allocation11 + $0x620] ss:$16 sps:$4 sm:$0xff]   ;;  %v6777_v10 = vld [vmem:[#allocation11 + $0x628] ss:$16 sps:$4 sm:$0xff]  }
 0x1f3   :  { %2289 = vmatpush1.bf16.msra.mxu0 %v6756_v30  ;;  %2375 = vmatpush1.bf16.msra.mxu1 %v6759_v59  ;;  %v6782_v30 = vld [vmem:[#allocation11 + $0x644] ss:$16 sps:$4 sm:$0xff]   ;;  %v6785_v59 = vld [vmem:[#allocation11 + $0x64c] ss:$16 sps:$4 sm:$0xff]  }
 0x1f4   :  { %2290 = vmatprep.subr.bf16.mxu0 %v6764_v43  ;;  %2376 = vmatprep.subr.bf16.mxu1 %v6767_v32  ;;  %v6780_v43 = vld [vmem:[#allocation11 + $0x640] ss:$16 sps:$4 sm:$0xff]   ;;  %v6783_v32 = vld [vmem:[#allocation11 + $0x648] ss:$16 sps:$4 sm:$0xff]  }
 0x1f7   :  { %2291 = vmatpush1.bf16.msra.mxu0 %v6762_v0  ;;  %2377 = vmatpush1.bf16.msra.mxu1 %v6765_v42  ;;  %v6788_v0 = vld [vmem:[#allocation11 + $0x664] ss:$16 sps:$4 sm:$0xff]   ;;  %v6791_v42 = vld [vmem:[#allocation11 + $0x66c] ss:$16 sps:$4 sm:$0xff]  }
 0x1f8   :  { %2292 = vmatprep.subr.bf16.mxu0 %v6770_v44  ;;  %2378 = vmatprep.subr.bf16.mxu1 %v6773_v41  ;;  %v6786_v44 = vld [vmem:[#allocation11 + $0x660] ss:$16 sps:$4 sm:$0xff]   ;;  %v6789_v41 = vld [vmem:[#allocation11 + $0x668] ss:$16 sps:$4 sm:$0xff]  }
 0x1fb   :  { %2293 = vmatpush1.bf16.msra.mxu0 %v6768_v57  ;;  %2379 = vmatpush1.bf16.msra.mxu1 %v6771_v62  ;;  %v6794_v57 = vld [vmem:[#allocation11 + $0x684] ss:$16 sps:$4 sm:$0xff]   ;;  %v6797_v62 = vld [vmem:[#allocation11 + $0x68c] ss:$16 sps:$4 sm:$0xff]  }
 0x1fc   :  { %2294 = vmatprep.subr.bf16.mxu0 %v6776_v48  ;;  %2380 = vmatprep.subr.bf16.mxu1 %v6779_v27  ;;  %v6792_v48 = vld [vmem:[#allocation11 + $0x680] ss:$16 sps:$4 sm:$0xff]   ;;  %v6795_v27 = vld [vmem:[#allocation11 + $0x688] ss:$16 sps:$4 sm:$0xff]  }
 0x1ff   :  { %2295 = vmatpush1.bf16.msra.mxu0 %v6774_v45  ;;  %2381 = vmatpush1.bf16.msra.mxu1 %v6777_v10  ;;  %v6800_v45 = vld [vmem:[#allocation11 + $0x6a4] ss:$16 sps:$4 sm:$0xff]   ;;  %v6803_v10 = vld [vmem:[#allocation11 + $0x6ac] ss:$16 sps:$4 sm:$0xff]  }
 0x200   :  { %2296 = vmatprep.subr.bf16.mxu0 %v6782_v30  ;;  %2382 = vmatprep.subr.bf16.mxu1 %v6785_v59  ;;  %v634_v30 = vld [vmem:[#allocation9 + $0x4] sm:$0xf] }
 0x201   :  { %v639_v59 = vrot.slane %v634_v30, %v7818_v15 }
 0x203   :  { %2297 = vmatpush1.bf16.msra.mxu0 %v6780_v43  ;;  %2383 = vmatpush1.bf16.msra.mxu1 %v6783_v32  ;;  %v647_v43 = vrot.slane %v634_v30, %v7869_v31  ;;  %v643_v32 = vrot.slane %v634_v30, %v7821_v16 }
 0x204   :  { %2298 = vmatprep.subr.bf16.mxu0 %v6788_v0  ;;  %2384 = vmatprep.subr.bf16.mxu1 %v6791_v42  ;;  %v651_v0 = vrot.slane %v634_v30, %v7850_v60 }
 0x207   :  { %2299 = vmatpush1.bf16.msra.mxu0 %v6786_v44  ;;  %2385 = vmatpush1.bf16.msra.mxu1 %v6789_v41 }
 0x208   :  { %2300 = vmatprep.subr.bf16.mxu0 %v6794_v57  ;;  %2386 = vmatprep.subr.bf16.mxu1 %v6797_v62 }
 0x20b   :  { %2301 = vmatpush1.bf16.msra.mxu0 %v6792_v48  ;;  %2387 = vmatpush1.bf16.msra.mxu1 %v6795_v27 }
 0x20c   :  { %2313 = vmatprep.subr.bf16.mxu0 %v6800_v45  ;;  %2399 = vmatprep.subr.bf16.mxu1 %v6803_v10 }
 0x2a1   :  { %v1373_v42 = vpop.f32.mrb[8].mxu0  ;;  %v1459_v44 = vpop.f32.mrb[0].mxu1 }
 0x2a2   :  { %v6376_v41 = vadd.f32 %v1373_v42, %v639_v59  ;;  %v6380_v57 = vadd.f32 %v1459_v44, %v647_v43  ;;  %v1375_v62 = vpop.f32.mrb[9].mxu0  ;;  %v1461_v48 = vpop.f32.mrb[1].mxu1 }
 0x2a3   :  { %v6377_v27 = vadd.f32 %v1375_v62, %v643_v32  ;;  %v6381_v11 = vadd.f32 %v1461_v48, %v651_v0  ;;  %v1377_v12 = vpop.f32.mrb[10].mxu0  ;;  %v1463_v45 = vpop.f32.mrb[2].mxu1 }
 0x2a4   :  { %v6378_v10 = vadd.f32 %v1377_v12, %v639_v59  ;;  %v6382_v58 = vadd.f32 %v1463_v45, %v647_v43  ;;  %v1379_v25 = vpop.f32.mrb[11].mxu0  ;;  %v1465_v26 = vpop.f32.mrb[3].mxu1  ;;  %v1468_v7 = vmax.f32 %v6376_v41, 0.0  ;;  %v1470_v8 = vmax.f32 %v6380_v57, 0.0  ;;  %v6801_v12 = vld [vmem:[#allocation11 + $0x6a8] ss:$16 sps:$4 sm:$0xff]  }
 0x2a5   :  { %v6379_v39 = vadd.f32 %v1379_v25, %v643_v32  ;;  %v6383_v40 = vadd.f32 %v1465_v26, %v651_v0  ;;  %v1469_v56 = vmax.f32 %v6377_v27, 0.0  ;;  %v1471_v23 = vmax.f32 %v6381_v11, 0.0  ;;  %v6806_v59 = vld [vmem:[#allocation11 + $0x6c4] ss:$16 sps:$4 sm:$0xff]   ;;  %v6809_v25 = vld [vmem:[#allocation11 + $0x6cc] ss:$16 sps:$4 sm:$0xff]  }
 0x2a6   :  { %v1472_v55 = vmax.f32 %v6378_v10, 0.0  ;;  %v1474_v30 = vmax.f32 %v6382_v58, 0.0  ;;  %v6804_v26 = vld [vmem:[#allocation11 + $0x6c0] ss:$16 sps:$4 sm:$0xff]   ;;  %v6807_v58 = vld [vmem:[#allocation11 + $0x6c8] ss:$16 sps:$4 sm:$0xff]  }
 0x2a7   :  { %v1473_v42 = vmax.f32 %v6379_v39, 0.0  ;;  %v1475_v44 = vmax.f32 %v6383_v40, 0.0  ;;  %v6812_v39 = vld [vmem:[#allocation11 + $0x6e4] ss:$16 sps:$4 sm:$0xff]   ;;  %v6827_v11 = vld [vmem:[#allocation11 + $0x72c] ss:$16 sps:$4 sm:$0xff]  }
 0x2a8   :  { %v1604_v24 = vpack.c.bf16 %v1472_v55, %v1468_v7  ;;  %v7889_v37 = vpack.c.bf16 %v1474_v30, %v1470_v8  ;;  %v6815_v7 = vld [vmem:[#allocation11 + $0x6ec] ss:$16 sps:$4 sm:$0xff]   ;;  %v6810_v8 = vld [vmem:[#allocation11 + $0x6e0] ss:$16 sps:$4 sm:$0xff]   ;;  %v6818_v40 = vld [vmem:[#allocation11 + $0x704] ss:$16 sps:$4 sm:$0xff]  }
 0x2a9   :  { %v1605_v62 = vpack.c.bf16 %v1473_v42, %v1469_v56  ;;  %v1607_v48 = vpack.c.bf16 %v1475_v44, %v1471_v23  ;;  %v6813_v23 = vld [vmem:[#allocation11 + $0x6e8] ss:$16 sps:$4 sm:$0xff]   ;;  %v6821_v55 = vld [vmem:[#allocation11 + $0x70c] ss:$16 sps:$4 sm:$0xff]   ;;  %v6824_v56 = vld [vmem:[#allocation11 + $0x724] ss:$16 sps:$4 sm:$0xff]  }
 0x2aa   :  { %v6822_v43 = vld [vmem:[#allocation11 + $0x720] ss:$16 sps:$4 sm:$0xff]   ;;  %v6825_v32 = vld [vmem:[#allocation11 + $0x728] ss:$16 sps:$4 sm:$0xff]   ;;  %v6830_v0 = vld [vmem:[#allocation11 + $0x744] ss:$16 sps:$4 sm:$0xff]  }
 0x2ab   :  { %2302 = vmatprep.mubr.bf16.mxu0 %v1605_v62  ;;  %2388 = vmatprep.mubr.bf16.mxu1 %v1605_v62  ;;  %v6833_v41 = vld [vmem:[#allocation11 + $0x74c] ss:$16 sps:$4 sm:$0xff]   ;;  %v6828_v57 = vld [vmem:[#allocation11 + $0x740] ss:$16 sps:$4 sm:$0xff]   ;;  %v6831_v27 = vld [vmem:[#allocation11 + $0x748] ss:$16 sps:$4 sm:$0xff]  }
 0x2ac   :  { %2303 = vmatmul.mubr.bf16.vlgmr.msra.gmra.mrb[12].mxu0 %v1604_v24  ;;  %2389 = vmatmul.mubr.bf16.vlgmr.msra.gmra.mrb[4].mxu1 %v1604_v24  ;;  %v6816_v24 = vld [vmem:[#allocation11 + $0x700] ss:$16 sps:$4 sm:$0xff]   ;;  %v6836_v45 = vld [vmem:[#allocation11 + $0x764] ss:$16 sps:$4 sm:$0xff]   ;;  %v6839_v10 = vld [vmem:[#allocation11 + $0x76c] ss:$16 sps:$4 sm:$0xff]  }
 0x2ad   :  { %2314 = vmatpush1.bf16.msra.mxu0 %v6798_v38  ;;  %2400 = vmatpush1.bf16.msra.mxu1 %v6801_v12  ;;  %v6819_v38 = vld [vmem:[#allocation11 + $0x708] ss:$16 sps:$4 sm:$0xff]   ;;  %v6834_v30 = vld [vmem:[#allocation11 + $0x760] ss:$16 sps:$4 sm:$0xff]   ;;  %v6842_v44 = vld [vmem:[#allocation11 + $0x784] ss:$16 sps:$4 sm:$0xff]  }
 0x2ae   :  { %2345 = vmatprep.mubr.bf16.mxu0 %v1607_v48  ;;  %2431 = vmatprep.mubr.bf16.mxu1 %v1607_v48  ;;  %v6837_v42 = vld [vmem:[#allocation11 + $0x768] ss:$16 sps:$4 sm:$0xff]   ;;  %v6845_v62 = vld [vmem:[#allocation11 + $0x78c] ss:$16 sps:$4 sm:$0xff]   ;;  %v6840_v48 = vld [vmem:[#allocation11 + $0x780] ss:$16 sps:$4 sm:$0xff]  }
 0x2af   :  { %2315 = vmatprep.subr.bf16.mxu0 %v6806_v59  ;;  %2401 = vmatprep.subr.bf16.mxu1 %v6809_v25  ;;  %v6843_v12 = vld [vmem:[#allocation11 + $0x788] ss:$16 sps:$4 sm:$0xff]   ;;  %v6848_v59 = vld [vmem:[#allocation11 + $0x7a4] ss:$16 sps:$4 sm:$0xff]   ;;  %v6851_v25 = vld [vmem:[#allocation11 + $0x7ac] ss:$16 sps:$4 sm:$0xff]  }
 0x2b1   :  { %2316 = vmatpush1.bf16.msra.mxu0 %v6804_v26  ;;  %2402 = vmatpush1.bf16.msra.mxu1 %v6807_v58  ;;  %v6846_v26 = vld [vmem:[#allocation11 + $0x7a0] ss:$16 sps:$4 sm:$0xff]   ;;  %v6849_v58 = vld [vmem:[#allocation11 + $0x7a8] ss:$16 sps:$4 sm:$0xff]  }
 0x2b2   :  { %2317 = vmatprep.subr.bf16.mxu0 %v6812_v39  ;;  %2403 = vmatprep.subr.bf16.mxu1 %v6815_v7  ;;  %v6854_v39 = vld [vmem:[#allocation11 + $0x7c4] ss:$16 sps:$4 sm:$0xff]   ;;  %v6857_v7 = vld [vmem:[#allocation11 + $0x7cc] ss:$16 sps:$4 sm:$0xff]  }
 0x2b5   :  { %2318 = vmatpush1.bf16.msra.mxu0 %v6810_v8  ;;  %2404 = vmatpush1.bf16.msra.mxu1 %v6813_v23  ;;  %v6852_v8 = vld [vmem:[#allocation11 + $0x7c0] ss:$16 sps:$4 sm:$0xff]   ;;  %v6855_v23 = vld [vmem:[#allocation11 + $0x7c8] ss:$16 sps:$4 sm:$0xff]  }
 0x2b6   :  { %2319 = vmatprep.subr.bf16.mxu0 %v6818_v40  ;;  %2405 = vmatprep.subr.bf16.mxu1 %v6821_v55  ;;  %v6860_v40 = vld [vmem:[#allocation11 + $0x7e4] ss:$16 sps:$4 sm:$0xff]   ;;  %v6863_v55 = vld [vmem:[#allocation11 + $0x7ec] ss:$16 sps:$4 sm:$0xff]  }
 0x2b9   :  { %2320 = vmatpush1.bf16.msra.mxu0 %v6816_v24  ;;  %2406 = vmatpush1.bf16.msra.mxu1 %v6819_v38  ;;  %v6858_v24 = vld [vmem:[#allocation11 + $0x7e0] ss:$16 sps:$4 sm:$0xff]   ;;  %v6861_v38 = vld [vmem:[#allocation11 + $0x7e8] ss:$16 sps:$4 sm:$0xff]  }
 0x2ba   :  { %2321 = vmatprep.subr.bf16.mxu0 %v6824_v56  ;;  %2407 = vmatprep.subr.bf16.mxu1 %v6827_v11  ;;  %v6866_v56 = vld [vmem:[#allocation11 + $0x804] ss:$16 sps:$4 sm:$0xff]   ;;  %v6869_v11 = vld [vmem:[#allocation11 + $0x80c] ss:$16 sps:$4 sm:$0xff]  }
 0x2bd   :  { %2322 = vmatpush1.bf16.msra.mxu0 %v6822_v43  ;;  %2408 = vmatpush1.bf16.msra.mxu1 %v6825_v32  ;;  %v6864_v43 = vld [vmem:[#allocation11 + $0x800] ss:$16 sps:$4 sm:$0xff]   ;;  %v6867_v32 = vld [vmem:[#allocation11 + $0x808] ss:$16 sps:$4 sm:$0xff]  }
 0x2be   :  { %2323 = vmatprep.subr.bf16.mxu0 %v6830_v0  ;;  %2409 = vmatprep.subr.bf16.mxu1 %v6833_v41  ;;  %v6872_v0 = vld [vmem:[#allocation11 + $0x824] ss:$16 sps:$4 sm:$0xff]   ;;  %v6875_v41 = vld [vmem:[#allocation11 + $0x82c] ss:$16 sps:$4 sm:$0xff]  }
 0x2c1   :  { %2324 = vmatpush1.bf16.msra.mxu0 %v6828_v57  ;;  %2410 = vmatpush1.bf16.msra.mxu1 %v6831_v27  ;;  %v6870_v57 = vld [vmem:[#allocation11 + $0x820] ss:$16 sps:$4 sm:$0xff]   ;;  %v6873_v27 = vld [vmem:[#allocation11 + $0x828] ss:$16 sps:$4 sm:$0xff]  }
 0x2c2   :  { %2325 = vmatprep.subr.bf16.mxu0 %v6836_v45  ;;  %2411 = vmatprep.subr.bf16.mxu1 %v6839_v10  ;;  %v6878_v45 = vld [vmem:[#allocation11 + $0x844] ss:$16 sps:$4 sm:$0xff]   ;;  %v6881_v10 = vld [vmem:[#allocation11 + $0x84c] ss:$16 sps:$4 sm:$0xff]  }
 0x2c5   :  { %2326 = vmatpush1.bf16.msra.mxu0 %v6834_v30  ;;  %2412 = vmatpush1.bf16.msra.mxu1 %v6837_v42  ;;  %v6876_v30 = vld [vmem:[#allocation11 + $0x840] ss:$16 sps:$4 sm:$0xff]   ;;  %v6879_v42 = vld [vmem:[#allocation11 + $0x848] ss:$16 sps:$4 sm:$0xff]  }
 0x2c6   :  { %2327 = vmatprep.subr.bf16.mxu0 %v6842_v44  ;;  %2413 = vmatprep.subr.bf16.mxu1 %v6845_v62  ;;  %v6884_v44 = vld [vmem:[#allocation11 + $0x864] ss:$16 sps:$4 sm:$0xff]   ;;  %v6887_v62 = vld [vmem:[#allocation11 + $0x86c] ss:$16 sps:$4 sm:$0xff]  }
 0x2c9   :  { %2328 = vmatpush1.bf16.msra.mxu0 %v6840_v48  ;;  %2414 = vmatpush1.bf16.msra.mxu1 %v6843_v12  ;;  %v6882_v48 = vld [vmem:[#allocation11 + $0x860] ss:$16 sps:$4 sm:$0xff]   ;;  %v6885_v12 = vld [vmem:[#allocation11 + $0x868] ss:$16 sps:$4 sm:$0xff]  }
 0x2ca   :  { %2329 = vmatprep.subr.bf16.mxu0 %v6848_v59  ;;  %2415 = vmatprep.subr.bf16.mxu1 %v6851_v25  ;;  %v6890_v59 = vld [vmem:[#allocation11 + $0x884] ss:$16 sps:$4 sm:$0xff]   ;;  %v6893_v25 = vld [vmem:[#allocation11 + $0x88c] ss:$16 sps:$4 sm:$0xff]  }
 0x2cd   :  { %2330 = vmatpush1.bf16.msra.mxu0 %v6846_v26  ;;  %2416 = vmatpush1.bf16.msra.mxu1 %v6849_v58  ;;  %v6888_v26 = vld [vmem:[#allocation11 + $0x880] ss:$16 sps:$4 sm:$0xff]   ;;  %v6891_v58 = vld [vmem:[#allocation11 + $0x888] ss:$16 sps:$4 sm:$0xff]  }
 0x2ce   :  { %2331 = vmatprep.subr.bf16.mxu0 %v6854_v39  ;;  %2417 = vmatprep.subr.bf16.mxu1 %v6857_v7  ;;  %v6896_v39 = vld [vmem:[#allocation12 + $0x4] ss:$8 sps:$4 sm:$0xff]   ;;  %v6894_v7 = vld [vmem:[#allocation12] ss:$8 sps:$4 sm:$0xff]  }
 0x2d1   :  { %2332 = vmatpush1.bf16.msra.mxu0 %v6852_v8  ;;  %2418 = vmatpush1.bf16.msra.mxu1 %v6855_v23  ;;  %v6899_v8 = vld [vmem:[#allocation12 + $0x14] ss:$8 sps:$4 sm:$0xff]   ;;  %v6897_v23 = vld [vmem:[#allocation12 + $0x10] ss:$8 sps:$4 sm:$0xff]  }
 0x2d2   :  { %2333 = vmatprep.subr.bf16.mxu0 %v6860_v40  ;;  %2419 = vmatprep.subr.bf16.mxu1 %v6863_v55  ;;  %v6902_v40 = vld [vmem:[#allocation12 + $0x24] ss:$8 sps:$4 sm:$0xff]   ;;  %v6900_v55 = vld [vmem:[#allocation12 + $0x20] ss:$8 sps:$4 sm:$0xff]  }
 0x2d5   :  { %2334 = vmatpush1.bf16.msra.mxu0 %v6858_v24  ;;  %2420 = vmatpush1.bf16.msra.mxu1 %v6861_v38  ;;  %v6905_v24 = vld [vmem:[#allocation12 + $0x34] ss:$8 sps:$4 sm:$0xff]   ;;  %v6903_v38 = vld [vmem:[#allocation12 + $0x30] ss:$8 sps:$4 sm:$0xff]  }
 0x2d6   :  { %2335 = vmatprep.subr.bf16.mxu0 %v6866_v56  ;;  %2421 = vmatprep.subr.bf16.mxu1 %v6869_v11  ;;  %v6908_v56 = vld [vmem:[#allocation12 + $0x44] ss:$8 sps:$4 sm:$0xff]   ;;  %v6906_v11 = vld [vmem:[#allocation12 + $0x40] ss:$8 sps:$4 sm:$0xff]  }
 0x2d9   :  { %2336 = vmatpush1.bf16.msra.mxu0 %v6864_v43  ;;  %2422 = vmatpush1.bf16.msra.mxu1 %v6867_v32  ;;  %v6911_v43 = vld [vmem:[#allocation12 + $0x54] ss:$8 sps:$4 sm:$0xff]   ;;  %v6909_v32 = vld [vmem:[#allocation12 + $0x50] ss:$8 sps:$4 sm:$0xff]  }
 0x2da   :  { %2337 = vmatprep.subr.bf16.mxu0 %v6872_v0  ;;  %2423 = vmatprep.subr.bf16.mxu1 %v6875_v41  ;;  %v6912_v0 = vld [vmem:[#allocation12 + $0x60] ss:$8 sps:$4 sm:$0xff]   ;;  %v6917_v41 = vld [vmem:[#allocation12 + $0x74] ss:$8 sps:$4 sm:$0xff]  }
 0x2dd   :  { %2338 = vmatpush1.bf16.msra.mxu0 %v6870_v57  ;;  %2424 = vmatpush1.bf16.msra.mxu1 %v6873_v27  ;;  %v6915_v57 = vld [vmem:[#allocation12 + $0x70] ss:$8 sps:$4 sm:$0xff]   ;;  %v6920_v27 = vld [vmem:[#allocation12 + $0x84] ss:$8 sps:$4 sm:$0xff]  }
 0x2de   :  { %2339 = vmatprep.subr.bf16.mxu0 %v6878_v45  ;;  %2425 = vmatprep.subr.bf16.mxu1 %v6881_v10  ;;  %v6918_v45 = vld [vmem:[#allocation12 + $0x80] ss:$8 sps:$4 sm:$0xff]   ;;  %v6923_v10 = vld [vmem:[#allocation12 + $0x94] ss:$8 sps:$4 sm:$0xff]  }
 0x2e1   :  { %2340 = vmatpush1.bf16.msra.mxu0 %v6876_v30  ;;  %2426 = vmatpush1.bf16.msra.mxu1 %v6879_v42  ;;  %v6921_v30 = vld [vmem:[#allocation12 + $0x90] ss:$8 sps:$4 sm:$0xff]   ;;  %v6926_v42 = vld [vmem:[#allocation12 + $0xa4] ss:$8 sps:$4 sm:$0xff]  }
 0x2e2   :  { %2341 = vmatprep.subr.bf16.mxu0 %v6884_v44  ;;  %2427 = vmatprep.subr.bf16.mxu1 %v6887_v62  ;;  %v6924_v44 = vld [vmem:[#allocation12 + $0xa0] ss:$8 sps:$4 sm:$0xff]   ;;  %v6929_v62 = vld [vmem:[#allocation12 + $0xb4] ss:$8 sps:$4 sm:$0xff]  }
 0x2e5   :  { %2342 = vmatpush1.bf16.msra.mxu0 %v6882_v48  ;;  %2428 = vmatpush1.bf16.msra.mxu1 %v6885_v12  ;;  %v6927_v48 = vld [vmem:[#allocation12 + $0xb0] ss:$8 sps:$4 sm:$0xff]   ;;  %v6932_v12 = vld [vmem:[#allocation12 + $0xc4] ss:$8 sps:$4 sm:$0xff]  }
 0x2e6   :  { %2343 = vmatprep.subr.bf16.mxu0 %v6890_v59  ;;  %2429 = vmatprep.subr.bf16.mxu1 %v6893_v25  ;;  %v6930_v59 = vld [vmem:[#allocation12 + $0xc0] ss:$8 sps:$4 sm:$0xff]   ;;  %v6935_v25 = vld [vmem:[#allocation12 + $0xd4] ss:$8 sps:$4 sm:$0xff]  }
 0x2e9   :  { %2344 = vmatpush1.bf16.msra.mxu0 %v6888_v26  ;;  %2430 = vmatpush1.bf16.msra.mxu1 %v6891_v58  ;;  %v6933_v26 = vld [vmem:[#allocation12 + $0xd0] ss:$8 sps:$4 sm:$0xff]   ;;  %v6938_v58 = vld [vmem:[#allocation12 + $0xe4] ss:$8 sps:$4 sm:$0xff]  }
 0x2ea   :  { %2858 = vmatprep.subr.bf16.mxu0 %v6896_v39  ;;  %v6936_v39 = vld [vmem:[#allocation12 + $0xe0] ss:$8 sps:$4 sm:$0xff]  }
 0x2ec   :  { %2346 = vmatmul.mubr.bf16.vlgmr.msra.gmra.mrb[12].mxu0 %v7889_v37  ;;  %2432 = vmatmul.mubr.bf16.vlgmr.msra.gmra.mrb[4].mxu1 %v7889_v37  ;;  %v6914_v37 = vld [vmem:[#allocation12 + $0x64] ss:$8 sps:$4 sm:$0xff]  }
 0x2ed   :  { %2859 = vmatpush1.bf16.msra.mxu0 %v6894_v7  ;;  %v6941_v7 = vld [vmem:[#allocation12 + $0xf4] ss:$8 sps:$4 sm:$0xff]  }
 0x2ee   :  { %2860 = vmatprep.subr.bf16.mxu0 %v6899_v8  ;;  %v6939_v8 = vld [vmem:[#allocation12 + $0xf0] ss:$8 sps:$4 sm:$0xff]  }
 0x2f1   :  { %2861 = vmatpush1.bf16.msra.mxu0 %v6897_v23  ;;  %v6944_v23 = vld [vmem:[#allocation12 + $0x104] ss:$8 sps:$4 sm:$0xff]  }
 0x2f2   :  { %2862 = vmatprep.subr.bf16.mxu0 %v6902_v40  ;;  %v6990_v40 = vld [vmem:[#allocation12 + $0x200] ss:$8 sps:$4 sm:$0xff]  }
 0x2f5   :  { %2863 = vmatpush1.bf16.msra.mxu0 %v6900_v55  ;;  %v6992_v55 = vld [vmem:[#allocation12 + $0x204] ss:$8 sps:$4 sm:$0xff]  }
 0x2f6   :  { %2864 = vmatprep.subr.bf16.mxu0 %v6905_v24  ;;  %v6995_v24 = vld [vmem:[#allocation12 + $0x214] ss:$8 sps:$4 sm:$0xff]   ;;  %3154 = vmatprep.subr.bf16.mxu1 %v6992_v55 }
 0x2f7   :  { %3155 = vmatpush1.bf16.msra.mxu1 %v6990_v40  ;;  %v7031_v40 = vld [vmem:[#allocation12 + $0x2d4] ss:$8 sps:$4 sm:$0xff]  }
 0x2f8   :  { %3156 = vmatprep.subr.bf16.mxu1 %v6995_v24 }
 0x2f9   :  { %2865 = vmatpush1.bf16.msra.mxu0 %v6903_v38  ;;  %v6993_v38 = vld [vmem:[#allocation12 + $0x210] ss:$8 sps:$4 sm:$0xff]  }
 0x2fa   :  { %2866 = vmatprep.subr.bf16.mxu0 %v6908_v56  ;;  %v6998_v56 = vld [vmem:[#allocation12 + $0x224] ss:$8 sps:$4 sm:$0xff]  }
 0x2fb   :  { %3157 = vmatpush1.bf16.msra.mxu1 %v6993_v38 }
 0x2fc   :  { %3158 = vmatprep.subr.bf16.mxu1 %v6998_v56 }
 0x2fd   :  { %2867 = vmatpush1.bf16.msra.mxu0 %v6906_v11  ;;  %v6996_v11 = vld [vmem:[#allocation12 + $0x220] ss:$8 sps:$4 sm:$0xff]  }
 0x2fe   :  { %2868 = vmatprep.subr.bf16.mxu0 %v6911_v43  ;;  %v7001_v43 = vld [vmem:[#allocation12 + $0x234] ss:$8 sps:$4 sm:$0xff]  }
 0x2ff   :  { %3159 = vmatpush1.bf16.msra.mxu1 %v6996_v11  ;;  %v7029_v11 = vld [vmem:[#allocation12 + $0x2d0] ss:$8 sps:$4 sm:$0xff]  }
 0x300   :  { %3160 = vmatprep.subr.bf16.mxu1 %v7001_v43 }
 0x301   :  { %2869 = vmatpush1.bf16.msra.mxu0 %v6909_v32  ;;  %v6999_v32 = vld [vmem:[#allocation12 + $0x230] ss:$8 sps:$4 sm:$0xff]  }
 0x302   :  { %2870 = vmatprep.subr.bf16.mxu0 %v6914_v37  ;;  %v7004_v37 = vld [vmem:[#allocation12 + $0x244] ss:$8 sps:$4 sm:$0xff]  }
 0x303   :  { %3161 = vmatpush1.bf16.msra.mxu1 %v6999_v32 }
 0x304   :  { %3162 = vmatprep.subr.bf16.mxu1 %v7004_v37 }
 0x305   :  { %2871 = vmatpush1.bf16.msra.mxu0 %v6912_v0  ;;  %v7002_v0 = vld [vmem:[#allocation12 + $0x240] ss:$8 sps:$4 sm:$0xff]  }
 0x306   :  { %2872 = vmatprep.subr.bf16.mxu0 %v6917_v41  ;;  %v7007_v41 = vld [vmem:[#allocation12 + $0x254] ss:$8 sps:$4 sm:$0xff]  }
 0x307   :  { %3163 = vmatpush1.bf16.msra.mxu1 %v7002_v0 }
 0x308   :  { %3164 = vmatprep.subr.bf16.mxu1 %v7007_v41 }
 0x309   :  { %2873 = vmatpush1.bf16.msra.mxu0 %v6915_v57  ;;  %v7005_v57 = vld [vmem:[#allocation12 + $0x250] ss:$8 sps:$4 sm:$0xff]  }
 0x30a   :  { %2874 = vmatprep.subr.bf16.mxu0 %v6920_v27  ;;  %v7010_v27 = vld [vmem:[#allocation12 + $0x264] ss:$8 sps:$4 sm:$0xff]  }
 0x30b   :  { %3165 = vmatpush1.bf16.msra.mxu1 %v7005_v57 }
 0x30c   :  { %3166 = vmatprep.subr.bf16.mxu1 %v7010_v27 }
 0x30d   :  { %2875 = vmatpush1.bf16.msra.mxu0 %v6918_v45  ;;  %v7008_v45 = vld [vmem:[#allocation12 + $0x260] ss:$8 sps:$4 sm:$0xff]  }
 0x30e   :  { %2876 = vmatprep.subr.bf16.mxu0 %v6923_v10  ;;  %v7013_v10 = vld [vmem:[#allocation12 + $0x274] ss:$8 sps:$4 sm:$0xff]  }
 0x30f   :  { %3167 = vmatpush1.bf16.msra.mxu1 %v7008_v45 }
 0x310   :  { %3168 = vmatprep.subr.bf16.mxu1 %v7013_v10  ;;  %v8299_v10 = vmax.f32 %v7831_v29, 0.0 }
 0x311   :  { %2877 = vmatpush1.bf16.msra.mxu0 %v6921_v30  ;;  %v7011_v30 = vld [vmem:[#allocation12 + $0x270] ss:$8 sps:$4 sm:$0xff]  }
 0x312   :  { %2878 = vmatprep.subr.bf16.mxu0 %v6926_v42  ;;  %v7016_v42 = vld [vmem:[#allocation12 + $0x284] ss:$8 sps:$4 sm:$0xff]  }
 0x313   :  { %3169 = vmatpush1.bf16.msra.mxu1 %v7011_v30 }
 0x314   :  { %3170 = vmatprep.subr.bf16.mxu1 %v7016_v42  ;;  %v8300_v42 = vmax.f32 %v7874_v47, 0.0 }
 0x315   :  { %2879 = vmatpush1.bf16.msra.mxu0 %v6924_v44  ;;  %v7014_v44 = vld [vmem:[#allocation12 + $0x280] ss:$8 sps:$4 sm:$0xff]  }
 0x316   :  { %2880 = vmatprep.subr.bf16.mxu0 %v6929_v62  ;;  %v7019_v62 = vld [vmem:[#allocation12 + $0x294] ss:$8 sps:$4 sm:$0xff]  }
 0x317   :  { %3171 = vmatpush1.bf16.msra.mxu1 %v7014_v44 }
 0x318   :  { %3172 = vmatprep.subr.bf16.mxu1 %v7019_v62 }
 0x319   :  { %2881 = vmatpush1.bf16.msra.mxu0 %v6927_v48  ;;  %v7017_v48 = vld [vmem:[#allocation12 + $0x290] ss:$8 sps:$4 sm:$0xff]  }
 0x31a   :  { %2882 = vmatprep.subr.bf16.mxu0 %v6932_v12  ;;  %v7022_v12 = vld [vmem:[#allocation12 + $0x2a4] ss:$8 sps:$4 sm:$0xff]  }
 0x31b   :  { %3173 = vmatpush1.bf16.msra.mxu1 %v7017_v48 }
 0x31c   :  { %3174 = vmatprep.subr.bf16.mxu1 %v7022_v12 }
 0x31d   :  { %2883 = vmatpush1.bf16.msra.mxu0 %v6930_v59  ;;  %v7020_v59 = vld [vmem:[#allocation12 + $0x2a0] ss:$8 sps:$4 sm:$0xff]  }
 0x31e   :  { %2884 = vmatprep.subr.bf16.mxu0 %v6935_v25  ;;  %v7025_v25 = vld [vmem:[#allocation12 + $0x2b4] ss:$8 sps:$4 sm:$0xff]  }
 0x31f   :  { %3175 = vmatpush1.bf16.msra.mxu1 %v7020_v59 }
 0x320   :  { %3176 = vmatprep.subr.bf16.mxu1 %v7025_v25  ;;  %v8301_v25 = vmax.f32 %v7829_v46, 0.0 }
 0x321   :  { %2885 = vmatpush1.bf16.msra.mxu0 %v6933_v26  ;;  %v7023_v26 = vld [vmem:[#allocation12 + $0x2b0] ss:$8 sps:$4 sm:$0xff]  }
 0x322   :  { %2886 = vmatprep.subr.bf16.mxu0 %v6938_v58  ;;  %v7028_v58 = vld [vmem:[#allocation12 + $0x2c4] ss:$8 sps:$4 sm:$0xff]  }
 0x323   :  { %3177 = vmatpush1.bf16.msra.mxu1 %v7023_v26 }
 0x324   :  { %3178 = vmatprep.subr.bf16.mxu1 %v7028_v58  ;;  %v8302_v58 = vmax.f32 %v7856_v28, 0.0 }
 0x325   :  { %2887 = vmatpush1.bf16.msra.mxu0 %v6936_v39  ;;  %v1608_v39 = vld [vmem:[#allocation9 + $0x8] sm:$0xf] }
 0x326   :  { %2888 = vmatprep.subr.bf16.mxu0 %v6941_v7  ;;  %v7026_v7 = vld [vmem:[#allocation12 + $0x2c0] ss:$8 sps:$4 sm:$0xff]   ;;  %v1617_v55 = vrot.slane %v1608_v39, %v7821_v16  ;;  %v1625_v24 = vrot.slane %v1608_v39, %v7850_v60 }
 0x327   :  { %3179 = vmatpush1.bf16.msra.mxu1 %v7026_v7 }
 0x328   :  { %3180 = vmatprep.subr.bf16.mxu1 %v7031_v40 }
 0x329   :  { %2889 = vmatpush1.bf16.msra.mxu0 %v6939_v8  ;;  %v1613_v8 = vrot.slane %v1608_v39, %v7818_v15 }
 0x32a   :  { %2901 = vmatprep.subr.bf16.mxu0 %v6944_v23  ;;  %v1621_v23 = vrot.slane %v1608_v39, %v7869_v31 }
 0x32b   :  { %3181 = vmatpush1.bf16.msra.mxu1 %v7029_v11 }
 0x3bf   :  { %v2347_v38 = vpop.f32.mrb[12].mxu0  ;;  %v2433_v56 = vpop.f32.mrb[4].mxu1 }
 0x3c0   :  { %v6384_v43 = vadd.f32 %v2347_v38, %v1613_v8  ;;  %v6388_v32 = vadd.f32 %v2433_v56, %v1621_v23  ;;  %v2349_v37 = vpop.f32.mrb[13].mxu0  ;;  %v2435_v0 = vpop.f32.mrb[5].mxu1  ;;  %v8303_v38 = vmax.f32 %v7833_v14, 0.0  ;;  %v8304_v56 = vmax.f32 %v7877_v9, 0.0  ;;  %v6942_v9 = vld [vmem:[#allocation12 + $0x100] ss:$8 sps:$4 sm:$0xff]  }
 0x3c1   :  { %v6385_v41 = vadd.f32 %v2349_v37, %v1617_v55  ;;  %v6389_v57 = vadd.f32 %v2435_v0, %v1625_v24  ;;  %v2351_v27 = vpop.f32.mrb[14].mxu0  ;;  %v2437_v45 = vpop.f32.mrb[6].mxu1 }
 0x3c2   :  { %v2442_v30 = vadd.f32 %v6384_v43, %v8299_v10  ;;  %v2444_v44 = vadd.f32 %v6388_v32, %v8300_v42  ;;  %v6386_v62 = vadd.f32 %v2351_v27, %v1613_v8  ;;  %v6390_v48 = vadd.f32 %v2437_v45, %v1621_v23  ;;  %v2353_v12 = vpop.f32.mrb[15].mxu0  ;;  %v2439_v59 = vpop.f32.mrb[7].mxu1  ;;  %v6947_v10 = vld [vmem:[#allocation12 + $0x114] ss:$8 sps:$4 sm:$0xff]  }
 0x3c3   :  { %v2443_v26 = vadd.f32 %v6385_v41, %v8301_v25  ;;  %v2445_v39 = vadd.f32 %v6389_v57, %v8302_v58  ;;  %v6387_v7 = vadd.f32 %v2353_v12, %v1617_v55  ;;  %v6391_v40 = vadd.f32 %v2439_v59, %v1625_v24  ;;  %v6953_v42 = vld [vmem:[#allocation12 + $0x134] ss:$8 sps:$4 sm:$0xff]   ;;  %v6957_v59 = vld [vmem:[#allocation12 + $0x150] ss:$8 sps:$4 sm:$0xff]   ;;  %v6962_v25 = vld [vmem:[#allocation12 + $0x164] ss:$8 sps:$4 sm:$0xff]  }
 0x3c4   :  { %v2446_v29 = vadd.f32 %v6386_v62, %v8303_v38  ;;  %v2448_v47 = vadd.f32 %v6390_v48, %v8304_v56  ;;  %v8305_v8 = vmax.f32 %v7835_v13, 0.0  ;;  %v8306_v43 = vmax.f32 %v7861_v61, 0.0  ;;  %v6945_v13 = vld [vmem:[#allocation12 + $0x110] ss:$8 sps:$4 sm:$0xff]   ;;  %v6950_v61 = vld [vmem:[#allocation12 + $0x124] ss:$8 sps:$4 sm:$0xff]  }
 0x3c5   :  { %v2450_v46 = vmax.f32 %v2442_v30, 0.0  ;;  %v2452_v37 = vmax.f32 %v2444_v44, 0.0  ;;  %v2451_v41 = vmax.f32 %v2443_v26, 0.0  ;;  %v2453_v55 = vmax.f32 %v2445_v39, 0.0  ;;  %v6948_v30 = vld [vmem:[#allocation12 + $0x120] ss:$8 sps:$4 sm:$0xff]  }
 0x3c6   :  { %v2447_v23 = vadd.f32 %v6387_v7, %v8305_v8  ;;  %v2449_v32 = vadd.f32 %v6391_v40, %v8306_v43  ;;  %v2454_v0 = vmax.f32 %v2446_v29, 0.0  ;;  %v2456_v28 = vmax.f32 %v2448_v47, 0.0  ;;  %v6951_v44 = vld [vmem:[#allocation12 + $0x130] ss:$8 sps:$4 sm:$0xff]   ;;  %v6956_v62 = vld [vmem:[#allocation12 + $0x144] ss:$8 sps:$4 sm:$0xff]  }
 0x3c7   :  { %v6954_v48 = vld [vmem:[#allocation12 + $0x140] ss:$8 sps:$4 sm:$0xff]   ;;  %v6959_v12 = vld [vmem:[#allocation12 + $0x154] ss:$8 sps:$4 sm:$0xff]   ;;  %v6963_v39 = vld [vmem:[#allocation12 + $0x170] ss:$8 sps:$4 sm:$0xff]  }
 0x3c8   :  { %v2455_v24 = vmax.f32 %v2447_v23, 0.0  ;;  %v2457_v11 = vmax.f32 %v2449_v32, 0.0  ;;  %v2522_v57 = vpack.c.bf16 %v2454_v0, %v2450_v46  ;;  %v7913_v14 = vpack.c.bf16 %v2456_v28, %v2452_v37  ;;  %v6960_v26 = vld [vmem:[#allocation12 + $0x160] ss:$8 sps:$4 sm:$0xff]   ;;  %v6965_v58 = vld [vmem:[#allocation12 + $0x174] ss:$8 sps:$4 sm:$0xff]  }
 0x3c9   :  { %v6968_v7 = vld [vmem:[#allocation12 + $0x184] ss:$8 sps:$4 sm:$0xff]   ;;  %v6966_v40 = vld [vmem:[#allocation12 + $0x180] ss:$8 sps:$4 sm:$0xff]   ;;  %v6971_v38 = vld [vmem:[#allocation12 + $0x194] ss:$8 sps:$4 sm:$0xff]  }
 0x3ca   :  { %v2523_v27 = vpack.c.bf16 %v2455_v24, %v2451_v41  ;;  %v2525_v45 = vpack.c.bf16 %v2457_v11, %v2453_v55  ;;  %v6969_v29 = vld [vmem:[#allocation12 + $0x190] ss:$8 sps:$4 sm:$0xff]   ;;  %v6974_v56 = vld [vmem:[#allocation12 + $0x1a4] ss:$8 sps:$4 sm:$0xff]   ;;  %v6972_v47 = vld [vmem:[#allocation12 + $0x1a0] ss:$8 sps:$4 sm:$0xff]  }
 0x3cb   :  { %v6977_v8 = vld [vmem:[#allocation12 + $0x1b4] ss:$8 sps:$4 sm:$0xff]   ;;  %v6975_v23 = vld [vmem:[#allocation12 + $0x1b0] ss:$8 sps:$4 sm:$0xff]   ;;  %v6980_v43 = vld [vmem:[#allocation12 + $0x1c4] ss:$8 sps:$4 sm:$0xff]  }
 0x3cc   :  { %2890 = vmatprep.mubr.bf16.mxu0 %v2523_v27  ;;  %v6978_v32 = vld [vmem:[#allocation12 + $0x1c0] ss:$8 sps:$4 sm:$0xff]   ;;  %v6983_v46 = vld [vmem:[#allocation12 + $0x1d4] ss:$8 sps:$4 sm:$0xff]   ;;  %v6981_v37 = vld [vmem:[#allocation12 + $0x1d0] ss:$8 sps:$4 sm:$0xff]  }
 0x3cd   :  { %2891 = vmatmul.mubr.bf16.vlgmr.msra.gmra.mrb[16].mxu0 %v2522_v57  ;;  %v6986_v0 = vld [vmem:[#allocation12 + $0x1e4] ss:$8 sps:$4 sm:$0xff]   ;;  %v6984_v28 = vld [vmem:[#allocation12 + $0x1e0] ss:$8 sps:$4 sm:$0xff]   ;;  %v6989_v41 = vld [vmem:[#allocation12 + $0x1f4] ss:$8 sps:$4 sm:$0xff]  }
 0x3ce   :  { %2902 = vmatpush1.bf16.msra.mxu0 %v6942_v9  ;;  %2933 = vmatprep.mubr.bf16.mxu0 %v2525_v45  ;;  %v6987_v55 = vld [vmem:[#allocation12 + $0x1f0] ss:$8 sps:$4 sm:$0xff]   ;;  %v7034_v24 = vld [vmem:[#allocation12 + $0x2e4] ss:$8 sps:$4 sm:$0xff]   ;;  %v7032_v11 = vld [vmem:[#allocation12 + $0x2e0] ss:$8 sps:$4 sm:$0xff]  }
 0x3cf   :  { %2903 = vmatprep.subr.bf16.mxu0 %v6947_v10  ;;  %3182 = vmatprep.subr.bf16.mxu1 %v7034_v24  ;;  %v7037_v57 = vld [vmem:[#allocation12 + $0x2f4] ss:$8 sps:$4 sm:$0xff]   ;;  %v7035_v27 = vld [vmem:[#allocation12 + $0x2f0] ss:$8 sps:$4 sm:$0xff]   ;;  %v7040_v9 = vld [vmem:[#allocation12 + $0x304] ss:$8 sps:$4 sm:$0xff]  }
 0x3d0   :  { %3183 = vmatpush1.bf16.msra.mxu1 %v7032_v11  ;;  %v2526_v45 = vld [vmem:[#allocation9 + $0xc] sm:$0x3]  ;;  %v7064_v24 = vld [vmem:[#allocation12 + $0x384] ss:$8 sps:$4 sm:$0xff]  }
 0x3d1   :  { %3184 = vmatprep.subr.bf16.mxu1 %v7037_v57  ;;  %v2535_v10 = vrot.slane %v2526_v45, %v7821_v16  ;;  %v7062_v11 = vld [vmem:[#allocation12 + $0x380] ss:$8 sps:$4 sm:$0xff]   ;;  %v7067_v57 = vld [vmem:[#allocation12 + $0x394] ss:$8 sps:$4 sm:$0xff]  }
 0x3d2   :  { %2904 = vmatpush1.bf16.msra.mxu0 %v6945_v13  ;;  %v2531_v13 = vrot.slane %v2526_v45, %v7818_v15  ;;  %v7068_v45 = vld [vmem:[#allocation12 + $0x3a0] ss:$8 sps:$4 sm:$0xff]  }
 0x3d3   :  { %2905 = vmatprep.subr.bf16.mxu0 %v6950_v61 }
 0x3d4   :  { %3185 = vmatpush1.bf16.msra.mxu1 %v7035_v27  ;;  %v7065_v27 = vld [vmem:[#allocation12 + $0x390] ss:$8 sps:$4 sm:$0xff]  }
 0x3d5   :  { %3407 = vmatprep.subr.bf16.mxu1 %v7040_v9  ;;  %v7070_v9 = vld [vmem:[#allocation12 + $0x3a4] ss:$8 sps:$4 sm:$0xff]  }
 0x3d6   :  { %2906 = vmatpush1.bf16.msra.mxu0 %v6948_v30 }
 0x3d7   :  { %2907 = vmatprep.subr.bf16.mxu0 %v6953_v42 }
 0x3da   :  { %2908 = vmatpush1.bf16.msra.mxu0 %v6951_v44 }
 0x3db   :  { %2909 = vmatprep.subr.bf16.mxu0 %v6956_v62 }
 0x3de   :  { %2910 = vmatpush1.bf16.msra.mxu0 %v6954_v48 }
 0x3df   :  { %2911 = vmatprep.subr.bf16.mxu0 %v6959_v12 }
 0x3e2   :  { %2912 = vmatpush1.bf16.msra.mxu0 %v6957_v59 }
 0x3e3   :  { %2913 = vmatprep.subr.bf16.mxu0 %v6962_v25 }
 0x3e6   :  { %2914 = vmatpush1.bf16.msra.mxu0 %v6960_v26 }
 0x3e7   :  { %2915 = vmatprep.subr.bf16.mxu0 %v6965_v58 }
 0x3ea   :  { %2916 = vmatpush1.bf16.msra.mxu0 %v6963_v39 }
 0x3eb   :  { %2917 = vmatprep.subr.bf16.mxu0 %v6968_v7  ;;  %v7038_v7 = vld [vmem:[#allocation12 + $0x300] ss:$8 sps:$4 sm:$0xff]  }
 0x3ee   :  { %2918 = vmatpush1.bf16.msra.mxu0 %v6966_v40 }
 0x3ef   :  { %2919 = vmatprep.subr.bf16.mxu0 %v6971_v38  ;;  %v7043_v38 = vld [vmem:[#allocation12 + $0x314] ss:$8 sps:$4 sm:$0xff]  }
 0x3f2   :  { %2920 = vmatpush1.bf16.msra.mxu0 %v6969_v29  ;;  %v7041_v29 = vld [vmem:[#allocation12 + $0x310] ss:$8 sps:$4 sm:$0xff]  }
 0x3f3   :  { %2921 = vmatprep.subr.bf16.mxu0 %v6974_v56  ;;  %v7046_v56 = vld [vmem:[#allocation12 + $0x324] ss:$8 sps:$4 sm:$0xff]  }
 0x3f6   :  { %2922 = vmatpush1.bf16.msra.mxu0 %v6972_v47  ;;  %v7044_v47 = vld [vmem:[#allocation12 + $0x320] ss:$8 sps:$4 sm:$0xff]  }
 0x3f7   :  { %2923 = vmatprep.subr.bf16.mxu0 %v6977_v8  ;;  %v7049_v8 = vld [vmem:[#allocation12 + $0x334] ss:$8 sps:$4 sm:$0xff]  }
 0x3fa   :  { %2924 = vmatpush1.bf16.msra.mxu0 %v6975_v23  ;;  %v7047_v23 = vld [vmem:[#allocation12 + $0x330] ss:$8 sps:$4 sm:$0xff]  }
 0x3fb   :  { %2925 = vmatprep.subr.bf16.mxu0 %v6980_v43  ;;  %v7052_v43 = vld [vmem:[#allocation12 + $0x344] ss:$8 sps:$4 sm:$0xff]  }
 0x3fe   :  { %2926 = vmatpush1.bf16.msra.mxu0 %v6978_v32  ;;  %v7050_v32 = vld [vmem:[#allocation12 + $0x340] ss:$8 sps:$4 sm:$0xff]  }
 0x3ff   :  { %2927 = vmatprep.subr.bf16.mxu0 %v6983_v46  ;;  %v7055_v46 = vld [vmem:[#allocation12 + $0x354] ss:$8 sps:$4 sm:$0xff]  }
 0x402   :  { %2928 = vmatpush1.bf16.msra.mxu0 %v6981_v37  ;;  %v7053_v37 = vld [vmem:[#allocation12 + $0x350] ss:$8 sps:$4 sm:$0xff]  }
 0x403   :  { %2929 = vmatprep.subr.bf16.mxu0 %v6986_v0  ;;  %v7058_v0 = vld [vmem:[#allocation12 + $0x364] ss:$8 sps:$4 sm:$0xff]  }
 0x406   :  { %2930 = vmatpush1.bf16.msra.mxu0 %v6984_v28  ;;  %v7056_v28 = vld [vmem:[#allocation12 + $0x360] ss:$8 sps:$4 sm:$0xff]  }
 0x407   :  { %2931 = vmatprep.subr.bf16.mxu0 %v6989_v41  ;;  %v7061_v41 = vld [vmem:[#allocation12 + $0x374] ss:$8 sps:$4 sm:$0xff]  }
 0x40a   :  { %2932 = vmatpush1.bf16.msra.mxu0 %v6987_v55  ;;  %v7059_v55 = vld [vmem:[#allocation12 + $0x370] ss:$8 sps:$4 sm:$0xff]  }
 0x40d   :  { %2934 = vmatmul.mubr.bf16.vlgmr.msra.gmra.mrb[16].mxu0 %v7913_v14 }
 0x4e0   :  { %v2935_v61 = vpop.f32.mrb[16].mxu0 }
 0x4e1   :  { %v2937_v30 = vpop.f32.mrb[17].mxu0  ;;  %v7920_v44 = vadd.f32 %v2935_v61, %v2531_v13  ;;  %v7076_v61 = vld [vmem:[#allocation12 + $0x3c4] ss:$8 sps:$4 sm:$0xff]  }
 0x4e2   :  { %v7918_v42 = vadd.f32 %v2937_v30, %v2535_v10  ;;  %v2939_v14 = vpop.f32.mrb[18].mxu0  ;;  %v7074_v30 = vld [vmem:[#allocation12 + $0x3c0] ss:$8 sps:$4 sm:$0xff]  }
 0x4e3   :  { %v7922_v62 = vadd.f32 %v2939_v14, %v2531_v13  ;;  %v2941_v48 = vpop.f32.mrb[19].mxu0  ;;  %v2944_v58 = vmax.f32 %v7920_v44, 0.0  ;;  %v7071_v13 = vld [vmem:[#allocation12 + $0x3b0] ss:$8 sps:$4 sm:$0xff]   ;;  %v7079_v14 = vld [vmem:[#allocation12 + $0x3d4] ss:$8 sps:$4 sm:$0xff]  }
 0x4e4   :  { %v7924_v12 = vadd.f32 %v2941_v48, %v2535_v10  ;;  %v2945_v25 = vmax.f32 %v7918_v42, 0.0  ;;  %v7073_v10 = vld [vmem:[#allocation12 + $0x3b4] ss:$8 sps:$4 sm:$0xff]   ;;  %v7077_v48 = vld [vmem:[#allocation12 + $0x3d0] ss:$8 sps:$4 sm:$0xff]   ;;  %v7107_v44 = vld [vmem:[#allocation14 + $0xa8] sm:$0xff]  }
 0x4e5   :  { %v2946_v59 = vmax.f32 %v7922_v62, 0.0  ;;  %v7108_v42 = vld [vmem:[#allocation14 + $0xb0] sm:$0xff]   ;;  %v7109_v62 = vld [vmem:[#allocation14 + $0xb8] sm:$0xff]  }
 0x4e6   :  { %v2947_v26 = vmax.f32 %v7924_v12, 0.0  ;;  %v7110_v12 = vld [vmem:[#allocation14 + $0xc0] sm:$0xff]  }
 0x4e7   :  { %v2980_v40 = vpack.c.bf16 %v2946_v59, %v2944_v58 }
 0x4e8   :  { %v2981_v39 = vpack.c.bf16 %v2947_v26, %v2945_v25 }
 0x4ea   :  { %3186 = vmatprep.mubr.bf16.mxu1 %v2981_v39  ;;  %v7082_v39 = vld [vmem:[#allocation12 + $0x3e4] ss:$8 sps:$4 sm:$0xff]  }
 0x4eb   :  { %3187 = vmatmul.mubr.bf16.vlgmr.msra.gmra.mrb[8].mxu1 %v2980_v40  ;;  %v7085_v40 = vld [vmem:[#allocation12 + $0x3f4] ss:$8 sps:$4 sm:$0xff]  }
 0x4ec   :  { %3408 = vmatpush1.bf16.msra.mxu1 %v7038_v7  ;;  %v7080_v7 = vld [vmem:[#allocation12 + $0x3e0] ss:$8 sps:$4 sm:$0xff]  }
 0x4ed   :  { %3409 = vmatprep.subr.bf16.mxu1 %v7043_v38  ;;  %v7083_v38 = vld [vmem:[#allocation12 + $0x3f0] ss:$8 sps:$4 sm:$0xff]  }
 0x4f0   :  { %3410 = vmatpush1.bf16.msra.mxu1 %v7041_v29  ;;  %v7086_v29 = vld [vmem:[#allocation14 + $0x40] sm:$0xff]  }
 0x4f1   :  { %3411 = vmatprep.subr.bf16.mxu1 %v7046_v56  ;;  %v7087_v56 = vld [vmem:[#allocation14] sm:$0xff]   ;;  %6154 = vmatprep.subr.bf16.mxu0 %v7086_v29  ;;  %v7098_v29 = vld [vmem:[#allocation14 + $0x70] sm:$0xff]  }
 0x4f2   :  { %6155 = vmatpush3.bf16.msra.mxu0 %v7087_v56  ;;  %v7099_v56 = vld [vmem:[#allocation14 + $0x30] sm:$0xff]  }
 0x4f4   :  { %3412 = vmatpush1.bf16.msra.mxu1 %v7044_v47  ;;  %v7088_v47 = vld [vmem:[#allocation14 + $0x48] sm:$0xff]  }
 0x4f5   :  { %3413 = vmatprep.subr.bf16.mxu1 %v7049_v8  ;;  %v7089_v8 = vld [vmem:[#allocation14 + $0x8] sm:$0xff]   ;;  %6156 = vmatprep.subr.bf16.mxu0 %v7088_v47  ;;  %v7100_v47 = vld [vmem:[#allocation14 + $0x78] sm:$0xff]  }
 0x4f6   :  { %6157 = vmatpush3.bf16.msra.mxu0 %v7089_v8  ;;  %v7101_v8 = vld [vmem:[#allocation14 + $0x38] sm:$0xff]  }
 0x4f8   :  { %3414 = vmatpush1.bf16.msra.mxu1 %v7047_v23  ;;  %v7090_v23 = vld [vmem:[#allocation14 + $0x50] sm:$0xff]  }
 0x4f9   :  { %3415 = vmatprep.subr.bf16.mxu1 %v7052_v43  ;;  %v7091_v43 = vld [vmem:[#allocation14 + $0x10] sm:$0xff]   ;;  %6158 = vmatprep.subr.bf16.mxu0 %v7090_v23  ;;  %v7102_v23 = vld [vmem:[#allocation14 + $0x80] sm:$0xff]  }
 0x4fa   :  { %6159 = vmatpush3.bf16.msra.mxu0 %v7091_v43  ;;  %v7321_v43 = vmov 0.0  }
 0x4fc   :  { %3416 = vmatpush1.bf16.msra.mxu1 %v7050_v32  ;;  %v7092_v32 = vld [vmem:[#allocation14 + $0x58] sm:$0xff]  }
 0x4fd   :  { %3417 = vmatprep.subr.bf16.mxu1 %v7055_v46  ;;  %v7093_v46 = vld [vmem:[#allocation14 + $0x18] sm:$0xff]   ;;  %6160 = vmatprep.subr.bf16.mxu0 %v7092_v32  ;;  %v7103_v32 = vld [vmem:[#allocation14 + $0x88] sm:$0xff]  }
 0x4fe   :  { %6161 = vmatpush3.bf16.msra.mxu0 %v7093_v46  ;;  %v7104_v46 = vld [vmem:[#allocation14 + $0x90] sm:$0xff]  }
 0x500   :  { %3418 = vmatpush1.bf16.msra.mxu1 %v7053_v37  ;;  %v7094_v37 = vld [vmem:[#allocation14 + $0x60] sm:$0xff]  }
 0x501   :  { %3419 = vmatprep.subr.bf16.mxu1 %v7058_v0  ;;  %v7095_v0 = vld [vmem:[#allocation14 + $0x20] sm:$0xff]   ;;  %6162 = vmatprep.subr.bf16.mxu0 %v7094_v37  ;;  %v7105_v37 = vld [vmem:[#allocation14 + $0x98] sm:$0xff]  }
 0x502   :  { %6163 = vmatpush3.bf16.msra.mxu0 %v7095_v0  ;;  %v7106_v0 = vld [vmem:[#allocation14 + $0xa0] sm:$0xff]  }
 0x504   :  { %3420 = vmatpush1.bf16.msra.mxu1 %v7056_v28  ;;  %v2982_v28 = vld [vmem:[#allocation9 + $0xe] sm:$0x3] }
 0x505   :  { %3421 = vmatprep.subr.bf16.mxu1 %v7061_v41  ;;  %v2987_v41 = vrot.slane %v2982_v28, %v7818_v15 }
 0x508   :  { %3422 = vmatpush1.bf16.msra.mxu1 %v7059_v55  ;;  %v2991_v55 = vrot.slane %v2982_v28, %v7821_v16  ;;  %v3235_v28 = vld [vmem:[#allocation9 + $0x10] sm:$0x3] }
 0x509   :  { %3423 = vmatprep.subr.bf16.mxu1 %v7064_v24 }
 0x50c   :  { %3424 = vmatpush1.bf16.msra.mxu1 %v7062_v11 }
 0x50d   :  { %3425 = vmatprep.subr.bf16.mxu1 %v7067_v57 }
 0x510   :  { %3426 = vmatpush1.bf16.msra.mxu1 %v7065_v27 }
 0x511   :  { %3427 = vmatprep.subr.bf16.mxu1 %v7070_v9 }
 0x514   :  { %3428 = vmatpush1.bf16.msra.mxu1 %v7068_v45 }
 0x515   :  { %3429 = vmatprep.subr.bf16.mxu1 %v7073_v10 }
 0x518   :  { %3430 = vmatpush1.bf16.msra.mxu1 %v7071_v13 }
 0x519   :  { %3431 = vmatprep.subr.bf16.mxu1 %v7076_v61 }
 0x51c   :  { %3432 = vmatpush1.bf16.msra.mxu1 %v7074_v30 }
 0x51d   :  { %3433 = vmatprep.subr.bf16.mxu1 %v7079_v14 }
 0x520   :  { %3434 = vmatpush1.bf16.msra.mxu1 %v7077_v48 }
 0x521   :  { %3435 = vmatprep.subr.bf16.mxu1 %v7082_v39 }
 0x524   :  { %3436 = vmatpush1.bf16.msra.mxu1 %v7080_v7 }
 0x525   :  { %3437 = vmatprep.subr.bf16.mxu1 %v7085_v40  ;;  %v7096_v40 = vld [vmem:[#allocation14 + $0x68] sm:$0xff]  }
 0x526   :  { %6164 = vmatprep.subr.bf16.mxu0 %v7096_v40 }
 0x528   :  { %3438 = vmatpush1.bf16.msra.mxu1 %v7083_v38  ;;  %v7097_v38 = vld [vmem:[#allocation14 + $0x28] sm:$0xff]  }
 0x529   :  { %6165 = vmatpush3.bf16.msra.mxu0 %v7097_v38  ;;  %6268 = vmatprep.subr.bf16.mxu1 %v7321_v43 }
 0x52a   :  { %6166 = vmatprep.subr.bf16.mxu0 %v7098_v29 }
 0x52d   :  { %6167 = vmatpush3.bf16.msra.mxu0 %v7099_v56 }
 0x52e   :  { %6168 = vmatprep.subr.bf16.mxu0 %v7100_v47  ;;  %v7115_v47 = vld [vmem:[#allocation14 + $0xe8] sm:$0xff]  }
 0x531   :  { %6169 = vmatpush3.bf16.msra.mxu0 %v7101_v8 }
 0x532   :  { %6288 = vmatprep.subr.bf16.mxu0 %v7321_v43 }
 0x5be   :  { %v3188_v24 = vpop.f32.mrb[8].mxu1 }
 0x5bf   :  { %v3189_v11 = vadd.f32 %v3188_v24, %v2987_v41  ;;  %v3190_v57 = vpop.f32.mrb[9].mxu1 }
 0x5c0   :  { %v3191_v27 = vadd.f32 %v3190_v57, %v2991_v55  ;;  %v3192_v9 = vpop.f32.mrb[10].mxu1 }
 0x5c1   :  { %v3193_v45 = vadd.f32 %v3192_v9, %v2987_v41  ;;  %v3194_v10 = vpop.f32.mrb[11].mxu1  ;;  %v3197_v61 = vmax.f32 %v3189_v11, 0.0  ;;  %v3240_v41 = vrot.slane %v3235_v28, %v7818_v15 }
 0x5c2   :  { %v3195_v13 = vadd.f32 %v3194_v10, %v2991_v55  ;;  %v3198_v14 = vmax.f32 %v3191_v27, 0.0  ;;  %v3244_v55 = vrot.slane %v3235_v28, %v7821_v16 }
 0x5c3   :  { %v3199_v30 = vmax.f32 %v3193_v45, 0.0 }
 0x5c4   :  { %v3200_v48 = vmax.f32 %v3195_v13, 0.0 }
 0x5c5   :  { %v3233_v39 = vpack.c.bf16 %v3199_v30, %v3197_v61 }
 0x5c6   :  { %v3234_v7 = vpack.c.bf16 %v3200_v48, %v3198_v14 }
 0x5c8   :  { %3439 = vmatprep.mubr.bf16.mxu1 %v3234_v7 }
 0x5c9   :  { %3440 = vmatmul.mubr.bf16.vlgmr.msra.gmra.mrb[12].mxu1 %v3233_v39 }
 0x5ca   :  { %6269 = vmatpush3.bf16.msra.mxu1 %v7102_v23  ;;  %6284 = vmatprep.mubr.msk.bf16.mxu1 %vm7322_vm1, %v7321_v43  ;;  %v6070_v23 = vld [vmem:[#allocation9 + $0x12] ss:$0 sm:$0xff] }
 0x5cb   :  { %6270 = vmatprep.subr.bf16.mxu1 %v7321_v43 }
 0x5ce   :  { %6271 = vmatpush3.bf16.msra.mxu1 %v7103_v32 }
 0x5cf   :  { %6272 = vmatprep.subr.bf16.mxu1 %v7321_v43 }
 0x5d2   :  { %6273 = vmatpush3.bf16.msra.mxu1 %v7104_v46 }
 0x5d3   :  { %6274 = vmatprep.subr.bf16.mxu1 %v7321_v43 }
 0x5d6   :  { %6275 = vmatpush3.bf16.msra.mxu1 %v7105_v37 }
 0x5d7   :  { %6276 = vmatprep.subr.bf16.mxu1 %v7321_v43 }
 0x5da   :  { %6277 = vmatpush3.bf16.msra.mxu1 %v7106_v0 }
 0x5db   :  { %6278 = vmatprep.subr.bf16.mxu1 %v7321_v43 }
 0x5de   :  { %6279 = vmatpush3.bf16.msra.mxu1 %v7107_v44 }
 0x5df   :  { %6280 = vmatprep.subr.bf16.mxu1 %v7321_v43 }
 0x5e2   :  { %6281 = vmatpush3.bf16.msra.mxu1 %v7108_v42 }
 0x5e3   :  { %6282 = vmatprep.subr.bf16.mxu1 %v7321_v43 }
 0x5e6   :  { %6283 = vmatpush3.bf16.msra.mxu1 %v7109_v62  ;;  %v7123_v62 = vld [vmem:[%s8233_s5 + $0x28] sm:$0xff]  }
 0x5e7   :  { %6308 = vmatprep.subr.bf16.mxu1 %v7321_v43 }
 0x69c   :  { %v3441_v24 = vpop.f32.mrb[12].mxu1 }
 0x69d   :  { %v3442_v11 = vadd.f32 %v3441_v24, %v3240_v41  ;;  %v3443_v57 = vpop.f32.mrb[13].mxu1 }
 0x69e   :  { %v3444_v27 = vadd.f32 %v3443_v57, %v3244_v55  ;;  %v3445_v9 = vpop.f32.mrb[14].mxu1 }
 0x69f   :  { %v3450_v45 = vadd.f32 %v3442_v11, %v2944_v58  ;;  %v3446_v10 = vadd.f32 %v3445_v9, %v3240_v41  ;;  %v3447_v13 = vpop.f32.mrb[15].mxu1  ;;  %v7114_v58 = vld [vmem:[#allocation14 + $0xe0] sm:$0xff]   ;;  %v7117_v9 = vld [vmem:[#allocation14 + $0xf8] sm:$0xff]  }
 0x6a0   :  { %v3451_v61 = vadd.f32 %v3444_v27, %v2945_v25  ;;  %v3448_v30 = vadd.f32 %v3447_v13, %v3244_v55  ;;  %v7112_v25 = vld [vmem:[#allocation14 + $0xd0] sm:$0xff]   ;;  %v7120_v13 = vld [vmem:[%s8233_s5 + $0x10] sm:$0xff]  }
 0x6a1   :  { %v3452_v14 = vadd.f32 %v3446_v10, %v2946_v59  ;;  %v3454_v39 = vmax.f32 %v3450_v45, 0.0  ;;  %v7111_v59 = vld [vmem:[#allocation14 + $0xc8] sm:$0xff]   ;;  %v7116_v27 = vld [vmem:[#allocation14 + $0xf0] sm:$0xff]   ;;  %v7119_v10 = vld [vmem:[%s8233_s5 + $0x8] sm:$0xff]  }
 0x6a2   :  { %v3453_v48 = vadd.f32 %v3448_v30, %v2947_v26  ;;  %v3455_v40 = vmax.f32 %v3451_v61, 0.0  ;;  %v7113_v26 = vld [vmem:[#allocation14 + $0xd8] sm:$0xff]   ;;  %v7121_v61 = vld [vmem:[%s8233_s5 + $0x18] sm:$0xff]  }
 0x6a3   :  { %v3456_v7 = vmax.f32 %v3452_v14, 0.0  ;;  %v7118_v45 = vld [vmem:[%s8233_s5] sm:$0xff]   ;;  %v6087_v14 = vld [vmem:[#allocation9 + $0x13] ss:$0 sm:$0xff] }
 0x6a4   :  { %v3457_v38 = vmax.f32 %v3453_v48, 0.0  ;;  %v7122_v30 = vld [vmem:[%s8233_s5 + $0x20] sm:$0xff]  }
 0x6a5   :  { %v3490_v29 = vpack.c.bf16 %v3456_v7, %v3454_v39 }
 0x6a6   :  { %v3491_v56 = vpack.c.bf16 %v3457_v38, %v3455_v40 }
 0x6a8   :  { %3627 = vmatprep.mubr.bf16.mxu0 %v3491_v56 }
 0x6a9   :  { %3628 = vmatmul.mubr.bf16.vlgmr.msra.gmra.mrb[20].mxu0 %v3490_v29 }
 0x6aa   :  { %6304 = vmatprep.mubr.msk.bf16.mxu0 %vm7322_vm1, %v7321_v43  ;;  %6289 = vmatpush3.bf16.msra.mxu0 %v7110_v12  ;;  %v7124_v12 = vld [vmem:[%s8233_s5 + $0x30] sm:$0xff]  }
 0x6ab   :  { %6290 = vmatprep.subr.bf16.mxu0 %v7321_v43 }
 0x6ae   :  { %6291 = vmatpush3.bf16.msra.mxu0 %v7111_v59  ;;  %v7125_v59 = vld [vmem:[%s8233_s5 + $0x38] sm:$0xff]   ;;  %s7323_s5 = smov 60  }
 0x6af   :  { %6292 = vmatprep.subr.bf16.mxu0 %v7321_v43 }
 0x6b2   :  { %6293 = vmatpush3.bf16.msra.mxu0 %v7112_v25  ;;  %v6096_v25 = vld [vmem:[#allocation9 + $0x14] ss:$0 sm:$0xff] }
 0x6b3   :  { %6294 = vmatprep.subr.bf16.mxu0 %v7321_v43 }
 0x6b6   :  { %6295 = vmatpush3.bf16.msra.mxu0 %v7113_v26 }
 0x6b7   :  { %6296 = vmatprep.subr.bf16.mxu0 %v7321_v43 }
 0x6ba   :  { %6297 = vmatpush3.bf16.msra.mxu0 %v7114_v58 }
 0x6bb   :  { %6298 = vmatprep.subr.bf16.mxu0 %v7321_v43 }
 0x6be   :  { %6299 = vmatpush3.bf16.msra.mxu0 %v7115_v47 }
 0x6bf   :  { %6300 = vmatprep.subr.bf16.mxu0 %v7321_v43 }
 0x6c2   :  { %6301 = vmatpush3.bf16.msra.mxu0 %v7116_v27 }
 0x6c3   :  { %6302 = vmatprep.subr.bf16.mxu0 %v7321_v43 }
 0x6c6   :  { %6303 = vmatpush3.bf16.msra.mxu0 %v7117_v9 }
 0x77c   :  { %v6170_v8 = vpop.f32.mrb[20].mxu0 }
 0x77d   :  { %v6171_v32 = vpop.f32.mrb[21].mxu0 }
 0x77e   :  { %v6172_v46 = vadd.f32 %v6171_v32, %v6170_v8  ;;  %v6173_v37 = vpop.f32.mrb[22].mxu0 }
 0x77f   :  { %v6174_v0 = vpop.f32.mrb[23].mxu0 }
 0x780   :  { %v3630_v28 = vadd.f32 %v6172_v46, %v6070_v23  ;;  %v6175_v41 = vadd.f32 %v6174_v0, %v6173_v37 }
 0x782   :  { %v3633_v55 = vadd.f32 %v6175_v41, %v6070_v23  ;;  %v3636_v24 = vmax.f32 %v3630_v28, 0.0 }
 0x784   :  { %v3637_v11 = vmax.f32 %v3633_v55, 0.0  ;;  %v6105_v55 = vld [vmem:[#allocation9 + $0x15] ss:$0 sm:$0xff] }
 0x786   :  { %v3654_v57 = vpack.c.bf16 %v3637_v11, %v3636_v24 }
 0x788   :  { %6285 = vmatmul.mubr.bf16.vlgmr.msra.gmra.mrb[16].mxu1 %v3654_v57 }
 0x789   :  { %6324 = vmatprep.mubr.msk.bf16.mxu1 %vm7322_vm1, %v7321_v43  ;;  %6309 = vmatpush3.bf16.msra.mxu1 %v7118_v45 }
 0x78a   :  { %6310 = vmatprep.subr.bf16.mxu1 %v7321_v43 }
 0x78d   :  { %6311 = vmatpush3.bf16.msra.mxu1 %v7119_v10 }
 0x78e   :  { %6312 = vmatprep.subr.bf16.mxu1 %v7321_v43 }
 0x791   :  { %6313 = vmatpush3.bf16.msra.mxu1 %v7120_v13 }
 0x792   :  { %6314 = vmatprep.subr.bf16.mxu1 %v7321_v43 }
 0x795   :  { %6315 = vmatpush3.bf16.msra.mxu1 %v7121_v61 }
 0x796   :  { %6316 = vmatprep.subr.bf16.mxu1 %v7321_v43 }
 0x799   :  { %6317 = vmatpush3.bf16.msra.mxu1 %v7122_v30 }
 0x79a   :  { %6318 = vmatprep.subr.bf16.mxu1 %v7321_v43 }
 0x79d   :  { %6319 = vmatpush3.bf16.msra.mxu1 %v7123_v62 }
 0x79e   :  { %6320 = vmatprep.subr.bf16.mxu1 %v7321_v43 }
 0x7a1   :  { %6321 = vmatpush3.bf16.msra.mxu1 %v7124_v12 }
 0x7a2   :  { %6322 = vmatprep.subr.bf16.mxu1 %v7321_v43 }
 0x7a5   :  { %6323 = vmatpush3.bf16.msra.mxu1 %v7125_v59 }
 0x85b   :  { %v3744_v48 = vpop.f32.mrb[16].mxu1 }
 0x85c   :  { %v3745_v39 = vadd.f32 %v6087_v14, %v3744_v48  ;;  %v6286_v7 = vpop.f32.mrb[17].mxu1 }
 0x85d   :  { %v3747_v40 = vpop.f32.mrb[18].mxu1  ;;  %v7131_v7 = vld [vmem:[#allocation6 + $0x8] sm:$0xff] }
 0x85e   :  { %v3748_v38 = vadd.f32 %v6087_v14, %v3747_v40  ;;  %v6287_v29 = vpop.f32.mrb[19].mxu1  ;;  %v3751_v56 = vmax.f32 %v3745_v39, 0.0  ;;  %v7130_v39 = vld [vmem:[#allocation6] sm:$0xff] }
 0x85f   :  { %v6475_v40 = vpack.i.bf16 %v7131_v7, %v7130_v39 }
 0x860   :  { %v3752_v44 = vmax.f32 %v3748_v38, 0.0 }
 0x862   :  { %v3769_v42 = vpack.c.bf16 %v3752_v44, %v3751_v56 }
 0x864   :  { %6305 = vmatmul.mubr.bf16.vlgmr.msra.gmra.mrb[24].mxu0 %v3769_v42 }
 0x937   :  { %v3859_v26 = vpop.f32.mrb[24].mxu0 }
 0x938   :  { %v3860_v58 = vadd.f32 %v6096_v25, %v3859_v26  ;;  %v6306_v47 = vpop.f32.mrb[25].mxu0 }
 0x939   :  { %v3862_v8 = vpop.f32.mrb[26].mxu0 }
 0x93a   :  { %v3866_v23 = vadd.f32 %v3860_v58, %v3636_v24  ;;  %v3863_v32 = vadd.f32 %v6096_v25, %v3862_v8  ;;  %v6307_v46 = vpop.f32.mrb[27].mxu0 }
 0x93c   :  { %v3867_v37 = vadd.f32 %v3863_v32, %v3637_v11  ;;  %v3868_v0 = vmax.f32 %v3866_v23, 0.0 }
 0x93e   :  { %v3869_v28 = vmax.f32 %v3867_v37, 0.0 }
 0x940   :  { %v3870_v41 = vpack.c.bf16 %v3869_v28, %v3868_v0 }
 0x942   :  { %6325 = vmatmul.mubr.bf16.vlgmr.msra.gmra.mrb[20].mxu1 %v3870_v41 }
 0xa15   :  { %v3960_v57 = vpop.f32.mrb[20].mxu1 }
 0xa16   :  { %v8004_v27 = vadd.f32 %v6105_v55, %v3960_v57  ;;  %v6326_v9 = vpop.f32.mrb[21].mxu1 }
 0xa17   :  { %v3963_v45 = vpop.f32.mrb[22].mxu1 }
 0xa18   :  { %v3967_v10 = vmul.f32 0.5, %v8004_v27  ;;  %v8007_v13 = vadd.f32 %v6105_v55, %v3963_v45  ;;  %v6327_v61 = vpop.f32.mrb[23].mxu1 }
 0xa1a   :  { %v3969_v30 = vmul.f32 1.442695, %v3967_v10  ;;  %v3968_v24 = vmul.f32 0.5, %v8007_v13 }
 0xa1c   :  { %7126 = vpow2.f32 %v3969_v30  ;;  %v3971_v11 = vmul.f32 1.442695, %v3968_v24 }
 0xa1e   :  { %7128 = vpow2.f32 %v3971_v11 }
 0xa26   :  { %v7127_v14 = vpop.eup %7126 }
 0xa27   :  { %3975 = vrot.lane.b32.xlu0 %v7127_v14, %s7323_s5 }
 0xa28   :  { %v7129_v48 = vpop.eup %7128 }
 0xa2b   :  { %3977 = vrot.lane.b32.xlu0 %v7129_v48, %s7323_s5 }
 0xa2f   :  { %6476 = vrot.lane.b32.xlu0 %v6475_v40, %s7324_s4 }
 0xa99   :  { %v3976_v38 = vpop.permute.xlu0 %3975 }
 0xa9a   :  { %v3981_v29 = vmul.f32 %v7130_v39, %v3976_v38 }
 0xa9c   :  { %3985 = vrot.lane.b32.xlu1 %v3981_v29, %s7325_s28 }
 0xa9d   :  { %v3978_v56 = vpop.permute.xlu0 %3977 }
 0xa9e   :  { %v3982_v44 = vmul.f32 %v7131_v7, %v3978_v56 }
 0xaa0   :  { %3987 = vrot.lane.b32.xlu1 %v3982_v44, %s7325_s28 }
 0xaa1   :  { %v6477_v42 = vpop.permute.xlu0 %6476 }
 0xaa2   :  { %v6478_v62 = vunpack.i.l.bf16 %v6477_v42  ;;  %v6479_v25 = vunpack.i.h.bf16 %v6477_v42 }
 0xb0e   :  { %v3986_v12 = vpop.permute.xlu1 %3985 }
 0xb0f   :  { %v3991_v59 = vadd.f32 %v3986_v12, %v8004_v27 }
 0xb11   :  { %v4002_v26 = vsel %vm4001_vm2, %v3991_v59, %v6478_v62 }
 0xb12   :  { %v4005_v58 = vsel %vm4004_vm3, %v4002_v26, 0.0  ;;  %v3988_v47 = vpop.permute.xlu1 %3987 }
 0xb13   :  { %v3992_v8 = vadd.f32 %v3988_v47, %v8007_v13 }
 0xb15   :  { %v4003_v23 = vsel %vm4001_vm2, %v3992_v8, %v6479_v25 }
 0xb16   :  { %v4006_v32 = vsel %vm4004_vm3, %v4003_v23, 0.0 }
 0xb17   :  { %7292 = dma.done.wait [#allocation5], 2304 }
 0xb18   :  { %7293 = vsyncadd [#allocation5], 4294964992  ;;  %6328 = vmatprep.subr.bf16.mxu1 %v7321_v43  ;;  %6332 = vmatprep.mubr.msk.bf16.mxu1 %vm7322_vm1, %v7321_v43  ;;  %v4011_v46 = vld [vmem:[#allocation2] sm:$0xff]  ;;  %v4012_v37 = vld [vmem:[#allocation2 + $0x8] sm:$0xff]  ;;  %v4013_v0 = vpack.c.bf16 %v4006_v32, %v4005_v58  ;;  %vm4021_vm4 = vcmask 261120  }
 0xb19   :  { %6356 = vmatprep.subr.bf16.mxu0 %v7321_v43  ;;  %6372 = vmatprep.mubr.msk.bf16.mxu0 %vm7322_vm1, %v7321_v43  ;;  %v4068_v28 = vld [vmem:[#allocation2 + $0x10] sm:$0xff]  ;;  %v4069_v41 = vld [vmem:[#allocation2 + $0x18] sm:$0xff]  ;;  %v4070_v55 = vld [vmem:[#allocation2 + $0x20] sm:$0xff] }
 0xb1a   :  { %6329 = vmatpush3.bf16.msra.mxu1 %v4011_v46  ;;  %v4071_v57 = vld [vmem:[#allocation2 + $0x28] sm:$0xff]  ;;  %v4072_v9 = vld [vmem:[#allocation2 + $0x30] sm:$0xff]  ;;  %v4073_v45 = vld [vmem:[#allocation2 + $0x38] sm:$0xff] }
 0xb1b   :  { %6330 = vmatprep.subr.bf16.mxu1 %v7321_v43  ;;  %v4074_v10 = vld [vmem:[#allocation2 + $0x40] sm:$0xff]  ;;  %v4075_v61 = vld [vmem:[#allocation2 + $0x48] sm:$0xff]  ;;  %v4127_v30 = vld [vmem:[#allocation2 + $0x50] sm:$0xff] }
 0xb1c   :  { %6357 = vmatpush3.bf16.msra.mxu0 %v4127_v30  ;;  %v4128_v24 = vld [vmem:[#allocation2 + $0x58] sm:$0xff]  ;;  %v4129_v11 = vld [vmem:[#allocation2 + $0x60] sm:$0xff]  ;;  %v4130_v14 = vld [vmem:[#allocation2 + $0x68] sm:$0xff] }
 0xb1d   :  { %6358 = vmatprep.subr.bf16.mxu0 %v7321_v43  ;;  %v4131_v48 = vld [vmem:[#allocation2 + $0x70] sm:$0xff]  ;;  %v4132_v39 = vld [vmem:[#allocation2 + $0x78] sm:$0xff]  ;;  %v4133_v25 = vld [vmem:[#allocation2 + $0x80] sm:$0xff] }
 0xb1e   :  { %6331 = vmatpush3.bf16.msra.mxu1 %v4012_v37  ;;  %v6114_v7 = vld [vmem:[#allocation9 + $0x16] ss:$0 sm:$0xff]  ;;  %v4134_v26 = vld [vmem:[#allocation2 + $0x88] sm:$0xff]  ;;  %v6116_v58 = vld [vmem:[#allocation9 + $0x17] ss:$0 sm:$0xff] }
 0xb1f   :  { %6336 = vmatprep.subr.bf16.mxu1 %v7321_v43 }
 0xb20   :  { %6359 = vmatpush3.bf16.msra.mxu0 %v4128_v24 }
 0xb21   :  { %6333 = vmatmul.mubr.msk.bf16.vlgmr.msra.gmra.mrb[24].mxu1 %vm4021_vm4, %v4013_v0  ;;  %6360 = vmatprep.subr.bf16.mxu0 %v7321_v43 }
 0xb22   :  { %6337 = vmatpush3.bf16.msra.mxu1 %v4068_v28  ;;  %6352 = vmatprep.mubr.msk.bf16.mxu1 %vm7322_vm1, %v7321_v43 }
 0xb23   :  { %6338 = vmatprep.subr.bf16.mxu1 %v7321_v43 }
 0xb24   :  { %6361 = vmatpush3.bf16.msra.mxu0 %v4129_v11 }
 0xb25   :  { %6362 = vmatprep.subr.bf16.mxu0 %v7321_v43 }
 0xb26   :  { %6339 = vmatpush3.bf16.msra.mxu1 %v4069_v41 }
 0xb27   :  { %6340 = vmatprep.subr.bf16.mxu1 %v7321_v43 }
 0xb28   :  { %6363 = vmatpush3.bf16.msra.mxu0 %v4130_v14 }
 0xb29   :  { %6364 = vmatprep.subr.bf16.mxu0 %v7321_v43 }
 0xb2a   :  { %6341 = vmatpush3.bf16.msra.mxu1 %v4070_v55  ;;  %v6117_v55 = vld [vmem:[#allocation9 + $0x18] ss:$0 sm:$0xff] }
 0xb2b   :  { %6342 = vmatprep.subr.bf16.mxu1 %v7321_v43 }
 0xb2c   :  { %6365 = vmatpush3.bf16.msra.mxu0 %v4131_v48 }
 0xb2d   :  { %6366 = vmatprep.subr.bf16.mxu0 %v7321_v43 }
 0xb2e   :  { %6343 = vmatpush3.bf16.msra.mxu1 %v4071_v57 }
 0xb2f   :  { %6344 = vmatprep.subr.bf16.mxu1 %v7321_v43 }
 0xb30   :  { %6367 = vmatpush3.bf16.msra.mxu0 %v4132_v39 }
 0xb31   :  { %6368 = vmatprep.subr.bf16.mxu0 %v7321_v43 }
 0xb32   :  { %6345 = vmatpush3.bf16.msra.mxu1 %v4072_v9 }
 0xb33   :  { %6346 = vmatprep.subr.bf16.mxu1 %v7321_v43 }
 0xb34   :  { %6369 = vmatpush3.bf16.msra.mxu0 %v4133_v25 }
 0xb35   :  { %6370 = vmatprep.subr.bf16.mxu0 %v7321_v43 }
 0xb36   :  { %6347 = vmatpush3.bf16.msra.mxu1 %v4073_v45 }
 0xb37   :  { %6348 = vmatprep.subr.bf16.mxu1 %v7321_v43 }
 0xb38   :  { %6371 = vmatpush3.bf16.msra.mxu0 %v4134_v26 }
 0xb3a   :  { %6349 = vmatpush3.bf16.msra.mxu1 %v4074_v10 }
 0xb3b   :  { %6350 = vmatprep.subr.bf16.mxu1 %v7321_v43 }
 0xb3e   :  { %6351 = vmatpush3.bf16.msra.mxu1 %v4075_v61 }
 0xbf4   :  { %v4059_v40 = vpop.f32.mrb[24].mxu1 }
 0xbf5   :  { %v4060_v38 = vadd.f32 %v6114_v7, %v4059_v40  ;;  %v6334_v29 = vpop.f32.mrb[25].mxu1 }
 0xbf6   :  { %v4062_v56 = vpop.f32.mrb[26].mxu1 }
 0xbf7   :  { %v4063_v44 = vadd.f32 %v6114_v7, %v4062_v56  ;;  %v6335_v42 = vpop.f32.mrb[27].mxu1  ;;  %v4066_v62 = vmax.f32 %v4060_v38, 0.0 }
 0xbf9   :  { %v4067_v12 = vmax.f32 %v4063_v44, 0.0 }
 0xbfb   :  { %v4076_v59 = vpack.c.bf16 %v4067_v12, %v4066_v62 }
 0xbfd   :  { %6353 = vmatmul.mubr.bf16.vlgmr.msra.gmra.mrb[28].mxu1 %v4076_v59 }
 0xcd0   :  { %v4118_v47 = vpop.f32.mrb[28].mxu1 }
 0xcd1   :  { %v4119_v8 = vadd.f32 %v6116_v58, %v4118_v47  ;;  %v6354_v23 = vpop.f32.mrb[29].mxu1 }
 0xcd2   :  { %v4121_v32 = vpop.f32.mrb[30].mxu1 }
 0xcd3   :  { %v4122_v46 = vadd.f32 %v6116_v58, %v4121_v32  ;;  %v6355_v37 = vpop.f32.mrb[31].mxu1  ;;  %v4125_v0 = vmax.f32 %v4119_v8, 0.0 }
 0xcd5   :  { %v4126_v28 = vmax.f32 %v4122_v46, 0.0 }
 0xcd7   :  { %v4135_v41 = vpack.c.bf16 %v4126_v28, %v4125_v0 }
 0xcd9   :  { %6373 = vmatmul.mubr.bf16.vlgmr.msra.gmra.mrb[28].mxu0 %v4135_v41 }
 0xdac   :  { %v4177_v57 = vpop.f32.mrb[28].mxu0 }
 0xdad   :  { %v4178_v9 = vadd.f32 %v6117_v55, %v4177_v57  ;;  %v6374_v45 = vpop.f32.mrb[29].mxu0 }
 0xdae   :  { %v4180_v10 = vpop.f32.mrb[30].mxu0 }
 0xdaf   :  { %v8036_v61 = vadd.f32 %v4178_v9, %v4066_v62  ;;  %v4181_v43 = vadd.f32 %v6117_v55, %v4180_v10  ;;  %v6375_v30 = vpop.f32.mrb[31].mxu0 }
 0xdb1   :  { %v4186_v24 = vmax.f32 %v8036_v61, 0.0  ;;  %v8039_v11 = vadd.f32 %v4181_v43, %v4067_v12 }
 0xdb3   :  { %v4187_v14 = vmax.f32 %v8039_v11, 0.0 }
 0xdb4   :  { %7294 = dma.done.wait [#allocation5 + $0x1], 10240 }
 0xdb5   :  { %7295 = vsyncadd [#allocation5 + $0x1], 4294957056  ;;  %4253 = vmatprep.mubr.bf16.mxu1 %v8298_v63  ;;  %v4193_v48 = vld [vmem:[#allocation3 + $0x8] sm:$0xff]  ;;  %v4192_v39 = vld [vmem:[#allocation3] sm:$0xff]  ;;  %v4208_v43 = vpack.c.bf16 %v4187_v14, %v4186_v24 }
 0xdb6   :  { %v4195_v7 = vld [vmem:[#allocation3 + $0x18] sm:$0xff]  ;;  %4221 = vmatprep.subr.bf16.mxu1 %v4193_v48  ;;  %v4194_v40 = vld [vmem:[#allocation3 + $0x10] sm:$0xff]  ;;  %v4197_v38 = vld [vmem:[#allocation3 + $0x28] sm:$0xff] }
 0xdb7   :  { %4222 = vmatpush1.bf16.msra.mxu1 %v4192_v39  ;;  %v4269_v29 = vld [vmem:[#allocation3 + $0x88] sm:$0xff]  ;;  %v4268_v56 = vld [vmem:[#allocation3 + $0x80] sm:$0xff]  ;;  %v4271_v44 = vld [vmem:[#allocation3 + $0x98] sm:$0xff] }
 0xdb8   :  { %4223 = vmatprep.subr.bf16.mxu1 %v4195_v7  ;;  %4314 = vmatprep.subr.bf16.mxu0 %v4269_v29  ;;  %v4196_v42 = vld [vmem:[#allocation3 + $0x20] sm:$0xff]  ;;  %v4199_v62 = vld [vmem:[#allocation3 + $0x38] sm:$0xff]  ;;  %v4270_v12 = vld [vmem:[#allocation3 + $0x90] sm:$0xff] }
 0xdb9   :  { %4315 = vmatpush1.bf16.msra.mxu0 %v4268_v56  ;;  %v4273_v63 = vld [vmem:[#allocation3 + $0xa8] sm:$0xff]  ;;  %v4198_v59 = vld [vmem:[#allocation3 + $0x30] sm:$0xff]  ;;  %v4272_v26 = vld [vmem:[#allocation3 + $0xa0] sm:$0xff] }
 0xdba   :  { %4316 = vmatprep.subr.bf16.mxu0 %v4271_v44  ;;  %v4201_v25 = vld [vmem:[#allocation3 + $0x48] sm:$0xff]  ;;  %v4275_v58 = vld [vmem:[#allocation3 + $0xb8] sm:$0xff]  ;;  %v4200_v47 = vld [vmem:[#allocation3 + $0x40] sm:$0xff] }
 0xdbb   :  { %4224 = vmatpush1.bf16.msra.mxu1 %v4194_v40  ;;  %v4203_v8 = vld [vmem:[#allocation3 + $0x58] sm:$0xff]  ;;  %v4274_v23 = vld [vmem:[#allocation3 + $0xb0] sm:$0xff]  ;;  %v4277_v32 = vld [vmem:[#allocation3 + $0xc8] sm:$0xff] }
 0xdbc   :  { %4225 = vmatprep.subr.bf16.mxu1 %v4197_v38  ;;  %v4202_v46 = vld [vmem:[#allocation3 + $0x50] sm:$0xff]  ;;  %v4205_v37 = vld [vmem:[#allocation3 + $0x68] sm:$0xff]  ;;  %v4276_v0 = vld [vmem:[#allocation3 + $0xc0] sm:$0xff] }
 0xdbd   :  { %4317 = vmatpush1.bf16.msra.mxu0 %v4270_v12  ;;  %v4279_v28 = vld [vmem:[#allocation3 + $0xd8] sm:$0xff]  ;;  %v4204_v41 = vld [vmem:[#allocation3 + $0x60] sm:$0xff]  ;;  %v4278_v57 = vld [vmem:[#allocation3 + $0xd0] sm:$0xff] }
 0xdbe   :  { %4318 = vmatprep.subr.bf16.mxu0 %v4273_v63  ;;  %v4207_v55 = vld [vmem:[#allocation3 + $0x78] sm:$0xff]  ;;  %v4281_v9 = vld [vmem:[#allocation3 + $0xe8] sm:$0xff]  ;;  %v4206_v45 = vld [vmem:[#allocation3 + $0x70] sm:$0xff] }
 0xdbf   :  { %4226 = vmatpush1.bf16.msra.mxu1 %v4196_v42  ;;  %v4280_v10 = vld [vmem:[#allocation3 + $0xe0] sm:$0xff]  ;;  %v4283_v30 = vld [vmem:[#allocation3 + $0xf8] sm:$0xff]  ;;  %v4282_v11 = vld [vmem:[#allocation3 + $0xf0] sm:$0xff] }
 0xdc0   :  { %4227 = vmatprep.subr.bf16.mxu1 %v4199_v62  ;;  %v4285_v48 = vld [vmem:[#allocation3 + $0x108] sm:$0xff]  ;;  %v4284_v39 = vld [vmem:[#allocation3 + $0x100] sm:$0xff]  ;;  %v4287_v7 = vld [vmem:[#allocation3 + $0x118] sm:$0xff] }
 0xdc1   :  { %4319 = vmatpush1.bf16.msra.mxu0 %v4272_v26  ;;  %v4286_v40 = vld [vmem:[#allocation3 + $0x110] sm:$0xff]  ;;  %v4289_v38 = vld [vmem:[#allocation3 + $0x128] sm:$0xff]  ;;  %v4288_v29 = vld [vmem:[#allocation3 + $0x120] sm:$0xff] }
 0xdc2   :  { %4320 = vmatprep.subr.bf16.mxu0 %v4275_v58  ;;  %v4291_v61 = vld [vmem:[#allocation3 + $0x138] sm:$0xff]  ;;  %v4290_v24 = vld [vmem:[#allocation3 + $0x130] sm:$0xff]  ;;  %v4293_v14 = vld [vmem:[#allocation3 + $0x148] sm:$0xff] }
 0xdc3   :  { %4228 = vmatpush1.bf16.msra.mxu1 %v4198_v59  ;;  %v4292_v56 = vld [vmem:[#allocation3 + $0x140] sm:$0xff]  ;;  %v4295_v44 = vld [vmem:[#allocation3 + $0x158] sm:$0xff]  ;;  %v4294_v42 = vld [vmem:[#allocation3 + $0x150] sm:$0xff] }
 0xdc4   :  { %4229 = vmatprep.subr.bf16.mxu1 %v4201_v25  ;;  %v4297_v62 = vld [vmem:[#allocation3 + $0x168] sm:$0xff]  ;;  %v4296_v12 = vld [vmem:[#allocation3 + $0x160] sm:$0xff]  ;;  %v4299_v63 = vld [vmem:[#allocation3 + $0x178] sm:$0xff] }
 0xdc5   :  { %4321 = vmatpush1.bf16.msra.mxu0 %v4274_v23  ;;  %v4298_v59 = vld [vmem:[#allocation3 + $0x170] sm:$0xff]  ;;  %v4362_v25 = vld [vmem:[#allocation3 + $0x188] sm:$0xff]  ;;  %v4361_v26 = vld [vmem:[#allocation3 + $0x180] sm:$0xff] }
 0xdc6   :  { %4322 = vmatprep.subr.bf16.mxu0 %v4277_v32  ;;  %v4364_v58 = vld [vmem:[#allocation3 + $0x198] sm:$0xff]  ;;  %v4365_v23 = vld [vmem:[#allocation3 + $0x1a0] sm:$0xff] }
 0xdc7   :  { %4230 = vmatpush1.bf16.msra.mxu1 %v4200_v47  ;;  %v4363_v47 = vld [vmem:[#allocation3 + $0x190] sm:$0xff]  ;;  %v4368_v32 = vld [vmem:[#allocation3 + $0x1b8] sm:$0xff] }
 0xdc8   :  { %4231 = vmatprep.subr.bf16.mxu1 %v4203_v8  ;;  %v4366_v8 = vld [vmem:[#allocation3 + $0x1a8] sm:$0xff] }
 0xdc9   :  { %4323 = vmatpush1.bf16.msra.mxu0 %v4276_v0  ;;  %v4369_v0 = vld [vmem:[#allocation3 + $0x1c0] sm:$0xff] }
 0xdca   :  { %4324 = vmatprep.subr.bf16.mxu0 %v4279_v28  ;;  %v4372_v28 = vld [vmem:[#allocation3 + $0x1d8] sm:$0xff] }
 0xdcb   :  { %4232 = vmatpush1.bf16.msra.mxu1 %v4202_v46  ;;  %v4367_v46 = vld [vmem:[#allocation3 + $0x1b0] sm:$0xff] }
 0xdcc   :  { %4233 = vmatprep.subr.bf16.mxu1 %v4205_v37  ;;  %v4370_v37 = vld [vmem:[#allocation3 + $0x1c8] sm:$0xff] }
 0xdcd   :  { %4325 = vmatpush1.bf16.msra.mxu0 %v4278_v57  ;;  %v4373_v57 = vld [vmem:[#allocation3 + $0x1e0] sm:$0xff] }
 0xdce   :  { %4326 = vmatprep.subr.bf16.mxu0 %v4281_v9  ;;  %v4376_v9 = vld [vmem:[#allocation3 + $0x1f8] sm:$0xff] }
 0xdcf   :  { %4234 = vmatpush1.bf16.msra.mxu1 %v4204_v41  ;;  %v4371_v41 = vld [vmem:[#allocation3 + $0x1d0] sm:$0xff] }
 0xdd0   :  { %4235 = vmatprep.subr.bf16.mxu1 %v4207_v55  ;;  %v4374_v55 = vld [vmem:[#allocation3 + $0x1e8] sm:$0xff] }
 0xdd1   :  { %4327 = vmatpush1.bf16.msra.mxu0 %v4280_v10  ;;  %v4378_v10 = vld [vmem:[#allocation3 + $0x208] sm:$0xff] }
 0xdd2   :  { %4328 = vmatprep.subr.bf16.mxu0 %v4283_v30  ;;  %v4380_v30 = vld [vmem:[#allocation3 + $0x218] sm:$0xff] }
 0xdd3   :  { %4236 = vmatpush1.bf16.msra.mxu1 %v4206_v45  ;;  %v4375_v45 = vld [vmem:[#allocation3 + $0x1f0] sm:$0xff] }
 0xdd4   :  { %4407 = vmatprep.subr.bf16.mxu1 %v4362_v25 }
 0xdd5   :  { %4329 = vmatpush1.bf16.msra.mxu0 %v4282_v11  ;;  %v4379_v11 = vld [vmem:[#allocation3 + $0x210] sm:$0xff] }
 0xdd6   :  { %4254 = vmatmul.mubr.bf16.vlgmr.msra.gmra.mrb[32].mxu1 %v4208_v43  ;;  %4330 = vmatprep.subr.bf16.mxu0 %v4285_v48  ;;  %v4377_v43 = vld [vmem:[#allocation3 + $0x200] sm:$0xff]  ;;  %v4382_v48 = vld [vmem:[#allocation3 + $0x228] sm:$0xff] }
 0xdd7   :  { %4408 = vmatpush1.bf16.msra.mxu1 %v4361_v26 }
 0xdd8   :  { %4409 = vmatprep.subr.bf16.mxu1 %v4364_v58 }
 0xdd9   :  { %4331 = vmatpush1.bf16.msra.mxu0 %v4284_v39  ;;  %v4381_v39 = vld [vmem:[#allocation3 + $0x220] sm:$0xff] }
 0xdda   :  { %4332 = vmatprep.subr.bf16.mxu0 %v4287_v7  ;;  %v4384_v7 = vld [vmem:[#allocation3 + $0x238] sm:$0xff] }
 0xddb   :  { %4410 = vmatpush1.bf16.msra.mxu1 %v4363_v47 }
 0xddc   :  { %4411 = vmatprep.subr.bf16.mxu1 %v4366_v8 }
 0xddd   :  { %4333 = vmatpush1.bf16.msra.mxu0 %v4286_v40  ;;  %v4383_v40 = vld [vmem:[#allocation3 + $0x230] sm:$0xff] }
 0xdde   :  { %4334 = vmatprep.subr.bf16.mxu0 %v4289_v38  ;;  %v4386_v38 = vld [vmem:[#allocation3 + $0x248] sm:$0xff] }
 0xddf   :  { %4412 = vmatpush1.bf16.msra.mxu1 %v4365_v23 }
 0xde0   :  { %4413 = vmatprep.subr.bf16.mxu1 %v4368_v32 }
 0xde1   :  { %4335 = vmatpush1.bf16.msra.mxu0 %v4288_v29  ;;  %v4385_v29 = vld [vmem:[#allocation3 + $0x240] sm:$0xff] }
 0xde2   :  { %4336 = vmatprep.subr.bf16.mxu0 %v4291_v61  ;;  %v4388_v61 = vld [vmem:[#allocation3 + $0x258] sm:$0xff] }
 0xde3   :  { %4414 = vmatpush1.bf16.msra.mxu1 %v4367_v46 }
 0xde4   :  { %4415 = vmatprep.subr.bf16.mxu1 %v4370_v37  ;;  %v4387_v37 = vld [vmem:[#allocation3 + $0x250] sm:$0xff] }
 0xde5   :  { %4337 = vmatpush1.bf16.msra.mxu0 %v4290_v24  ;;  %v4209_v24 = vld [vmem:[#allocation9 + $0x19] sm:$0x3] }
 0xde6   :  { %4338 = vmatprep.subr.bf16.mxu0 %v4293_v14  ;;  %v4218_v14 = vrot.slane %v4209_v24, %v7821_v16 }
 0xde7   :  { %4416 = vmatpush1.bf16.msra.mxu1 %v4369_v0  ;;  %v4390_v0 = vld [vmem:[#allocation3 + $0x268] sm:$0xff] }
 0xde8   :  { %4417 = vmatprep.subr.bf16.mxu1 %v4372_v28  ;;  %v4389_v28 = vld [vmem:[#allocation3 + $0x260] sm:$0xff] }
 0xde9   :  { %4339 = vmatpush1.bf16.msra.mxu0 %v4292_v56  ;;  %v4214_v56 = vrot.slane %v4209_v24, %v7818_v15 }
 0xdea   :  { %4340 = vmatprep.subr.bf16.mxu0 %v4295_v44 }
 0xdeb   :  { %4418 = vmatpush1.bf16.msra.mxu1 %v4371_v41  ;;  %v4392_v41 = vld [vmem:[#allocation3 + $0x278] sm:$0xff] }
 0xdec   :  { %4419 = vmatprep.subr.bf16.mxu1 %v4374_v55  ;;  %v4391_v55 = vld [vmem:[#allocation3 + $0x270] sm:$0xff] }
 0xded   :  { %4341 = vmatpush1.bf16.msra.mxu0 %v4294_v42 }
 0xdee   :  { %4342 = vmatprep.subr.bf16.mxu0 %v4297_v62 }
 0xdef   :  { %4420 = vmatpush1.bf16.msra.mxu1 %v4373_v57  ;;  %v4302_v57 = vld [vmem:[#allocation9 + $0x1b] sm:$0x3] }
 0xdf0   :  { %4421 = vmatprep.subr.bf16.mxu1 %v4376_v9  ;;  %v4307_v9 = vrot.slane %v4302_v57, %v7818_v15 }
 0xdf1   :  { %4343 = vmatpush1.bf16.msra.mxu0 %v4296_v12 }
 0xdf2   :  { %4344 = vmatprep.subr.bf16.mxu0 %v4299_v63 }
 0xdf3   :  { %4422 = vmatpush1.bf16.msra.mxu1 %v4375_v45  ;;  %v4311_v45 = vrot.slane %v4302_v57, %v7821_v16 }
 0xdf4   :  { %4423 = vmatprep.subr.bf16.mxu1 %v4378_v10 }
 0xdf5   :  { %4345 = vmatpush1.bf16.msra.mxu0 %v4298_v59 }
 0xdf7   :  { %4424 = vmatpush1.bf16.msra.mxu1 %v4377_v43 }
 0xdf8   :  { %4425 = vmatprep.subr.bf16.mxu1 %v4380_v30 }
 0xdfb   :  { %4426 = vmatpush1.bf16.msra.mxu1 %v4379_v11 }
 0xdfc   :  { %4427 = vmatprep.subr.bf16.mxu1 %v4382_v48 }
 0xdff   :  { %4428 = vmatpush1.bf16.msra.mxu1 %v4381_v39 }
 0xe00   :  { %4429 = vmatprep.subr.bf16.mxu1 %v4384_v7 }
 0xe03   :  { %4430 = vmatpush1.bf16.msra.mxu1 %v4383_v40 }
 0xe04   :  { %4431 = vmatprep.subr.bf16.mxu1 %v4386_v38 }
 0xe07   :  { %4432 = vmatpush1.bf16.msra.mxu1 %v4385_v29 }
 0xe08   :  { %4433 = vmatprep.subr.bf16.mxu1 %v4388_v61 }
 0xe0b   :  { %4434 = vmatpush1.bf16.msra.mxu1 %v4387_v37 }
 0xe0c   :  { %4435 = vmatprep.subr.bf16.mxu1 %v4390_v0 }
 0xe0f   :  { %4436 = vmatpush1.bf16.msra.mxu1 %v4389_v28 }
 0xe10   :  { %4437 = vmatprep.subr.bf16.mxu1 %v4392_v41 }
 0xe13   :  { %4438 = vmatpush1.bf16.msra.mxu1 %v4391_v55 }
 0xea9   :  { %v4255_v44 = vpop.f32.mrb[32].mxu1 }
 0xeaa   :  { %v4257_v42 = vpop.f32.mrb[33].mxu1  ;;  %v4256_v63 = vadd.f32 %v4255_v44, %v4214_v56  ;;  %v4395_v44 = vld [vmem:[#allocation9 + $0x1d] sm:$0x3] }
 0xeab   :  { %v4258_v62 = vadd.f32 %v4257_v42, %v4218_v14  ;;  %v4259_v12 = vpop.f32.mrb[34].mxu1  ;;  %v4400_v42 = vrot.slane %v4395_v44, %v7818_v15 }
 0xeac   :  { %v4260_v59 = vadd.f32 %v4259_v12, %v4214_v56  ;;  %v4261_v25 = vpop.f32.mrb[35].mxu1  ;;  %v4264_v23 = vmax.f32 %v4256_v63, 0.0 }
 0xead   :  { %v4262_v26 = vadd.f32 %v4261_v25, %v4218_v14  ;;  %v4265_v47 = vmax.f32 %v4258_v62, 0.0  ;;  %v4404_v62 = vrot.slane %v4395_v44, %v7821_v16 }
 0xeae   :  { %v4266_v58 = vmax.f32 %v4260_v59, 0.0 }
 0xeaf   :  { %v4267_v8 = vmax.f32 %v4262_v26, 0.0 }
 0xeb0   :  { %v4300_v46 = vpack.c.bf16 %v4266_v58, %v4264_v23 }
 0xeb1   :  { %v4301_v32 = vpack.c.bf16 %v4267_v8, %v4265_v47 }
 0xeb3   :  { %4346 = vmatprep.mubr.bf16.mxu0 %v4301_v32 }
 0xeb4   :  { %4347 = vmatmul.mubr.bf16.vlgmr.msra.gmra.mrb[32].mxu0 %v4300_v46 }
 0xf87   :  { %v4348_v10 = vpop.f32.mrb[32].mxu0 }
 0xf88   :  { %v4349_v43 = vadd.f32 %v4348_v10, %v4307_v9  ;;  %v4350_v30 = vpop.f32.mrb[33].mxu0 }
 0xf89   :  { %v4351_v11 = vadd.f32 %v4350_v30, %v4311_v45  ;;  %v4352_v48 = vpop.f32.mrb[34].mxu0 }
 0xf8a   :  { %v4353_v39 = vadd.f32 %v4352_v48, %v4307_v9  ;;  %v4354_v7 = vpop.f32.mrb[35].mxu0  ;;  %v4357_v38 = vmax.f32 %v4349_v43, 0.0 }
 0xf8b   :  { %v4355_v40 = vadd.f32 %v4354_v7, %v4311_v45  ;;  %v4358_v61 = vmax.f32 %v4351_v11, 0.0 }
 0xf8c   :  { %v4359_v29 = vmax.f32 %v4353_v39, 0.0 }
 0xf8d   :  { %v4360_v24 = vmax.f32 %v4355_v40, 0.0 }
 0xf8e   :  { %v4393_v14 = vpack.c.bf16 %v4359_v29, %v4357_v38 }
 0xf8f   :  { %v4394_v56 = vpack.c.bf16 %v4360_v24, %v4358_v61 }
 0xf91   :  { %4439 = vmatprep.mubr.bf16.mxu1 %v4394_v56 }
 0xf92   :  { %4440 = vmatmul.mubr.bf16.vlgmr.msra.gmra.mrb[36].mxu1 %v4393_v14 }
0x1065   :  { %v4441_v12 = vpop.f32.mrb[36].mxu1 }
0x1066   :  { %v4442_v63 = vadd.f32 %v4441_v12, %v4400_v42  ;;  %v4443_v59 = vpop.f32.mrb[37].mxu1 }
0x1067   :  { %v4444_v25 = vadd.f32 %v4443_v59, %v4404_v62  ;;  %v4445_v26 = vpop.f32.mrb[38].mxu1 }
0x1068   :  { %v8051_v32 = vadd.f32 %v4442_v63, %v4264_v23  ;;  %v4446_v46 = vadd.f32 %v4445_v26, %v4400_v42  ;;  %v4447_v37 = vpop.f32.mrb[39].mxu1 }
0x1069   :  { %v4451_v0 = vadd.f32 %v4444_v25, %v4265_v47  ;;  %v4448_v28 = vadd.f32 %v4447_v37, %v4404_v62 }
0x106a   :  { %v4454_v41 = vmax.f32 %v8051_v32, 0.0  ;;  %v8054_v55 = vadd.f32 %v4446_v46, %v4266_v58 }
0x106b   :  { %v4455_v57 = vmax.f32 %v4451_v0, 0.0  ;;  %v4453_v9 = vadd.f32 %v4448_v28, %v4267_v8 }
0x106c   :  { %v4456_v45 = vmax.f32 %v8054_v55, 0.0 }
0x106d   :  { %v4457_v10 = vmax.f32 %v4453_v9, 0.0 }
0x106e   :  { %7296 = dma.done.wait [#allocation5 + $0x2], 40960 }
0x106f   :  { %7297 = vsyncadd [#allocation5 + $0x2], 4294926336  ;;  %v4527_v43 = vpack.c.bf16 %v4457_v10, %v4455_v57  ;;  %5607 = vrot.lane.b32.xlu0 %v8004_v27, %s7309_s2  ;;  %v4463_v47 = vld [vmem:[#allocation4 + $0x8] sm:$0xff]  ;;  %v4462_v23 = vld [vmem:[#allocation4] sm:$0xff]  ;;  %vm5613_vm5 = vcmask 523264   ;;  %vm5616_vm6 = vcmask 850944  }
0x1070   :  { %v4467_v58 = vld [vmem:[#allocation4 + $0x28] sm:$0xff]  ;;  %4550 = vmatprep.subr.bf16.mxu0 %v4463_v47  ;;  %v4466_v8 = vld [vmem:[#allocation4 + $0x20] sm:$0xff]  ;;  %v4465_v39 = vld [vmem:[#allocation4 + $0x18] sm:$0xff] }
0x1071   :  { %4582 = vmatprep.mubr.bf16.mxu0 %v4527_v43  ;;  %4625 = vmatprep.mubr.bf16.mxu1 %v4527_v43  ;;  %v4471_v30 = vld [vmem:[#allocation4 + $0x48] sm:$0xff]  ;;  %v4470_v11 = vld [vmem:[#allocation4 + $0x40] sm:$0xff]  ;;  %v4464_v7 = vld [vmem:[#allocation4 + $0x10] sm:$0xff] }
0x1072   :  { %4551 = vmatpush1.bf16.msra.mxu0 %v4462_v23  ;;  %v4475_v48 = vld [vmem:[#allocation4 + $0x68] sm:$0xff]  ;;  %v4474_v27 = vld [vmem:[#allocation4 + $0x60] sm:$0xff]  ;;  %4593 = vmatprep.subr.bf16.mxu1 %v4465_v39  ;;  %v4469_v40 = vld [vmem:[#allocation4 + $0x38] sm:$0xff] }
0x1073   :  { %5609 = vrot.lane.b32.xlu0 %v8007_v13, %s7309_s2  ;;  %4552 = vmatprep.subr.bf16.mxu0 %v4467_v58  ;;  %v4479_v13 = vld [vmem:[#allocation4 + $0x88] sm:$0xff]  ;;  %v4468_v38 = vld [vmem:[#allocation4 + $0x30] sm:$0xff]  ;;  %v4473_v29 = vld [vmem:[#allocation4 + $0x58] sm:$0xff]  ;;  %s7326_s2 = smov [#allocation15]  }
0x1074   :  { %4594 = vmatpush1.bf16.msra.mxu1 %v4464_v7  ;;  %v4478_v61 = vld [vmem:[#allocation4 + $0x80] sm:$0xff]  ;;  %v4483_v24 = vld [vmem:[#allocation4 + $0xa8] sm:$0xff]  ;;  %v4472_v14 = vld [vmem:[#allocation4 + $0x50] sm:$0xff]  ;;  %s5626_s23 = sshll.u32 %s7326_s2, 4  ;;  %s5627_s23 = int_to_ptr.vmem [resolvable:$true] %s5626_s23 }
0x1075   :  { %4595 = vmatprep.subr.bf16.mxu1 %v4469_v40  ;;  %v4477_v56 = vld [vmem:[#allocation4 + $0x78] sm:$0xff]  ;;  %v4482_v44 = vld [vmem:[#allocation4 + $0xa0] sm:$0xff]  ;;  %v4487_v42 = vld [vmem:[#allocation4 + $0xc8] sm:$0xff]  ;;  %s7264_s7 = scalar_lea.vmem %s5627_s23, 256  ;;  %p7269_p7 = scmp.lt.s32.totalorder %s5627_s23, %s5627_s23 }
0x1076   :  { %4553 = vmatpush1.bf16.msra.mxu0 %v4466_v8  ;;  %v4476_v62 = vld [vmem:[#allocation4 + $0x70] sm:$0xff]  ;;  %v4481_v12 = vld [vmem:[#allocation4 + $0x98] sm:$0xff]  ;;  %v4486_v63 = vld [vmem:[#allocation4 + $0xc0] sm:$0xff]  ;;  %p7265_p6 = scmp.ne.s32.totalorder %s5627_s23, %s7264_s7  ;;  %p7270_p8 = scmp.lt.s32.totalorder %s7264_s7, %s7264_s7 }
0x1077   :  { %4554 = vmatprep.subr.bf16.mxu0 %v4471_v30  ;;  %v4491_v59 = vld [vmem:[#allocation4 + $0xe8] sm:$0xff]  ;;  %v4480_v25 = vld [vmem:[#allocation4 + $0x90] sm:$0xff]  ;;  %v4485_v26 = vld [vmem:[#allocation4 + $0xb8] sm:$0xff] }
0x1078   :  { %4596 = vmatpush1.bf16.msra.mxu1 %v4468_v38  ;;  %v4490_v46 = vld [vmem:[#allocation4 + $0xe0] sm:$0xff]  ;;  %v4495_v37 = vld [vmem:[#allocation4 + $0x108] sm:$0xff]  ;;  %v4484_v0 = vld [vmem:[#allocation4 + $0xb0] sm:$0xff]  ;;  %p7271_p9 = por %p7270_p8, %p7269_p7 }
0x1079   :  { %4597 = vmatprep.subr.bf16.mxu1 %v4473_v29  ;;  %v4489_v28 = vld [vmem:[#allocation4 + $0xd8] sm:$0xff]  ;;  %v4494_v57 = vld [vmem:[#allocation4 + $0x100] sm:$0xff]  ;;  %v4499_v9 = vld [vmem:[#allocation4 + $0x128] sm:$0xff] }
0x107a   :  { %4555 = vmatpush1.bf16.msra.mxu0 %v4470_v11  ;;  %v4488_v10 = vld [vmem:[#allocation4 + $0xd0] sm:$0xff]  ;;  %v4493_v43 = vld [vmem:[#allocation4 + $0xf8] sm:$0xff]  ;;  %v4498_v47 = vld [vmem:[#allocation4 + $0x120] sm:$0xff]  ;;  %p7272_p10 = pnand %p7271_p9, %p7265_p6 }
0x107b   :  { %4556 = vmatprep.subr.bf16.mxu0 %v4475_v48  ;;  %v4503_v23 = vld [vmem:[#allocation4 + $0x148] sm:$0xff]  ;;  %v4492_v58 = vld [vmem:[#allocation4 + $0xf0] sm:$0xff]  ;;  %v4497_v8 = vld [vmem:[#allocation4 + $0x118] sm:$0xff] }
0x107c   :  { %4598 = vmatpush1.bf16.msra.mxu1 %v4472_v14  ;;  %v4502_v30 = vld [vmem:[#allocation4 + $0x140] sm:$0xff]  ;;  %v4507_v11 = vld [vmem:[#allocation4 + $0x168] sm:$0xff]  ;;  %v4496_v48 = vld [vmem:[#allocation4 + $0x110] sm:$0xff] }
0x107d   :  { %4599 = vmatprep.subr.bf16.mxu1 %v4477_v56  ;;  %v4501_v39 = vld [vmem:[#allocation4 + $0x138] sm:$0xff]  ;;  %v4511_v7 = vld [vmem:[#allocation4 + $0x188] sm:$0xff]  ;;  %v4500_v40 = vld [vmem:[#allocation4 + $0x130] sm:$0xff] }
0x107e   :  { %4557 = vmatpush1.bf16.msra.mxu0 %v4474_v27  ;;  %v4506_v27 = vld [vmem:[#allocation4 + $0x160] sm:$0xff]  ;;  %v4515_v29 = vld [vmem:[#allocation4 + $0x1a8] sm:$0xff]  ;;  %v4524_v55 = vld [vmem:[#allocation4 + $0x1f0] sm:$0xff] }
0x107f   :  { %4558 = vmatprep.subr.bf16.mxu0 %v4479_v13  ;;  %v4505_v13 = vld [vmem:[#allocation4 + $0x158] sm:$0xff]  ;;  %v4510_v38 = vld [vmem:[#allocation4 + $0x180] sm:$0xff]  ;;  %v4519_v56 = vld [vmem:[#allocation4 + $0x1c8] sm:$0xff] }
0x1080   :  { %4600 = vmatpush1.bf16.msra.mxu1 %v4476_v62  ;;  %v4514_v14 = vld [vmem:[#allocation4 + $0x1a0] sm:$0xff]  ;;  %v4653_v32 = vld [vmem:[#allocation4 + $0x248] sm:$0xff] }
0x1081   :  { %4601 = vmatprep.subr.bf16.mxu1 %v4481_v12  ;;  %v4518_v62 = vld [vmem:[#allocation4 + $0x1c0] sm:$0xff]  ;;  %v4523_v12 = vld [vmem:[#allocation4 + $0x1e8] sm:$0xff] }
0x1082   :  { %4559 = vmatpush1.bf16.msra.mxu0 %v4478_v61  ;;  %v4504_v61 = vld [vmem:[#allocation4 + $0x150] sm:$0xff] }
0x1083   :  { %4560 = vmatprep.subr.bf16.mxu0 %v4483_v24  ;;  %v4509_v24 = vld [vmem:[#allocation4 + $0x178] sm:$0xff] }
0x1084   :  { %4602 = vmatpush1.bf16.msra.mxu1 %v4480_v25  ;;  %v4522_v25 = vld [vmem:[#allocation4 + $0x1e0] sm:$0xff] }
0x1085   :  { %4603 = vmatprep.subr.bf16.mxu1 %v4485_v26  ;;  %v4645_v26 = vld [vmem:[#allocation4 + $0x208] sm:$0xff] }
0x1086   :  { %4561 = vmatpush1.bf16.msra.mxu0 %v4482_v44  ;;  %v4508_v44 = vld [vmem:[#allocation4 + $0x170] sm:$0xff] }
0x1087   :  { %4562 = vmatprep.subr.bf16.mxu0 %v4487_v42  ;;  %v4513_v42 = vld [vmem:[#allocation4 + $0x198] sm:$0xff] }
0x1088   :  { %4604 = vmatpush1.bf16.msra.mxu1 %v4484_v0  ;;  %v4521_v0 = vld [vmem:[#allocation4 + $0x1d8] sm:$0xff] }
0x1089   :  { %4605 = vmatprep.subr.bf16.mxu1 %v4489_v28  ;;  %v4644_v28 = vld [vmem:[#allocation4 + $0x200] sm:$0xff] }
0x108a   :  { %4563 = vmatpush1.bf16.msra.mxu0 %v4486_v63  ;;  %v4512_v63 = vld [vmem:[#allocation4 + $0x190] sm:$0xff] }
0x108b   :  { %4564 = vmatprep.subr.bf16.mxu0 %v4491_v59  ;;  %v4517_v59 = vld [vmem:[#allocation4 + $0x1b8] sm:$0xff] }
0x108c   :  { %4606 = vmatpush1.bf16.msra.mxu1 %v4488_v10  ;;  %v4525_v10 = vld [vmem:[#allocation4 + $0x1f8] sm:$0xff] }
0x108d   :  { %4607 = vmatprep.subr.bf16.mxu1 %v4493_v43  ;;  %v4648_v43 = vld [vmem:[#allocation4 + $0x220] sm:$0xff] }
0x108e   :  { %4565 = vmatpush1.bf16.msra.mxu0 %v4490_v46  ;;  %v4526_v46 = vpack.c.bf16 %v4456_v45, %v4454_v41  ;;  %v4647_v41 = vld [vmem:[#allocation4 + $0x218] sm:$0xff]  ;;  %v4652_v45 = vld [vmem:[#allocation4 + $0x240] sm:$0xff] }
0x108f   :  { %4566 = vmatprep.subr.bf16.mxu0 %v4495_v37  ;;  %v4516_v37 = vld [vmem:[#allocation4 + $0x1b0] sm:$0xff] }
0x1090   :  { %4608 = vmatpush1.bf16.msra.mxu1 %v4492_v58  ;;  %v4651_v58 = vld [vmem:[#allocation4 + $0x238] sm:$0xff] }
0x1091   :  { %4609 = vmatprep.subr.bf16.mxu1 %v4497_v8  ;;  %v4656_v8 = vld [vmem:[#allocation4 + $0x260] sm:$0xff] }
0x1092   :  { %4567 = vmatpush1.bf16.msra.mxu0 %v4494_v57  ;;  %v4649_v57 = vld [vmem:[#allocation4 + $0x228] sm:$0xff] }
0x1093   :  { %4568 = vmatprep.subr.bf16.mxu0 %v4499_v9  ;;  %v4520_v9 = vld [vmem:[#allocation4 + $0x1d0] sm:$0xff] }
0x1094   :  { %4610 = vmatpush1.bf16.msra.mxu1 %v4496_v48  ;;  %v4655_v48 = vld [vmem:[#allocation4 + $0x258] sm:$0xff] }
0x1095   :  { %4611 = vmatprep.subr.bf16.mxu1 %v4501_v39  ;;  %v4660_v39 = vld [vmem:[#allocation4 + $0x280] sm:$0xff] }
0x1096   :  { %4569 = vmatpush1.bf16.msra.mxu0 %v4498_v47  ;;  %v4657_v47 = vld [vmem:[#allocation4 + $0x268] sm:$0xff] }
0x1097   :  { %4570 = vmatprep.subr.bf16.mxu0 %v4503_v23  ;;  %v4646_v23 = vld [vmem:[#allocation4 + $0x210] sm:$0xff] }
0x1098   :  { %4612 = vmatpush1.bf16.msra.mxu1 %v4500_v40  ;;  %v4659_v40 = vld [vmem:[#allocation4 + $0x278] sm:$0xff] }
0x1099   :  { %4613 = vmatprep.subr.bf16.mxu1 %v4505_v13  ;;  %v4664_v13 = vld [vmem:[#allocation4 + $0x2a0] sm:$0xff] }
0x109a   :  { %4571 = vmatpush1.bf16.msra.mxu0 %v4502_v30  ;;  %v4661_v30 = vld [vmem:[#allocation4 + $0x288] sm:$0xff] }
0x109b   :  { %4572 = vmatprep.subr.bf16.mxu0 %v4507_v11  ;;  %v4650_v11 = vld [vmem:[#allocation4 + $0x230] sm:$0xff] }
0x109c   :  { %4614 = vmatpush1.bf16.msra.mxu1 %v4504_v61  ;;  %v4663_v61 = vld [vmem:[#allocation4 + $0x298] sm:$0xff] }
0x109d   :  { %4615 = vmatprep.subr.bf16.mxu1 %v4509_v24  ;;  %v4668_v24 = vld [vmem:[#allocation4 + $0x2c0] sm:$0xff] }
0x109e   :  { %4573 = vmatpush1.bf16.msra.mxu0 %v4506_v27  ;;  %v4665_v27 = vld [vmem:[#allocation4 + $0x2a8] sm:$0xff] }
0x109f   :  { %4574 = vmatprep.subr.bf16.mxu0 %v4511_v7  ;;  %v4654_v7 = vld [vmem:[#allocation4 + $0x250] sm:$0xff] }
0x10a0   :  { %4616 = vmatpush1.bf16.msra.mxu1 %v4508_v44  ;;  %v4667_v44 = vld [vmem:[#allocation4 + $0x2b8] sm:$0xff] }
0x10a1   :  { %4617 = vmatprep.subr.bf16.mxu1 %v4513_v42  ;;  %v4672_v42 = vld [vmem:[#allocation4 + $0x2e0] sm:$0xff] }
0x10a2   :  { %4575 = vmatpush1.bf16.msra.mxu0 %v4510_v38  ;;  %v4669_v38 = vld [vmem:[#allocation4 + $0x2c8] sm:$0xff] }
0x10a3   :  { %4576 = vmatprep.subr.bf16.mxu0 %v4515_v29  ;;  %v4658_v29 = vld [vmem:[#allocation4 + $0x270] sm:$0xff] }
0x10a4   :  { %4618 = vmatpush1.bf16.msra.mxu1 %v4512_v63  ;;  %v4671_v63 = vld [vmem:[#allocation4 + $0x2d8] sm:$0xff] }
0x10a5   :  { %4619 = vmatprep.subr.bf16.mxu1 %v4517_v59  ;;  %v4676_v59 = vld [vmem:[#allocation4 + $0x300] sm:$0xff] }
0x10a6   :  { %4577 = vmatpush1.bf16.msra.mxu0 %v4514_v14  ;;  %v4673_v14 = vld [vmem:[#allocation4 + $0x2e8] sm:$0xff] }
0x10a7   :  { %4578 = vmatprep.subr.bf16.mxu0 %v4519_v56  ;;  %v4662_v56 = vld [vmem:[#allocation4 + $0x290] sm:$0xff] }
0x10a8   :  { %4620 = vmatpush1.bf16.msra.mxu1 %v4516_v37  ;;  %v4680_v37 = vld [vmem:[#allocation4 + $0x320] sm:$0xff] }
0x10a9   :  { %4621 = vmatprep.subr.bf16.mxu1 %v4521_v0  ;;  %v4685_v0 = vld [vmem:[#allocation4 + $0x348] sm:$0xff] }
0x10aa   :  { %4579 = vmatpush1.bf16.msra.mxu0 %v4518_v62  ;;  %v4677_v62 = vld [vmem:[#allocation4 + $0x308] sm:$0xff] }
0x10ab   :  { %4580 = vmatprep.subr.bf16.mxu0 %v4523_v12  ;;  %v4666_v12 = vld [vmem:[#allocation4 + $0x2b0] sm:$0xff] }
0x10ac   :  { %4622 = vmatpush1.bf16.msra.mxu1 %v4520_v9  ;;  %v4684_v9 = vld [vmem:[#allocation4 + $0x340] sm:$0xff] }
0x10ad   :  { %4623 = vmatprep.subr.bf16.mxu1 %v4525_v10  ;;  %v4689_v10 = vld [vmem:[#allocation4 + $0x368] sm:$0xff] }
0x10ae   :  { %4581 = vmatpush1.bf16.msra.mxu0 %v4522_v25  ;;  %v4681_v25 = vld [vmem:[#allocation4 + $0x328] sm:$0xff] }
0x10af   :  { %4798 = vmatprep.subr.bf16.mxu0 %v4645_v26  ;;  %v4670_v26 = vld [vmem:[#allocation4 + $0x2d0] sm:$0xff] }
0x10b0   :  { %4624 = vmatpush1.bf16.msra.mxu1 %v4524_v55  ;;  %v4688_v55 = vld [vmem:[#allocation4 + $0x360] sm:$0xff] }
0x10b1   :  { %4583 = vmatmul.mubr.bf16.vlgmr.msra.gmra.mrb[36].mxu0 %v4526_v46  ;;  %4884 = vmatprep.subr.bf16.mxu1 %v4647_v41  ;;  %v4693_v41 = vld [vmem:[#allocation4 + $0x388] sm:$0xff] }
0x10b2   :  { %4799 = vmatpush1.bf16.msra.mxu0 %v4644_v28  ;;  %v4674_v28 = vld [vmem:[#allocation4 + $0x2f0] sm:$0xff] }
0x10b3   :  { %4800 = vmatprep.subr.bf16.mxu0 %v4649_v57  ;;  %4626 = vmatmul.mubr.bf16.vlgmr.msra.gmra.mrb[40].mxu1 %v4526_v46  ;;  %v4675_v46 = vld [vmem:[#allocation4 + $0x2f8] sm:$0xff] }
0x10b4   :  { %4885 = vmatpush1.bf16.msra.mxu1 %v4646_v23  ;;  %v4679_v57 = vld [vmem:[#allocation4 + $0x318] sm:$0xff]  ;;  %v4692_v23 = vld [vmem:[#allocation4 + $0x380] sm:$0xff] }
0x10b5   :  { %4886 = vmatprep.subr.bf16.mxu1 %v4651_v58  ;;  %v4697_v58 = vld [vmem:[#allocation4 + $0x3a8] sm:$0xff] }
0x10b6   :  { %4801 = vmatpush1.bf16.msra.mxu0 %v4648_v43  ;;  %v4678_v43 = vld [vmem:[#allocation4 + $0x310] sm:$0xff] }
0x10b7   :  { %4802 = vmatprep.subr.bf16.mxu0 %v4653_v32  ;;  %v4683_v32 = vld [vmem:[#allocation4 + $0x338] sm:$0xff] }
0x10b8   :  { %4887 = vmatpush1.bf16.msra.mxu1 %v4650_v11  ;;  %v4696_v11 = vld [vmem:[#allocation4 + $0x3a0] sm:$0xff] }
0x10b9   :  { %4888 = vmatprep.subr.bf16.mxu1 %v4655_v48  ;;  %v4690_v48 = vld [vmem:[#allocation4 + $0x370] sm:$0xff] }
0x10ba   :  { %4803 = vmatpush1.bf16.msra.mxu0 %v4652_v45  ;;  %v4682_v45 = vld [vmem:[#allocation4 + $0x330] sm:$0xff] }
0x10bb   :  { %4804 = vmatprep.subr.bf16.mxu0 %v4657_v47  ;;  %v4687_v47 = vld [vmem:[#allocation4 + $0x358] sm:$0xff] }
0x10bc   :  { %4889 = vmatpush1.bf16.msra.mxu1 %v4654_v7  ;;  %v4699_v7 = vld [vmem:[#allocation4 + $0x3b8] sm:$0xff] }
0x10bd   :  { %4890 = vmatprep.subr.bf16.mxu1 %v4659_v40  ;;  %v4698_v40 = vld [vmem:[#allocation4 + $0x3b0] sm:$0xff] }
0x10be   :  { %4805 = vmatpush1.bf16.msra.mxu0 %v4656_v8  ;;  %v4686_v8 = vld [vmem:[#allocation4 + $0x350] sm:$0xff] }
0x10bf   :  { %4806 = vmatprep.subr.bf16.mxu0 %v4661_v30  ;;  %v4691_v30 = vld [vmem:[#allocation4 + $0x378] sm:$0xff] }
0x10c0   :  { %4891 = vmatpush1.bf16.msra.mxu1 %v4658_v29  ;;  %v4700_v29 = vld [vmem:[#allocation4 + $0x3c0] sm:$0xff] }
0x10c1   :  { %4892 = vmatprep.subr.bf16.mxu1 %v4663_v61  ;;  %v4702_v61 = vld [vmem:[#allocation4 + $0x3d0] sm:$0xff] }
0x10c2   :  { %4807 = vmatpush1.bf16.msra.mxu0 %v4660_v39  ;;  %v4695_v39 = vld [vmem:[#allocation4 + $0x398] sm:$0xff] }
0x10c3   :  { %4808 = vmatprep.subr.bf16.mxu0 %v4665_v27  ;;  %v4694_v27 = vld [vmem:[#allocation4 + $0x390] sm:$0xff] }
0x10c4   :  { %4893 = vmatpush1.bf16.msra.mxu1 %v4662_v56  ;;  %v4704_v56 = vld [vmem:[#allocation4 + $0x3e0] sm:$0xff] }
0x10c5   :  { %4894 = vmatprep.subr.bf16.mxu1 %v4667_v44  ;;  %v4706_v44 = vld [vmem:[#allocation4 + $0x3f0] sm:$0xff] }
0x10c6   :  { %4809 = vmatpush1.bf16.msra.mxu0 %v4664_v13  ;;  %v4701_v13 = vld [vmem:[#allocation4 + $0x3c8] sm:$0xff] }
0x10c7   :  { %4810 = vmatprep.subr.bf16.mxu0 %v4669_v38  ;;  %v4703_v38 = vld [vmem:[#allocation4 + $0x3d8] sm:$0xff] }
0x10c8   :  { %4895 = vmatpush1.bf16.msra.mxu1 %v4666_v12  ;;  %v8065_v12 = vld [vmem:[#allocation9 + $0x1f] sm:$0xf] }
0x10c9   :  { %4896 = vmatprep.subr.bf16.mxu1 %v4671_v63  ;;  %v4537_v63 = vrot.slane %v8065_v12, %v7821_v16 }
0x10ca   :  { %4811 = vmatpush1.bf16.msra.mxu0 %v4668_v24  ;;  %v4705_v24 = vld [vmem:[#allocation4 + $0x3e8] sm:$0xff] }
0x10cb   :  { %4812 = vmatprep.subr.bf16.mxu0 %v4673_v14  ;;  %v4707_v14 = vld [vmem:[#allocation4 + $0x3f8] sm:$0xff] }
0x10cc   :  { %4897 = vmatpush1.bf16.msra.mxu1 %v4670_v26 }
0x10cd   :  { %4898 = vmatprep.subr.bf16.mxu1 %v4675_v46 }
0x10ce   :  { %4813 = vmatpush1.bf16.msra.mxu0 %v4672_v42  ;;  %v4709_v42 = vld [vmem:[#allocation4 + $0x408] sm:$0xff] }
0x10cf   :  { %4814 = vmatprep.subr.bf16.mxu0 %v4677_v62  ;;  %v4711_v62 = vld [vmem:[#allocation4 + $0x418] sm:$0xff] }
0x10d0   :  { %4899 = vmatpush1.bf16.msra.mxu1 %v4674_v28 }
0x10d1   :  { %4900 = vmatprep.subr.bf16.mxu1 %v4679_v57 }
0x10d2   :  { %4815 = vmatpush1.bf16.msra.mxu0 %v4676_v59  ;;  %v4533_v59 = vrot.slane %v8065_v12, %v7818_v15 }
0x10d3   :  { %4816 = vmatprep.subr.bf16.mxu0 %v4681_v25 }
0x10d4   :  { %4901 = vmatpush1.bf16.msra.mxu1 %v4678_v43 }
0x10d5   :  { %4902 = vmatprep.subr.bf16.mxu1 %v4683_v32 }
0x10d6   :  { %4817 = vmatpush1.bf16.msra.mxu0 %v4680_v37 }
0x10d7   :  { %4818 = vmatprep.subr.bf16.mxu0 %v4685_v0 }
0x10d8   :  { %4903 = vmatpush1.bf16.msra.mxu1 %v4682_v45  ;;  %v4545_v45 = vrot.slane %v8065_v12, %v7850_v60 }
0x10d9   :  { %4904 = vmatprep.subr.bf16.mxu1 %v4687_v47 }
0x10da   :  { %4819 = vmatpush1.bf16.msra.mxu0 %v4684_v9 }
0x10db   :  { %4820 = vmatprep.subr.bf16.mxu0 %v4689_v10 }
0x10dc   :  { %4905 = vmatpush1.bf16.msra.mxu1 %v4686_v8  ;;  %v4713_v8 = vld [vmem:[#allocation4 + $0x428] sm:$0xff] }
0x10dd   :  { %4906 = vmatprep.subr.bf16.mxu1 %v4691_v30  ;;  %v4715_v30 = vld [vmem:[#allocation4 + $0x438] sm:$0xff] }
0x10de   :  { %4821 = vmatpush1.bf16.msra.mxu0 %v4688_v55 }
0x10df   :  { %4822 = vmatprep.subr.bf16.mxu0 %v4693_v41 }
0x10e0   :  { %4907 = vmatpush1.bf16.msra.mxu1 %v4690_v48 }
0x10e1   :  { %4908 = vmatprep.subr.bf16.mxu1 %v4695_v39 }
0x10e2   :  { %4823 = vmatpush1.bf16.msra.mxu0 %v4692_v23  ;;  %v4708_v23 = vld [vmem:[#allocation4 + $0x400] sm:$0xff] }
0x10e3   :  { %4824 = vmatprep.subr.bf16.mxu0 %v4697_v58  ;;  %v4710_v58 = vld [vmem:[#allocation4 + $0x410] sm:$0xff] }
0x10e4   :  { %4909 = vmatpush1.bf16.msra.mxu1 %v4694_v27 }
0x10e5   :  { %4910 = vmatprep.subr.bf16.mxu1 %v4699_v7  ;;  %v4712_v7 = vld [vmem:[#allocation4 + $0x420] sm:$0xff] }
0x10e6   :  { %4825 = vmatpush1.bf16.msra.mxu0 %v4696_v11 }
0x10e7   :  { %4826 = vmatprep.subr.bf16.mxu0 %v4701_v13 }
0x10e8   :  { %4911 = vmatpush1.bf16.msra.mxu1 %v4698_v40  ;;  %v4714_v40 = vld [vmem:[#allocation4 + $0x430] sm:$0xff] }
0x10e9   :  { %4912 = vmatprep.subr.bf16.mxu1 %v4703_v38  ;;  %v4717_v38 = vld [vmem:[#allocation4 + $0x448] sm:$0xff] }
0x10ea   :  { %4827 = vmatpush1.bf16.msra.mxu0 %v4700_v29  ;;  %v4719_v29 = vld [vmem:[#allocation4 + $0x458] sm:$0xff] }
0x10eb   :  { %4828 = vmatprep.subr.bf16.mxu0 %v4705_v24 }
0x10ec   :  { %4913 = vmatpush1.bf16.msra.mxu1 %v4702_v61 }
0x10ed   :  { %4914 = vmatprep.subr.bf16.mxu1 %v4707_v14 }
0x10ee   :  { %4829 = vmatpush1.bf16.msra.mxu0 %v4704_v56  ;;  %v4716_v56 = vld [vmem:[#allocation4 + $0x440] sm:$0xff] }
0x10ef   :  { %4841 = vmatprep.subr.bf16.mxu0 %v4709_v42  ;;  %v4721_v42 = vld [vmem:[#allocation4 + $0x468] sm:$0xff] }
0x10f0   :  { %4915 = vmatpush1.bf16.msra.mxu1 %v4706_v44  ;;  %v4718_v44 = vld [vmem:[#allocation4 + $0x450] sm:$0xff] }
0x10f1   :  { %4927 = vmatprep.subr.bf16.mxu1 %v4711_v62  ;;  %v4723_v62 = vld [vmem:[#allocation4 + $0x478] sm:$0xff] }
0x1184   :  { %v4584_v25 = vpop.f32.mrb[36].mxu0 }
0x1185   :  { %v4586_v26 = vpop.f32.mrb[37].mxu0  ;;  %v8073_v0 = vadd.f32 %v4584_v25, %v4533_v59  ;;  %v4722_v25 = vld [vmem:[#allocation4 + $0x470] sm:$0xff] }
0x1186   :  { %v8071_v46 = vadd.f32 %v4586_v26, %v4537_v63  ;;  %v4588_v37 = vpop.f32.mrb[38].mxu0  ;;  %v8093_v11 = vpop.f32.mrb[40].mxu1  ;;  %v4725_v26 = vld [vmem:[#allocation4 + $0x488] sm:$0xff] }
0x1187   :  { %v8075_v28 = vadd.f32 %v4588_v37, %v4533_v59  ;;  %v4590_v57 = vpop.f32.mrb[39].mxu0  ;;  %v4636_v55 = vmax.f32 %v8073_v0, 0.0  ;;  %v4629_v48 = vpop.f32.mrb[41].mxu1  ;;  %v4720_v59 = vld [vmem:[#allocation4 + $0x460] sm:$0xff]  ;;  %v4727_v37 = vld [vmem:[#allocation4 + $0x498] sm:$0xff] }
0x1188   :  { %v8077_v9 = vadd.f32 %v4590_v57, %v4537_v63  ;;  %v8254_v43 = vmax.f32 %v8071_v46, 0.0  ;;  %v8095_v39 = vadd.f32 %v4629_v48, %v4545_v45  ;;  %v8097_v27 = vpop.f32.mrb[42].mxu1  ;;  %v4724_v57 = vld [vmem:[#allocation4 + $0x480] sm:$0xff] }
0x1189   :  { %v8252_v10 = vmax.f32 %v8075_v28, 0.0  ;;  %v4633_v13 = vpop.f32.mrb[43].mxu1  ;;  %v4732_v48 = vld [vmem:[#allocation4 + $0x4c0] sm:$0xff] }
0x118a   :  { %v8250_v32 = vmax.f32 %v8077_v9, 0.0  ;;  %v8253_v61 = vmax.f32 %v8095_v39, 0.0  ;;  %v8100_v24 = vadd.f32 %v4633_v13, %v4545_v45  ;;  %v4729_v45 = vld [vmem:[#allocation4 + $0x4a8] sm:$0xff]  ;;  %v4739_v13 = vld [vmem:[#allocation4 + $0x4f8] sm:$0xff] }
0x118b   :  { %v4772_v47 = vpack.c.bf16 %v8252_v10, %v4636_v55 }
0x118c   :  { %v4773_v41 = vpack.c.bf16 %v8250_v32, %v8254_v43  ;;  %v8249_v14 = vmax.f32 %v8100_v24, 0.0 }
0x118e   :  { %4830 = vmatprep.mubr.bf16.mxu0 %v4773_v41  ;;  %4916 = vmatprep.mubr.bf16.mxu1 %v4773_v41  ;;  %v4775_v63 = vpack.c.bf16 %v8249_v14, %v8253_v61  ;;  %v4726_v41 = vld [vmem:[#allocation4 + $0x490] sm:$0xff] }
0x118f   :  { %4831 = vmatmul.mubr.bf16.vlgmr.msra.gmra.mrb[40].mxu0 %v4772_v47  ;;  %4917 = vmatmul.mubr.bf16.vlgmr.msra.gmra.mrb[44].mxu1 %v4772_v47  ;;  %v4731_v47 = vld [vmem:[#allocation4 + $0x4b8] sm:$0xff] }
0x1190   :  { %4842 = vmatpush1.bf16.msra.mxu0 %v4708_v23  ;;  %4928 = vmatpush1.bf16.msra.mxu1 %v4710_v58  ;;  %v4728_v23 = vld [vmem:[#allocation4 + $0x4a0] sm:$0xff]  ;;  %v4730_v58 = vld [vmem:[#allocation4 + $0x4b0] sm:$0xff] }
0x1191   :  { %4843 = vmatprep.subr.bf16.mxu0 %v4713_v8  ;;  %4929 = vmatprep.subr.bf16.mxu1 %v4715_v30  ;;  %v4733_v8 = vld [vmem:[#allocation4 + $0x4c8] sm:$0xff]  ;;  %v4735_v30 = vld [vmem:[#allocation4 + $0x4d8] sm:$0xff] }
0x1192   :  { %4873 = vmatprep.mubr.bf16.mxu0 %v4775_v63  ;;  %4959 = vmatprep.mubr.bf16.mxu1 %v4775_v63  ;;  %v4745_v63 = vld [vmem:[#allocation4 + $0x528] sm:$0xff] }
0x1194   :  { %4844 = vmatpush1.bf16.msra.mxu0 %v4712_v7  ;;  %4930 = vmatpush1.bf16.msra.mxu1 %v4714_v40  ;;  %v4734_v7 = vld [vmem:[#allocation4 + $0x4d0] sm:$0xff]  ;;  %v4737_v40 = vld [vmem:[#allocation4 + $0x4e8] sm:$0xff] }
0x1195   :  { %4845 = vmatprep.subr.bf16.mxu0 %v4717_v38  ;;  %4931 = vmatprep.subr.bf16.mxu1 %v4719_v29  ;;  %v4736_v38 = vld [vmem:[#allocation4 + $0x4e0] sm:$0xff]  ;;  %v4738_v29 = vld [vmem:[#allocation4 + $0x4f0] sm:$0xff] }
0x1198   :  { %4846 = vmatpush1.bf16.msra.mxu0 %v4716_v56  ;;  %4932 = vmatpush1.bf16.msra.mxu1 %v4718_v44  ;;  %v4741_v56 = vld [vmem:[#allocation4 + $0x508] sm:$0xff]  ;;  %v4743_v44 = vld [vmem:[#allocation4 + $0x518] sm:$0xff] }
0x1199   :  { %4847 = vmatprep.subr.bf16.mxu0 %v4721_v42  ;;  %4933 = vmatprep.subr.bf16.mxu1 %v4723_v62  ;;  %v4740_v42 = vld [vmem:[#allocation4 + $0x500] sm:$0xff]  ;;  %v4742_v62 = vld [vmem:[#allocation4 + $0x510] sm:$0xff] }
0x119c   :  { %4848 = vmatpush1.bf16.msra.mxu0 %v4720_v59  ;;  %4934 = vmatpush1.bf16.msra.mxu1 %v4722_v25  ;;  %v4747_v59 = vld [vmem:[#allocation4 + $0x538] sm:$0xff]  ;;  %v4744_v25 = vld [vmem:[#allocation4 + $0x520] sm:$0xff] }
0x119d   :  { %4849 = vmatprep.subr.bf16.mxu0 %v4725_v26  ;;  %4935 = vmatprep.subr.bf16.mxu1 %v4727_v37  ;;  %v4746_v26 = vld [vmem:[#allocation4 + $0x530] sm:$0xff]  ;;  %v4749_v37 = vld [vmem:[#allocation4 + $0x548] sm:$0xff] }
0x11a0   :  { %4850 = vmatpush1.bf16.msra.mxu0 %v4724_v57  ;;  %4936 = vmatpush1.bf16.msra.mxu1 %v4726_v41  ;;  %v4751_v57 = vld [vmem:[#allocation4 + $0x558] sm:$0xff]  ;;  %v4748_v41 = vld [vmem:[#allocation4 + $0x540] sm:$0xff] }
0x11a1   :  { %4851 = vmatprep.subr.bf16.mxu0 %v4729_v45  ;;  %4937 = vmatprep.subr.bf16.mxu1 %v4731_v47  ;;  %v4750_v45 = vld [vmem:[#allocation4 + $0x550] sm:$0xff]  ;;  %v4753_v47 = vld [vmem:[#allocation4 + $0x568] sm:$0xff] }
0x11a4   :  { %4852 = vmatpush1.bf16.msra.mxu0 %v4728_v23  ;;  %4938 = vmatpush1.bf16.msra.mxu1 %v4730_v58  ;;  %v4755_v23 = vld [vmem:[#allocation4 + $0x578] sm:$0xff]  ;;  %v4752_v58 = vld [vmem:[#allocation4 + $0x560] sm:$0xff] }
0x11a5   :  { %4853 = vmatprep.subr.bf16.mxu0 %v4733_v8  ;;  %4939 = vmatprep.subr.bf16.mxu1 %v4735_v30  ;;  %v4754_v8 = vld [vmem:[#allocation4 + $0x570] sm:$0xff]  ;;  %v4757_v30 = vld [vmem:[#allocation4 + $0x588] sm:$0xff] }
0x11a8   :  { %4854 = vmatpush1.bf16.msra.mxu0 %v4732_v48  ;;  %4940 = vmatpush1.bf16.msra.mxu1 %v4734_v7  ;;  %v4759_v48 = vld [vmem:[#allocation4 + $0x598] sm:$0xff]  ;;  %v4756_v7 = vld [vmem:[#allocation4 + $0x580] sm:$0xff] }
0x11a9   :  { %4855 = vmatprep.subr.bf16.mxu0 %v4737_v40  ;;  %4941 = vmatprep.subr.bf16.mxu1 %v4739_v13  ;;  %v4758_v40 = vld [vmem:[#allocation4 + $0x590] sm:$0xff]  ;;  %v4761_v13 = vld [vmem:[#allocation4 + $0x5a8] sm:$0xff] }
0x11ac   :  { %4856 = vmatpush1.bf16.msra.mxu0 %v4736_v38  ;;  %4942 = vmatpush1.bf16.msra.mxu1 %v4738_v29  ;;  %v4763_v38 = vld [vmem:[#allocation4 + $0x5b8] sm:$0xff]  ;;  %v4541_v29 = vrot.slane %v8065_v12, %v7869_v31 }
0x11ad   :  { %4857 = vmatprep.subr.bf16.mxu0 %v4741_v56  ;;  %4943 = vmatprep.subr.bf16.mxu1 %v4743_v44  ;;  %v4760_v56 = vld [vmem:[#allocation4 + $0x5a0] sm:$0xff]  ;;  %v4762_v44 = vld [vmem:[#allocation4 + $0x5b0] sm:$0xff]  ;;  %v4771_v12 = vld [vmem:[#allocation4 + $0x5f8] sm:$0xff] }
0x11b0   :  { %4858 = vmatpush1.bf16.msra.mxu0 %v4740_v42  ;;  %4944 = vmatpush1.bf16.msra.mxu1 %v4742_v62  ;;  %v4765_v42 = vld [vmem:[#allocation4 + $0x5c8] sm:$0xff]  ;;  %v4767_v62 = vld [vmem:[#allocation4 + $0x5d8] sm:$0xff] }
0x11b1   :  { %4859 = vmatprep.subr.bf16.mxu0 %v4745_v63  ;;  %4945 = vmatprep.subr.bf16.mxu1 %v4747_v59  ;;  %v8110_v63 = vadd.f32 %v8093_v11, %v4541_v29  ;;  %v8113_v59 = vadd.f32 %v8097_v27, %v4541_v29  ;;  %v4770_v11 = vld [vmem:[#allocation4 + $0x5f0] sm:$0xff]  ;;  %v4986_v29 = vld [vmem:[#allocation4 + $0x640] sm:$0xff] }
0x11b3   :  { %v8353_v0 = vmax.f32 %v8113_v59, 0.0 }
0x11b4   :  { %4860 = vmatpush1.bf16.msra.mxu0 %v4744_v25  ;;  %4946 = vmatpush1.bf16.msra.mxu1 %v4746_v26  ;;  %v4764_v25 = vld [vmem:[#allocation4 + $0x5c0] sm:$0xff]  ;;  %v4766_v26 = vld [vmem:[#allocation4 + $0x5d0] sm:$0xff] }
0x11b5   :  { %4861 = vmatprep.subr.bf16.mxu0 %v4749_v37  ;;  %4947 = vmatprep.subr.bf16.mxu1 %v4751_v57  ;;  %v4769_v37 = vld [vmem:[#allocation4 + $0x5e8] sm:$0xff]  ;;  %v8255_v57 = vmax.f32 %v8110_v63, 0.0 }
0x11b8   :  { %4862 = vmatpush1.bf16.msra.mxu0 %v4748_v41  ;;  %4948 = vmatpush1.bf16.msra.mxu1 %v4750_v45  ;;  %v8251_v41 = vmax.f32 %v8113_v59, 0.0  ;;  %v4768_v45 = vld [vmem:[#allocation4 + $0x5e0] sm:$0xff] }
0x11b9   :  { %4863 = vmatprep.subr.bf16.mxu0 %v4753_v47  ;;  %4949 = vmatprep.subr.bf16.mxu1 %v4755_v23  ;;  %v4979_v47 = vld [vmem:[#allocation4 + $0x608] sm:$0xff]  ;;  %v4981_v23 = vld [vmem:[#allocation4 + $0x618] sm:$0xff] }
0x11ba   :  { %v4774_v27 = vpack.c.bf16 %v8251_v41, %v8255_v57  ;;  %v5042_v57 = vld [vmem:[#allocation4 + $0x800] sm:$0xff] }
0x11bc   :  { %4864 = vmatpush1.bf16.msra.mxu0 %v4752_v58  ;;  %4950 = vmatpush1.bf16.msra.mxu1 %v4754_v8  ;;  %v4978_v58 = vld [vmem:[#allocation4 + $0x600] sm:$0xff]  ;;  %v4980_v8 = vld [vmem:[#allocation4 + $0x610] sm:$0xff] }
0x11bd   :  { %4865 = vmatprep.subr.bf16.mxu0 %v4757_v30  ;;  %4951 = vmatprep.subr.bf16.mxu1 %v4759_v48  ;;  %v4983_v30 = vld [vmem:[#allocation4 + $0x628] sm:$0xff]  ;;  %v4985_v48 = vld [vmem:[#allocation4 + $0x638] sm:$0xff] }
0x11c0   :  { %4866 = vmatpush1.bf16.msra.mxu0 %v4756_v7  ;;  %4952 = vmatpush1.bf16.msra.mxu1 %v4758_v40  ;;  %v4982_v7 = vld [vmem:[#allocation4 + $0x620] sm:$0xff]  ;;  %v4984_v40 = vld [vmem:[#allocation4 + $0x630] sm:$0xff] }
0x11c1   :  { %4867 = vmatprep.subr.bf16.mxu0 %v4761_v13  ;;  %4953 = vmatprep.subr.bf16.mxu1 %v4763_v38  ;;  %v4987_v13 = vld [vmem:[#allocation4 + $0x648] sm:$0xff]  ;;  %v4989_v38 = vld [vmem:[#allocation4 + $0x658] sm:$0xff] }
0x11c4   :  { %4868 = vmatpush1.bf16.msra.mxu0 %v4760_v56  ;;  %4954 = vmatpush1.bf16.msra.mxu1 %v4762_v44  ;;  %v4988_v56 = vld [vmem:[#allocation4 + $0x650] sm:$0xff]  ;;  %v4991_v44 = vld [vmem:[#allocation4 + $0x668] sm:$0xff] }
0x11c5   :  { %4869 = vmatprep.subr.bf16.mxu0 %v4765_v42  ;;  %4955 = vmatprep.subr.bf16.mxu1 %v4767_v62  ;;  %v4993_v42 = vld [vmem:[#allocation4 + $0x678] sm:$0xff]  ;;  %v4990_v62 = vld [vmem:[#allocation4 + $0x660] sm:$0xff] }
0x11c8   :  { %4870 = vmatpush1.bf16.msra.mxu0 %v4764_v25  ;;  %4956 = vmatpush1.bf16.msra.mxu1 %v4766_v26  ;;  %v4992_v25 = vld [vmem:[#allocation4 + $0x670] sm:$0xff]  ;;  %v4995_v26 = vld [vmem:[#allocation4 + $0x688] sm:$0xff] }
0x11c9   :  { %4871 = vmatprep.subr.bf16.mxu0 %v4769_v37  ;;  %4957 = vmatprep.subr.bf16.mxu1 %v4771_v12  ;;  %v4997_v37 = vld [vmem:[#allocation4 + $0x698] sm:$0xff]  ;;  %v4994_v12 = vld [vmem:[#allocation4 + $0x680] sm:$0xff] }
0x11cc   :  { %4872 = vmatpush1.bf16.msra.mxu0 %v4768_v45  ;;  %4958 = vmatpush1.bf16.msra.mxu1 %v4770_v11  ;;  %v4996_v45 = vld [vmem:[#allocation4 + $0x690] sm:$0xff]  ;;  %v4999_v11 = vld [vmem:[#allocation4 + $0x6a8] sm:$0xff] }
0x11cd   :  { %5132 = vmatprep.subr.bf16.mxu0 %v4979_v47  ;;  %5218 = vmatprep.subr.bf16.mxu1 %v4981_v23  ;;  %v5001_v47 = vld [vmem:[#allocation4 + $0x6b8] sm:$0xff]  ;;  %v4998_v23 = vld [vmem:[#allocation4 + $0x6a0] sm:$0xff] }
0x11cf   :  { %4874 = vmatmul.mubr.bf16.vlgmr.msra.gmra.mrb[40].mxu0 %v4774_v27  ;;  %4960 = vmatmul.mubr.bf16.vlgmr.msra.gmra.mrb[44].mxu1 %v4774_v27  ;;  %v5000_v27 = vld [vmem:[#allocation4 + $0x6b0] sm:$0xff] }
0x11d0   :  { %5133 = vmatpush1.bf16.msra.mxu0 %v4978_v58  ;;  %5219 = vmatpush1.bf16.msra.mxu1 %v4980_v8  ;;  %v5003_v58 = vld [vmem:[#allocation4 + $0x6c8] sm:$0xff]  ;;  %v5005_v8 = vld [vmem:[#allocation4 + $0x6d8] sm:$0xff] }
0x11d1   :  { %5134 = vmatprep.subr.bf16.mxu0 %v4983_v30  ;;  %5220 = vmatprep.subr.bf16.mxu1 %v4985_v48  ;;  %v5002_v30 = vld [vmem:[#allocation4 + $0x6c0] sm:$0xff]  ;;  %v5004_v48 = vld [vmem:[#allocation4 + $0x6d0] sm:$0xff] }
0x11d4   :  { %5135 = vmatpush1.bf16.msra.mxu0 %v4982_v7  ;;  %5221 = vmatpush1.bf16.msra.mxu1 %v4984_v40  ;;  %v5007_v7 = vld [vmem:[#allocation4 + $0x6e8] sm:$0xff]  ;;  %v5009_v40 = vld [vmem:[#allocation4 + $0x6f8] sm:$0xff] }
0x11d5   :  { %5136 = vmatprep.subr.bf16.mxu0 %v4987_v13  ;;  %5222 = vmatprep.subr.bf16.mxu1 %v4989_v38  ;;  %v5006_v13 = vld [vmem:[#allocation4 + $0x6e0] sm:$0xff]  ;;  %v5008_v38 = vld [vmem:[#allocation4 + $0x6f0] sm:$0xff] }
0x11d8   :  { %5137 = vmatpush1.bf16.msra.mxu0 %v4986_v29  ;;  %5223 = vmatpush1.bf16.msra.mxu1 %v4988_v56  ;;  %v5011_v29 = vld [vmem:[#allocation4 + $0x708] sm:$0xff]  ;;  %v5013_v56 = vld [vmem:[#allocation4 + $0x718] sm:$0xff] }
0x11d9   :  { %5138 = vmatprep.subr.bf16.mxu0 %v4991_v44  ;;  %5224 = vmatprep.subr.bf16.mxu1 %v4993_v42  ;;  %v5010_v44 = vld [vmem:[#allocation4 + $0x700] sm:$0xff]  ;;  %v5012_v42 = vld [vmem:[#allocation4 + $0x710] sm:$0xff] }
0x11dc   :  { %5139 = vmatpush1.bf16.msra.mxu0 %v4990_v62  ;;  %5225 = vmatpush1.bf16.msra.mxu1 %v4992_v25  ;;  %v5015_v62 = vld [vmem:[#allocation4 + $0x728] sm:$0xff]  ;;  %v5017_v25 = vld [vmem:[#allocation4 + $0x738] sm:$0xff] }
0x11dd   :  { %5140 = vmatprep.subr.bf16.mxu0 %v4995_v26  ;;  %5226 = vmatprep.subr.bf16.mxu1 %v4997_v37  ;;  %v5014_v26 = vld [vmem:[#allocation4 + $0x720] sm:$0xff]  ;;  %v5016_v37 = vld [vmem:[#allocation4 + $0x730] sm:$0xff] }
0x11e0   :  { %5141 = vmatpush1.bf16.msra.mxu0 %v4994_v12  ;;  %5227 = vmatpush1.bf16.msra.mxu1 %v4996_v45  ;;  %v5019_v12 = vld [vmem:[#allocation4 + $0x748] sm:$0xff]  ;;  %v5021_v45 = vld [vmem:[#allocation4 + $0x758] sm:$0xff] }
0x11e1   :  { %5142 = vmatprep.subr.bf16.mxu0 %v4999_v11  ;;  %5228 = vmatprep.subr.bf16.mxu1 %v5001_v47  ;;  %v5018_v11 = vld [vmem:[#allocation4 + $0x740] sm:$0xff]  ;;  %v5020_v47 = vld [vmem:[#allocation4 + $0x750] sm:$0xff] }
0x11e4   :  { %5143 = vmatpush1.bf16.msra.mxu0 %v4998_v23  ;;  %5229 = vmatpush1.bf16.msra.mxu1 %v5000_v27  ;;  %v5023_v23 = vld [vmem:[#allocation4 + $0x768] sm:$0xff]  ;;  %v5025_v27 = vld [vmem:[#allocation4 + $0x778] sm:$0xff] }
0x11e5   :  { %5144 = vmatprep.subr.bf16.mxu0 %v5003_v58  ;;  %5230 = vmatprep.subr.bf16.mxu1 %v5005_v8  ;;  %v5022_v58 = vld [vmem:[#allocation4 + $0x760] sm:$0xff]  ;;  %v5024_v8 = vld [vmem:[#allocation4 + $0x770] sm:$0xff] }
0x11e8   :  { %5145 = vmatpush1.bf16.msra.mxu0 %v5002_v30  ;;  %5231 = vmatpush1.bf16.msra.mxu1 %v5004_v48  ;;  %v5027_v30 = vld [vmem:[#allocation4 + $0x788] sm:$0xff]  ;;  %v5029_v48 = vld [vmem:[#allocation4 + $0x798] sm:$0xff] }
0x11e9   :  { %5146 = vmatprep.subr.bf16.mxu0 %v5007_v7  ;;  %5232 = vmatprep.subr.bf16.mxu1 %v5009_v40  ;;  %v5026_v7 = vld [vmem:[#allocation4 + $0x780] sm:$0xff]  ;;  %v5028_v40 = vld [vmem:[#allocation4 + $0x790] sm:$0xff] }
0x11ec   :  { %5147 = vmatpush1.bf16.msra.mxu0 %v5006_v13  ;;  %5233 = vmatpush1.bf16.msra.mxu1 %v5008_v38  ;;  %v5031_v13 = vld [vmem:[#allocation4 + $0x7a8] sm:$0xff]  ;;  %v5033_v38 = vld [vmem:[#allocation4 + $0x7b8] sm:$0xff] }
0x11ed   :  { %5148 = vmatprep.subr.bf16.mxu0 %v5011_v29  ;;  %5234 = vmatprep.subr.bf16.mxu1 %v5013_v56  ;;  %v5030_v29 = vld [vmem:[#allocation4 + $0x7a0] sm:$0xff]  ;;  %v5032_v56 = vld [vmem:[#allocation4 + $0x7b0] sm:$0xff] }
0x11f0   :  { %5149 = vmatpush1.bf16.msra.mxu0 %v5010_v44  ;;  %5235 = vmatpush1.bf16.msra.mxu1 %v5012_v42  ;;  %v5035_v44 = vld [vmem:[#allocation4 + $0x7c8] sm:$0xff]  ;;  %v5037_v42 = vld [vmem:[#allocation4 + $0x7d8] sm:$0xff] }
0x11f1   :  { %5150 = vmatprep.subr.bf16.mxu0 %v5015_v62  ;;  %5236 = vmatprep.subr.bf16.mxu1 %v5017_v25  ;;  %v5034_v62 = vld [vmem:[#allocation4 + $0x7c0] sm:$0xff]  ;;  %v5036_v25 = vld [vmem:[#allocation4 + $0x7d0] sm:$0xff] }
0x11f4   :  { %5151 = vmatpush1.bf16.msra.mxu0 %v5014_v26  ;;  %5237 = vmatpush1.bf16.msra.mxu1 %v5016_v37  ;;  %v5039_v26 = vld [vmem:[#allocation4 + $0x7e8] sm:$0xff]  ;;  %v5041_v37 = vld [vmem:[#allocation4 + $0x7f8] sm:$0xff] }
0x11f5   :  { %5152 = vmatprep.subr.bf16.mxu0 %v5019_v12  ;;  %5238 = vmatprep.subr.bf16.mxu1 %v5021_v45  ;;  %v5038_v12 = vld [vmem:[#allocation4 + $0x7e0] sm:$0xff]  ;;  %v5040_v45 = vld [vmem:[#allocation4 + $0x7f0] sm:$0xff] }
0x11f8   :  { %5153 = vmatpush1.bf16.msra.mxu0 %v5018_v11  ;;  %5239 = vmatpush1.bf16.msra.mxu1 %v5020_v47  ;;  %v5043_v11 = vld [vmem:[#allocation4 + $0x808] sm:$0xff]  ;;  %v5045_v47 = vld [vmem:[#allocation4 + $0x818] sm:$0xff] }
0x11f9   :  { %5154 = vmatprep.subr.bf16.mxu0 %v5023_v23  ;;  %5240 = vmatprep.subr.bf16.mxu1 %v5025_v27  ;;  %v4776_v23 = vld [vmem:[#allocation9 + $0x23] sm:$0xf] }
0x11fa   :  { %v4781_v27 = vrot.slane %v4776_v23, %v7818_v15 }
0x11fc   :  { %5155 = vmatpush1.bf16.msra.mxu0 %v5022_v58  ;;  %5241 = vmatpush1.bf16.msra.mxu1 %v5024_v8  ;;  %v4789_v58 = vrot.slane %v4776_v23, %v7869_v31  ;;  %v4785_v8 = vrot.slane %v4776_v23, %v7821_v16 }
0x11fd   :  { %5156 = vmatprep.subr.bf16.mxu0 %v5027_v30  ;;  %5242 = vmatprep.subr.bf16.mxu1 %v5029_v48  ;;  %v4793_v30 = vrot.slane %v4776_v23, %v7850_v60 }
0x1200   :  { %5157 = vmatpush1.bf16.msra.mxu0 %v5026_v7  ;;  %5243 = vmatpush1.bf16.msra.mxu1 %v5028_v40 }
0x1201   :  { %5158 = vmatprep.subr.bf16.mxu0 %v5031_v13  ;;  %5244 = vmatprep.subr.bf16.mxu1 %v5033_v38 }
0x1204   :  { %5159 = vmatpush1.bf16.msra.mxu0 %v5030_v29  ;;  %5245 = vmatpush1.bf16.msra.mxu1 %v5032_v56 }
0x1205   :  { %5160 = vmatprep.subr.bf16.mxu0 %v5035_v44  ;;  %5246 = vmatprep.subr.bf16.mxu1 %v5037_v42 }
0x1208   :  { %5161 = vmatpush1.bf16.msra.mxu0 %v5034_v62  ;;  %5247 = vmatpush1.bf16.msra.mxu1 %v5036_v25 }
0x1209   :  { %5162 = vmatprep.subr.bf16.mxu0 %v5039_v26  ;;  %5248 = vmatprep.subr.bf16.mxu1 %v5041_v37 }
0x120c   :  { %5163 = vmatpush1.bf16.msra.mxu0 %v5038_v12  ;;  %5249 = vmatpush1.bf16.msra.mxu1 %v5040_v45 }
0x120d   :  { %5175 = vmatprep.subr.bf16.mxu0 %v5043_v11  ;;  %5261 = vmatprep.subr.bf16.mxu1 %v5045_v47 }
0x12a2   :  { %v4875_v48 = vpop.f32.mrb[40].mxu0  ;;  %v4961_v7 = vpop.f32.mrb[44].mxu1 }
0x12a3   :  { %v6396_v40 = vadd.f32 %v4875_v48, %v4781_v27  ;;  %v6400_v13 = vadd.f32 %v4961_v7, %v4789_v58  ;;  %v4877_v38 = vpop.f32.mrb[41].mxu0  ;;  %v4963_v29 = vpop.f32.mrb[45].mxu1 }
0x12a4   :  { %v6397_v56 = vadd.f32 %v4877_v38, %v4785_v8  ;;  %v6401_v44 = vadd.f32 %v4963_v29, %v4793_v30  ;;  %v4879_v42 = vpop.f32.mrb[42].mxu0  ;;  %v4965_v62 = vpop.f32.mrb[46].mxu1 }
0x12a5   :  { %v6398_v25 = vadd.f32 %v4879_v42, %v4781_v27  ;;  %v6402_v26 = vadd.f32 %v4965_v62, %v4789_v58  ;;  %v4881_v37 = vpop.f32.mrb[43].mxu0  ;;  %v4967_v12 = vpop.f32.mrb[47].mxu1  ;;  %v4970_v47 = vmax.f32 %v6396_v40, 0.0  ;;  %v4972_v14 = vmax.f32 %v6400_v13, 0.0  ;;  %v5044_v27 = vld [vmem:[#allocation4 + $0x810] sm:$0xff]  ;;  %v5047_v58 = vld [vmem:[#allocation4 + $0x828] sm:$0xff] }
0x12a6   :  { %v6399_v45 = vadd.f32 %v4881_v37, %v4785_v8  ;;  %v6403_v11 = vadd.f32 %v4967_v12, %v4793_v30  ;;  %v4971_v41 = vmax.f32 %v6397_v56, 0.0  ;;  %v4973_v10 = vmax.f32 %v6401_v44, 0.0  ;;  %v5049_v8 = vld [vmem:[#allocation4 + $0x838] sm:$0xff]  ;;  %v5046_v30 = vld [vmem:[#allocation4 + $0x820] sm:$0xff]  ;;  %v5048_v40 = vld [vmem:[#allocation4 + $0x830] sm:$0xff] }
0x12a7   :  { %v4974_v32 = vmax.f32 %v6398_v25, 0.0  ;;  %v4976_v23 = vmax.f32 %v6402_v26, 0.0  ;;  %v5055_v13 = vld [vmem:[#allocation4 + $0x868] sm:$0xff]  ;;  %v5056_v56 = vld [vmem:[#allocation4 + $0x870] sm:$0xff]  ;;  %v5061_v42 = vld [vmem:[#allocation4 + $0x898] sm:$0xff] }
0x12a8   :  { %v4975_v48 = vmax.f32 %v6399_v45, 0.0  ;;  %v4977_v7 = vmax.f32 %v6403_v11, 0.0  ;;  %v5059_v44 = vld [vmem:[#allocation4 + $0x888] sm:$0xff]  ;;  %v5058_v62 = vld [vmem:[#allocation4 + $0x880] sm:$0xff]  ;;  %v5060_v25 = vld [vmem:[#allocation4 + $0x890] sm:$0xff] }
0x12a9   :  { %v5106_v61 = vpack.c.bf16 %v4974_v32, %v4970_v47  ;;  %v8125_v43 = vpack.c.bf16 %v4976_v23, %v4972_v14  ;;  %v5051_v32 = vld [vmem:[#allocation4 + $0x848] sm:$0xff]  ;;  %v5053_v14 = vld [vmem:[#allocation4 + $0x858] sm:$0xff]  ;;  %v5062_v12 = vld [vmem:[#allocation4 + $0x8a0] sm:$0xff] }
0x12aa   :  { %v5107_v38 = vpack.c.bf16 %v4975_v48, %v4971_v41  ;;  %v5109_v29 = vpack.c.bf16 %v4977_v7, %v4973_v10  ;;  %v5050_v10 = vld [vmem:[#allocation4 + $0x840] sm:$0xff]  ;;  %v5052_v41 = vld [vmem:[#allocation4 + $0x850] sm:$0xff]  ;;  %v5063_v26 = vld [vmem:[#allocation4 + $0x8a8] sm:$0xff] }
0x12ab   :  { %v5065_v37 = vld [vmem:[#allocation4 + $0x8b8] sm:$0xff]  ;;  %v5064_v45 = vld [vmem:[#allocation4 + $0x8b0] sm:$0xff]  ;;  %v5067_v11 = vld [vmem:[#allocation4 + $0x8c8] sm:$0xff] }
0x12ac   :  { %5164 = vmatprep.mubr.bf16.mxu0 %v5107_v38  ;;  %5250 = vmatprep.mubr.bf16.mxu1 %v5107_v38  ;;  %v5069_v47 = vld [vmem:[#allocation4 + $0x8d8] sm:$0xff]  ;;  %v5066_v23 = vld [vmem:[#allocation4 + $0x8c0] sm:$0xff]  ;;  %v5068_v48 = vld [vmem:[#allocation4 + $0x8d0] sm:$0xff] }
0x12ad   :  { %5165 = vmatmul.mubr.bf16.vlgmr.msra.gmra.mrb[44].mxu0 %v5106_v61  ;;  %5251 = vmatmul.mubr.bf16.vlgmr.msra.gmra.mrb[48].mxu1 %v5106_v61  ;;  %v5057_v61 = vld [vmem:[#allocation4 + $0x878] sm:$0xff]  ;;  %v5071_v7 = vld [vmem:[#allocation4 + $0x8e8] sm:$0xff] }
0x12ae   :  { %5176 = vmatpush1.bf16.msra.mxu0 %v5042_v57  ;;  %5262 = vmatpush1.bf16.msra.mxu1 %v5044_v27  ;;  %v5054_v57 = vld [vmem:[#allocation4 + $0x860] sm:$0xff]  ;;  %v5073_v38 = vld [vmem:[#allocation4 + $0x8f8] sm:$0xff]  ;;  %v5072_v27 = vld [vmem:[#allocation4 + $0x8f0] sm:$0xff] }
0x12af   :  { %5207 = vmatprep.mubr.bf16.mxu0 %v5109_v29  ;;  %5293 = vmatprep.mubr.bf16.mxu1 %v5109_v29  ;;  %v5070_v29 = vld [vmem:[#allocation4 + $0x8e0] sm:$0xff] }
0x12b0   :  { %5177 = vmatprep.subr.bf16.mxu0 %v5047_v58  ;;  %5263 = vmatprep.subr.bf16.mxu1 %v5049_v8  ;;  %v5075_v58 = vld [vmem:[#allocation4 + $0x908] sm:$0xff]  ;;  %v5077_v8 = vld [vmem:[#allocation4 + $0x918] sm:$0xff] }
0x12b2   :  { %5178 = vmatpush1.bf16.msra.mxu0 %v5046_v30  ;;  %5264 = vmatpush1.bf16.msra.mxu1 %v5048_v40  ;;  %v5074_v30 = vld [vmem:[#allocation4 + $0x900] sm:$0xff]  ;;  %v5076_v40 = vld [vmem:[#allocation4 + $0x910] sm:$0xff] }
0x12b3   :  { %5179 = vmatprep.subr.bf16.mxu0 %v5051_v32  ;;  %5265 = vmatprep.subr.bf16.mxu1 %v5053_v14  ;;  %v5079_v32 = vld [vmem:[#allocation4 + $0x928] sm:$0xff]  ;;  %v5081_v14 = vld [vmem:[#allocation4 + $0x938] sm:$0xff] }
0x12b6   :  { %5180 = vmatpush1.bf16.msra.mxu0 %v5050_v10  ;;  %5266 = vmatpush1.bf16.msra.mxu1 %v5052_v41  ;;  %v5078_v10 = vld [vmem:[#allocation4 + $0x920] sm:$0xff]  ;;  %v5080_v41 = vld [vmem:[#allocation4 + $0x930] sm:$0xff] }
0x12b7   :  { %5181 = vmatprep.subr.bf16.mxu0 %v5055_v13  ;;  %5267 = vmatprep.subr.bf16.mxu1 %v5057_v61  ;;  %v5083_v13 = vld [vmem:[#allocation4 + $0x948] sm:$0xff]  ;;  %v5085_v61 = vld [vmem:[#allocation4 + $0x958] sm:$0xff] }
0x12ba   :  { %5182 = vmatpush1.bf16.msra.mxu0 %v5054_v57  ;;  %5268 = vmatpush1.bf16.msra.mxu1 %v5056_v56  ;;  %v5082_v57 = vld [vmem:[#allocation4 + $0x940] sm:$0xff]  ;;  %v5084_v56 = vld [vmem:[#allocation4 + $0x950] sm:$0xff] }
0x12bb   :  { %5183 = vmatprep.subr.bf16.mxu0 %v5059_v44  ;;  %5269 = vmatprep.subr.bf16.mxu1 %v5061_v42  ;;  %v5087_v44 = vld [vmem:[#allocation4 + $0x968] sm:$0xff]  ;;  %v5089_v42 = vld [vmem:[#allocation4 + $0x978] sm:$0xff] }
0x12be   :  { %5184 = vmatpush1.bf16.msra.mxu0 %v5058_v62  ;;  %5270 = vmatpush1.bf16.msra.mxu1 %v5060_v25  ;;  %v5086_v62 = vld [vmem:[#allocation4 + $0x960] sm:$0xff]  ;;  %v5088_v25 = vld [vmem:[#allocation4 + $0x970] sm:$0xff] }
0x12bf   :  { %5185 = vmatprep.subr.bf16.mxu0 %v5063_v26  ;;  %5271 = vmatprep.subr.bf16.mxu1 %v5065_v37  ;;  %v5091_v26 = vld [vmem:[#allocation4 + $0x988] sm:$0xff]  ;;  %v5093_v37 = vld [vmem:[#allocation4 + $0x998] sm:$0xff] }
0x12c2   :  { %5186 = vmatpush1.bf16.msra.mxu0 %v5062_v12  ;;  %5272 = vmatpush1.bf16.msra.mxu1 %v5064_v45  ;;  %v5090_v12 = vld [vmem:[#allocation4 + $0x980] sm:$0xff]  ;;  %v5092_v45 = vld [vmem:[#allocation4 + $0x990] sm:$0xff] }
0x12c3   :  { %5187 = vmatprep.subr.bf16.mxu0 %v5067_v11  ;;  %5273 = vmatprep.subr.bf16.mxu1 %v5069_v47  ;;  %v5095_v11 = vld [vmem:[#allocation4 + $0x9a8] sm:$0xff]  ;;  %v5097_v47 = vld [vmem:[#allocation4 + $0x9b8] sm:$0xff] }
0x12c6   :  { %5188 = vmatpush1.bf16.msra.mxu0 %v5066_v23  ;;  %5274 = vmatpush1.bf16.msra.mxu1 %v5068_v48  ;;  %v5094_v23 = vld [vmem:[#allocation4 + $0x9a0] sm:$0xff]  ;;  %v5096_v48 = vld [vmem:[#allocation4 + $0x9b0] sm:$0xff] }
0x12c7   :  { %5189 = vmatprep.subr.bf16.mxu0 %v5071_v7  ;;  %5275 = vmatprep.subr.bf16.mxu1 %v5073_v38  ;;  %v5099_v7 = vld [vmem:[#allocation4 + $0x9c8] sm:$0xff]  ;;  %v5101_v38 = vld [vmem:[#allocation4 + $0x9d8] sm:$0xff] }
0x12ca   :  { %5190 = vmatpush1.bf16.msra.mxu0 %v5070_v29  ;;  %5276 = vmatpush1.bf16.msra.mxu1 %v5072_v27  ;;  %v5098_v29 = vld [vmem:[#allocation4 + $0x9c0] sm:$0xff]  ;;  %v5100_v27 = vld [vmem:[#allocation4 + $0x9d0] sm:$0xff] }
0x12cb   :  { %5191 = vmatprep.subr.bf16.mxu0 %v5075_v58  ;;  %5277 = vmatprep.subr.bf16.mxu1 %v5077_v8  ;;  %v5103_v58 = vld [vmem:[#allocation4 + $0x9e8] sm:$0xff]  ;;  %v5105_v8 = vld [vmem:[#allocation4 + $0x9f8] sm:$0xff] }
0x12ce   :  { %5192 = vmatpush1.bf16.msra.mxu0 %v5074_v30  ;;  %5278 = vmatpush1.bf16.msra.mxu1 %v5076_v40  ;;  %v5102_v30 = vld [vmem:[#allocation4 + $0x9e0] sm:$0xff]  ;;  %v5104_v40 = vld [vmem:[#allocation4 + $0x9f0] sm:$0xff] }
0x12cf   :  { %5193 = vmatprep.subr.bf16.mxu0 %v5079_v32  ;;  %5279 = vmatprep.subr.bf16.mxu1 %v5081_v14  ;;  %v6127_v32 = vcombine.low %v7575_v17, %v7580_v18  ;;  %v6143_v14 = vcombine.low %v7735_v49, %v7740_v50  ;;  %v6129_v17 = vcombine.low %v7595_v21, %v7600_v22  ;;  %v8312_v49 = vld [vmem:[#allocation63_spill] sm:$0xff]  ;;  %v8313_v21 = vld [vmem:[#allocation32_spill] sm:$0xff] }
0x12d0   :  { %v6145_v18 = vcombine.low %v7755_v53, %v7760_v54  ;;  %v8314_v22 = vld [vmem:[#allocation31_spill] sm:$0xff]  ;;  %v8316_v53 = vld [vmem:[#allocation53_spill] sm:$0xff] }
0x12d2   :  { %5194 = vmatpush1.bf16.msra.mxu0 %v5078_v10  ;;  %5280 = vmatpush1.bf16.msra.mxu1 %v5080_v41  ;;  %v6119_v10 = vcombine.low %v7495_v1, %v7500_v2  ;;  %v6135_v41 = vcombine.low %v7655_v33, %v7660_v34  ;;  %v6120_v1 = vcombine.low %v7505_v3, %v7510_v4  ;;  %v8308_v33 = vld [vmem:[#allocation51_spill] sm:$0xff]  ;;  %v8309_v3 = vld [vmem:[#allocation42_spill] sm:$0xff]  ;;  %v8310_v4 = vld [vmem:[#allocation41_spill] sm:$0xff] }
0x12d3   :  { %5195 = vmatprep.subr.bf16.mxu0 %v5083_v13  ;;  %5281 = vmatprep.subr.bf16.mxu1 %v5085_v61  ;;  %v6128_v13 = vcombine.low %v7585_v19, %v7590_v20  ;;  %v6144_v61 = vcombine.low %v7745_v51, %v7750_v52  ;;  %v6136_v2 = vcombine.low %v7665_v35, %v7670_v36  ;;  %v8307_v20 = vld [vmem:[#allocation52_spill] sm:$0xff]  ;;  %v8315_v52 = vld [vmem:[#allocation54_spill] sm:$0xff] }
0x12d4   :  { %v6121_v19 = vcombine.low %v7515_v5, %v7520_v6  ;;  %v6137_v34 = vcombine.low %v8308_v33, %v8307_v20  ;;  %v6130_v35 = vcombine.low %v8310_v4, %v8309_v3  ;;  %v8311_v36 = vld [vmem:[#allocation64_spill] sm:$0xff]  ;;  %v6122_v51 = vcombine.low %v8314_v22, %v8313_v21  ;;  %v8318_v6 = vld [vmem:[#allocation43_spill] sm:$0xff]  ;;  %v8341_v20 = vld [vmem:[#allocation50_spill] sm:$0xff] }
0x12d5   :  { %v6146_v50 = vcombine.low %v8312_v49, %v8311_v36  ;;  %v6138_v54 = vcombine.low %v8316_v53, %v8315_v52  ;;  %v8317_v5 = vld [vmem:[#allocation44_spill] sm:$0xff]  ;;  %v8342_v33 = vld [vmem:[#allocation49_spill] sm:$0xff]  ;;  %v8344_v4 = vld [vmem:[#allocation71_spill] sm:$0xff] }
0x12d6   :  { %5196 = vmatpush1.bf16.msra.mxu0 %v5082_v57  ;;  %5282 = vmatpush1.bf16.msra.mxu1 %v5084_v56  ;;  %v8319_v57 = vld [vmem:[#allocation66_spill] sm:$0xff]  ;;  %v8320_v56 = vld [vmem:[#allocation65_spill] sm:$0xff]  ;;  %v8343_v3 = vld [vmem:[#allocation72_spill] sm:$0xff] }
0x12d7   :  { %5197 = vmatprep.subr.bf16.mxu0 %v5087_v44  ;;  %5283 = vmatprep.subr.bf16.mxu1 %v5089_v42  ;;  %v6147_v44 = vcombine.low %v8320_v56, %v8319_v57  ;;  %v8321_v42 = vld [vmem:[#allocation34_spill] sm:$0xff]  ;;  %v8345_v36 = vld [vmem:[#allocation40_spill] sm:$0xff]  ;;  %v8346_v49 = vld [vmem:[#allocation39_spill] sm:$0xff] }
0x12d8   :  { %v8347_v21 = vld [vmem:[#allocation62_spill] sm:$0xff]  ;;  %v8348_v22 = vld [vmem:[#allocation61_spill] sm:$0xff]  ;;  %v5110_v52 = vld [vmem:[#allocation9 + $0x27] sm:$0xf] }
0x12d9   :  { %v5115_v53 = vrot.slane %v5110_v52, %v7818_v15  ;;  %v8349_v15 = vmax.f32 %v8110_v63, 0.0  ;;  %v8354_v63 = vmax.f32 %v8077_v9, 0.0  ;;  %v5608_v9 = vpop.permute.xlu0 %5607 }
0x12da   :  { %5198 = vmatpush1.bf16.msra.mxu0 %v5086_v62  ;;  %5284 = vmatpush1.bf16.msra.mxu1 %v5088_v25  ;;  %v8322_v62 = vld [vmem:[#allocation33_spill] sm:$0xff] }
0x12db   :  { %5199 = vmatprep.subr.bf16.mxu0 %v5091_v26  ;;  %5285 = vmatprep.subr.bf16.mxu1 %v5093_v37  ;;  %v6123_v25 = vcombine.low %v8322_v62, %v8321_v42  ;;  %v8323_v26 = vld [vmem:[#allocation56_spill] sm:$0xff]  ;;  %v8324_v37 = vld [vmem:[#allocation55_spill] sm:$0xff] }
0x12de   :  { %5200 = vmatpush1.bf16.msra.mxu0 %v5090_v12  ;;  %5286 = vmatpush1.bf16.msra.mxu1 %v5092_v45  ;;  %v6139_v12 = vcombine.low %v8324_v37, %v8323_v26  ;;  %v8325_v45 = vld [vmem:[#allocation46_spill] sm:$0xff] }
0x12df   :  { %5201 = vmatprep.subr.bf16.mxu0 %v5095_v11  ;;  %5287 = vmatprep.subr.bf16.mxu1 %v5097_v47  ;;  %v8326_v11 = vld [vmem:[#allocation45_spill] sm:$0xff] }
0x12e0   :  { %v6132_v47 = vcombine.low %v8326_v11, %v8325_v45 }
0x12e2   :  { %5202 = vmatpush1.bf16.msra.mxu0 %v5094_v23  ;;  %5288 = vmatpush1.bf16.msra.mxu1 %v5096_v48  ;;  %v8327_v23 = vld [vmem:[#allocation68_spill] sm:$0xff]  ;;  %v8328_v48 = vld [vmem:[#allocation67_spill] sm:$0xff] }
0x12e3   :  { %5203 = vmatprep.subr.bf16.mxu0 %v5099_v7  ;;  %5289 = vmatprep.subr.bf16.mxu1 %v5101_v38  ;;  %v6148_v7 = vcombine.low %v8328_v48, %v8327_v23  ;;  %v8329_v38 = vld [vmem:[#allocation36_spill] sm:$0xff]  ;;  %v8350_v23 = vmax.f32 %v8071_v46, 0.0 }
0x12e6   :  { %5204 = vmatpush1.bf16.msra.mxu0 %v5098_v29  ;;  %5290 = vmatpush1.bf16.msra.mxu1 %v5100_v27  ;;  %v8330_v29 = vld [vmem:[#allocation35_spill] sm:$0xff] }
0x12e7   :  { %5205 = vmatprep.subr.bf16.mxu0 %v5103_v58  ;;  %5291 = vmatprep.subr.bf16.mxu1 %v5105_v8  ;;  %v6124_v27 = vcombine.low %v8330_v29, %v8329_v38  ;;  %v8331_v58 = vld [vmem:[#allocation58_spill] sm:$0xff]  ;;  %v8332_v8 = vld [vmem:[#allocation57_spill] sm:$0xff] }
0x12ea   :  { %5206 = vmatpush1.bf16.msra.mxu0 %v5102_v30  ;;  %5292 = vmatpush1.bf16.msra.mxu1 %v5104_v40  ;;  %v6140_v30 = vcombine.low %v8332_v8, %v8331_v58  ;;  %v8333_v40 = vld [vmem:[#allocation48_spill] sm:$0xff]  ;;  %v8352_v58 = vmax.f32 %v8075_v28, 0.0 }
0x12eb   :  { %6224 = vmatprep.subr.bf16.mxu0 %v6127_v32  ;;  %6246 = vmatprep.subr.bf16.mxu1 %v6143_v14  ;;  %v8334_v32 = vld [vmem:[#allocation47_spill] sm:$0xff] }
0x12ec   :  { %v6133_v14 = vcombine.low %v8334_v32, %v8333_v40  ;;  %v8355_v40 = vmax.f32 %v8100_v24, 0.0 }
0x12ed   :  { %5208 = vmatmul.mubr.bf16.vlgmr.msra.gmra.mrb[44].mxu0 %v8125_v43  ;;  %5294 = vmatmul.mubr.bf16.vlgmr.msra.gmra.mrb[48].mxu1 %v8125_v43  ;;  %v6131_v43 = vcombine.low %v8318_v6, %v8317_v5  ;;  %v5119_v5 = vrot.slane %v5110_v52, %v7821_v16  ;;  %v5127_v6 = vrot.slane %v5110_v52, %v7850_v60 }
0x12ee   :  { %6225 = vmatpush3.bf16.msra.mxu0 %v6119_v10  ;;  %6247 = vmatpush3.bf16.msra.mxu1 %v6135_v41  ;;  %v8335_v10 = vld [vmem:[#allocation70_spill] sm:$0xff]  ;;  %v8336_v41 = vld [vmem:[#allocation69_spill] sm:$0xff] }
0x12ef   :  { %6226 = vmatprep.subr.bf16.mxu0 %v6128_v13  ;;  %6248 = vmatprep.subr.bf16.mxu1 %v6144_v61  ;;  %v6149_v13 = vcombine.low %v8336_v41, %v8335_v10  ;;  %v8337_v61 = vld [vmem:[#allocation38_spill] sm:$0xff] }
0x12f2   :  { %6227 = vmatpush3.bf16.msra.mxu0 %v6120_v1  ;;  %6249 = vmatpush3.bf16.msra.mxu1 %v6136_v2  ;;  %v8338_v1 = vld [vmem:[#allocation37_spill] sm:$0xff] }
0x12f3   :  { %6228 = vmatprep.subr.bf16.mxu0 %v6129_v17  ;;  %6250 = vmatprep.subr.bf16.mxu1 %v6145_v18  ;;  %v6125_v2 = vcombine.low %v8338_v1, %v8337_v61  ;;  %v8339_v17 = vld [vmem:[#allocation60_spill] sm:$0xff]  ;;  %v8340_v18 = vld [vmem:[#allocation59_spill] sm:$0xff] }
0x12f6   :  { %6229 = vmatpush3.bf16.msra.mxu0 %v6121_v19  ;;  %6251 = vmatpush3.bf16.msra.mxu1 %v6137_v34  ;;  %v6141_v19 = vcombine.low %v8340_v18, %v8339_v17  ;;  %v6134_v34 = vcombine.low %v8342_v33, %v8341_v20 }
0x12f7   :  { %6230 = vmatprep.subr.bf16.mxu0 %v6130_v35  ;;  %6252 = vmatprep.subr.bf16.mxu1 %v6146_v50  ;;  %v6150_v35 = vcombine.low %v8344_v4, %v8343_v3  ;;  %v6126_v50 = vcombine.low %v8346_v49, %v8345_v36 }
0x12fa   :  { %6231 = vmatpush3.bf16.msra.mxu0 %v6122_v51  ;;  %6253 = vmatpush3.bf16.msra.mxu1 %v6138_v54  ;;  %v6142_v51 = vcombine.low %v8348_v22, %v8347_v21  ;;  %v5123_v54 = vrot.slane %v5110_v52, %v7869_v31 }
0x12fb   :  { %6232 = vmatprep.subr.bf16.mxu0 %v6131_v43  ;;  %6254 = vmatprep.subr.bf16.mxu1 %v6147_v44 }
0x12fe   :  { %6233 = vmatpush3.bf16.msra.mxu0 %v6123_v25  ;;  %6255 = vmatpush3.bf16.msra.mxu1 %v6139_v12 }
0x12ff   :  { %6234 = vmatprep.subr.bf16.mxu0 %v6132_v47  ;;  %6256 = vmatprep.subr.bf16.mxu1 %v6148_v7  ;;  %v8351_v7 = vmax.f32 %v8095_v39, 0.0 }
0x1302   :  { %6235 = vmatpush3.bf16.msra.mxu0 %v6124_v27  ;;  %6257 = vmatpush3.bf16.msra.mxu1 %v6140_v30 }
0x1303   :  { %6236 = vmatprep.subr.bf16.mxu0 %v6133_v14  ;;  %6258 = vmatprep.subr.bf16.mxu1 %v6149_v13 }
0x1306   :  { %6237 = vmatpush3.bf16.msra.mxu0 %v6125_v2  ;;  %6259 = vmatpush3.bf16.msra.mxu1 %v6141_v19  ;;  %v6118_v19 = vld [vmem:[#allocation9 + $0x2b] ss:$0 sm:$0xff] }
0x1307   :  { %6238 = vmatprep.subr.bf16.mxu0 %v6134_v34  ;;  %6260 = vmatprep.subr.bf16.mxu1 %v6150_v35 }
0x130a   :  { %6239 = vmatpush3.bf16.msra.mxu0 %v6126_v50  ;;  %6261 = vmatpush3.bf16.msra.mxu1 %v6142_v51 }
0x13c0   :  { %v5209_v43 = vpop.f32.mrb[44].mxu0  ;;  %v5295_v57 = vpop.f32.mrb[48].mxu1 }
0x13c1   :  { %v6404_v56 = vadd.f32 %v5209_v43, %v5115_v53  ;;  %v6408_v44 = vadd.f32 %v5295_v57, %v5123_v54  ;;  %v5211_v42 = vpop.f32.mrb[45].mxu0  ;;  %v5297_v62 = vpop.f32.mrb[49].mxu1 }
0x13c2   :  { %v6405_v25 = vadd.f32 %v5211_v42, %v5119_v5  ;;  %v6409_v26 = vadd.f32 %v5297_v62, %v5127_v6  ;;  %v5213_v37 = vpop.f32.mrb[46].mxu0  ;;  %v5299_v12 = vpop.f32.mrb[50].mxu1 }
0x13c3   :  { %v5304_v45 = vadd.f32 %v6404_v56, %v4636_v55  ;;  %v5306_v31 = vadd.f32 %v6408_v44, %v8349_v15  ;;  %v6406_v11 = vadd.f32 %v5213_v37, %v5115_v53  ;;  %v6410_v16 = vadd.f32 %v5299_v12, %v5123_v54  ;;  %v5215_v47 = vpop.f32.mrb[47].mxu0  ;;  %v5301_v60 = vpop.f32.mrb[51].mxu1 }
0x13c4   :  { %v5305_v48 = vadd.f32 %v6405_v25, %v8350_v23  ;;  %v5307_v38 = vadd.f32 %v6409_v26, %v8351_v7  ;;  %v6407_v29 = vadd.f32 %v5215_v47, %v5119_v5  ;;  %v6411_v27 = vadd.f32 %v5301_v60, %v5127_v6  ;;  %v5610_v53 = vpop.permute.xlu0 %5609 }
0x13c5   :  { %v5308_v8 = vadd.f32 %v6406_v11, %v8352_v58  ;;  %v5310_v55 = vadd.f32 %v6410_v16, %v8353_v0  ;;  %v5312_v14 = vmax.f32 %v5304_v45, 0.0  ;;  %v5314_v46 = vmax.f32 %v5306_v31, 0.0 }
0x13c6   :  { %v5309_v30 = vadd.f32 %v6407_v29, %v8354_v63  ;;  %v5311_v32 = vadd.f32 %v6411_v27, %v8355_v40  ;;  %v5313_v39 = vmax.f32 %v5305_v48, 0.0  ;;  %v5315_v13 = vmax.f32 %v5307_v38, 0.0 }
0x13c7   :  { %v5316_v10 = vmax.f32 %v5308_v8, 0.0  ;;  %v5318_v41 = vmax.f32 %v5310_v55, 0.0 }
0x13c8   :  { %v5317_v61 = vmax.f32 %v5309_v30, 0.0  ;;  %v5319_v1 = vmax.f32 %v5311_v32, 0.0 }
0x13c9   :  { %v5320_v2 = vpack.c.bf16 %v5316_v10, %v5312_v14  ;;  %v5322_v28 = vpack.c.bf16 %v5318_v41, %v5314_v46 }
0x13ca   :  { %v5321_v17 = vpack.c.bf16 %v5317_v61, %v5313_v39  ;;  %v5323_v18 = vpack.c.bf16 %v5319_v1, %v5315_v13 }
0x13cc   :  { %5555 = vmatprep.mubr.bf16.mxu0 %v5321_v17  ;;  %5596 = vmatprep.mubr.bf16.mxu1 %v5323_v18 }
0x13cd   :  { %5556 = vmatmul.mubr.bf16.vlgmr.msra.gmra.mrb[48].mxu0 %v5320_v2  ;;  %5597 = vmatmul.mubr.bf16.vlgmr.msra.gmra.mrb[52].mxu1 %v5322_v28 }
0x14a0   :  { %v6240_v59 = vpop.f32.mrb[48].mxu0  ;;  %v6262_v24 = vpop.f32.mrb[52].mxu1 }
0x14a1   :  { %v6241_v20 = vpop.f32.mrb[49].mxu0  ;;  %v6263_v33 = vpop.f32.mrb[53].mxu1 }
0x14a2   :  { %v6242_v34 = vadd.f32 %v6241_v20, %v6240_v59  ;;  %v6264_v3 = vadd.f32 %v6263_v33, %v6262_v24  ;;  %v6243_v4 = vpop.f32.mrb[50].mxu0  ;;  %v6265_v35 = vpop.f32.mrb[54].mxu1 }
0x14a3   :  { %v6244_v36 = vpop.f32.mrb[51].mxu0  ;;  %v6266_v49 = vpop.f32.mrb[55].mxu1 }
0x14a4   :  { %v5558_v50 = vadd.f32 %v6242_v34, %v6118_v19  ;;  %v6245_v21 = vadd.f32 %v6244_v36, %v6243_v4  ;;  %v6267_v22 = vadd.f32 %v6266_v49, %v6265_v35 }
0x14a6   :  { %v5599_v51 = vadd.f32 %v6264_v3, %v5558_v50  ;;  %v5561_v52 = vadd.f32 %v6245_v21, %v6118_v19 }
0x14a8   :  { %v5602_v54 = vadd.f32 %v6267_v22, %v5561_v52  ;;  %v5614_v5 = vsel %vm5613_vm5, %v5599_v51, %v5608_v9 }
0x14a9   :  { %v5617_v6 = vsel %vm5616_vm6, %v5614_v5, 0.0 }
0x14aa   :  { %5619 = vst [vmem:[#allocation15] sm:$0xff] %v5617_v6  ;;  %v5615_v43 = vsel %vm5613_vm5, %v5602_v54, %v5610_v53 }
0x14ab   :  { %v5618_v57 = vsel %vm5616_vm6, %v5615_v43, 0.0 }
0x14ac   :  { %5620 = vst [vmem:[#allocation15 + $0x8] sm:$0xff] %v5618_v57 }
0x14ad   :  { %7275 = shalt.err (!%p7272_p10)
}
0x14ae   :  { %s7276_s20 = scalar_lea.hbm %s8238_s10, 256 }
0x14af   :  { %p7277_p11 = scmp.ne.s32.totalorder %s8238_s10, %s7276_s20  ;;  %p7280_p12 = scmp.lt.u32.totalorder %s7276_s20, %s8238_s10 }
0x14b1   :  { %p7282_p13 = pnand %p7280_p12, %p7277_p11 }
0x14b3   :  { %7285 = shalt.err (!%p7282_p13)
}
0x14b4   :  { %5632 = dma.vmem_to_hbm [thread:$0]  %s5627_s23, 256, %s8238_s10, [#allocation8], %s7303_s14, %s7303_s14, %s7304_s17  }
0x14b5   :  { %7298 = dma.done.wait [#allocation8], 256  }
0x14b6   :  { %7299 = vsyncadd [#allocation8], 4294967040 }
0x14b7   :  { %5636 = vsyncpa [#allocation7], 1 }
0x14b8   :  { %5637 = vsyncpa [#allocation10], 1 }
0x14b9   :  { %5638 = vsyncpa [#allocation13], 1 }
0x14ba   :  { %5639 = vsyncpa [#allocation8], 1 }
0x14bb   :  { %5640 = vsyncmov [#allocation5] }
0x14be   :  { %s5641_s22 = vpop.sfrf %5640 }
0x14bf   :  { %p6151_p0 = scmp.ne.s32.totalorder %s5641_s22, 0 }
0x14c1   :  { %5645 = shalt.err (%p6151_p0)  }
0x14c2   :  { %5647 = vsyncmov [#allocation5 + $0x1] }
0x14c5   :  { %s5648_s11 = vpop.sfrf %5647 }
0x14c6   :  { %p6152_p1 = scmp.ne.s32.totalorder %s5648_s11, 0 }
0x14c8   :  { %5652 = shalt.err (%p6152_p1)  }
0x14c9   :  { %5654 = vsyncmov [#allocation5 + $0x2] }
0x14cc   :  { %s5655_s3 = vpop.sfrf %5654 }
0x14cd   :  { %p6153_p2 = scmp.ne.s32.totalorder %s5655_s3, 0 }
0x14cf   :  { %5659 = shalt.err (%p6153_p2)  }

</bundles_post_ra>
